<compile_context>
chip_gen: v7x
topology: tpu7x:2x2x1
jax: 0.10.0
libtpu: 0.0.40
codegen_flags: <defaults>
</compile_context>

<pallas_src>
import jax
import jax.numpy as jnp
from jax.experimental import pallas as pl
from jax.experimental.pallas import tpu as pltpu


def _deconv_kernel(x_ref, w_ref, b_ref, o_ref):
    # x_ref: (R*W, C_in)           input pixels, channels-last
    # w_ref: (kH, C_in, kW*C_out)  packed ConvTranspose2d weight
    # b_ref: (1, kW*C_out)         bias tiled over kw
    # o_ref: (R, kH, W, kW*C_out)  output block (kh already between rows and W)
    R, KH, W, L = o_ref.shape
    TM, K = x_ref.shape
    x = x_ref[...]
    b = b_ref[...].astype(jnp.float32)
    for kh in range(KH):
        w_kh = w_ref[kh]                                   # (K, L)
        if K <= 8:
            # Tiny contraction: K broadcast-FMA terms on the VPU (the MXU
            # would be >98% idle at K=4).
            acc = jnp.zeros((TM, L), dtype=jnp.float32)
            for c in range(K):
                acc = acc + (x[:, c:c + 1].astype(jnp.float32)
                             * w_kh[c:c + 1, :].astype(jnp.float32))
        else:
            acc = jnp.dot(x, w_kh, preferred_element_type=jnp.float32)
        acc = acc + b
        o_ref[:, kh:kh + 1, :, :] = acc.reshape(R, 1, W, L).astype(o_ref.dtype)


def deconv_block(x_nchw, weight, bias, *, tile_rows=512,
                 vmem_budget_bytes=40 * 1024 * 1024):
    """ConvTranspose2d(in_c, out_c, kernel_size=2, stride=2, padding=0) forward.

    x_nchw: (N, in_c, H, W)       (PyTorch NCHW layout)
    weight: (in_c, out_c, 2, 2)   (PyTorch ConvTranspose2d layout)
    bias:   (out_c,)
    returns (N, out_c, 2H, 2W)    (PyTorch NCHW layout)
    """
    N, C_in, H, W = x_nchw.shape
    w_cin, C_out, kH, kW = weight.shape
    assert w_cin == C_in and (kH, kW) == (2, 2), (weight.shape, C_in)
    out_dtype = x_nchw.dtype
    L = kW * C_out                                   # lane dim of each store

    # ---- pack parameters for channels-last compute --------------------------
    # w_mat[kh, c, kw*C_out + oc] = weight[c, oc, kh, kw]
    w_mat = jnp.transpose(weight, (2, 0, 3, 1)).reshape(kH, C_in, L)
    w_mat = w_mat.astype(x_nchw.dtype)
    # bias broadcast over kw, laid out to match the (kw, oc) column order
    b_mat = jnp.tile(bias, (kW,)).reshape(1, L).astype(jnp.float32)

    # ---- input: one standard NCHW -> NHWC transpose (input is 4x smaller than
    # the output).
    # TODO(synk): if the surrounding network is channels-last, accept NHWC
    # directly and drop both boundary transposes entirely.
    x_nhwc = jnp.transpose(x_nchw, (0, 2, 3, 1))      # (N, H, W, C_in)
    Wp = W if W % 8 == 0 else W + (8 - W % 8)         # sublane-align the W axis
    if Wp != W:
        x_nhwc = jnp.pad(x_nhwc, ((0, 0), (0, 0), (0, Wp - W), (0, 0)))

    NH = N * H

    # ---- tile-size selection -------------------------------------------------
    def _step_vmem_bytes(r):
        xb = r * Wp * C_in * 4                        # x tile   (double-buffered)
        ob = r * kH * Wp * L * 4                      # out tile (double-buffered)
        wb = kH * C_in * L * 4                        # resident weight
        return 2 * (xb + ob) + wb + 4 * L

    R = max(1, tile_rows // Wp)                       # (n, h) rows per grid step
    while R > 1 and _step_vmem_bytes(R) > vmem_budget_bytes:
        R //= 2                                       # stay inside v7x's 64 MiB VMEM
    if NH >= 2:
        R = min(R, (NH + 1) // 2)                     # >= 2 steps -> megacore can split
    R = max(1, min(R, NH))
    NHp = ((NH + R - 1) // R) * R                     # pad rows to whole tiles
    grid = NHp // R

    x_flat = x_nhwc.reshape(NH * Wp, C_in)
    if NHp != NH:
        x_flat = jnp.pad(x_flat, ((0, (NHp - NH) * Wp), (0, 0)))

    vmem_limit = int(min(64 * 1024 * 1024,
                         max(_step_vmem_bytes(R) + (8 << 20), 32 * 1024 * 1024)))
    cost = pl.CostEstimate(
        flops=2 * NH * W * C_in * kH * L,
        transcendentals=0,
        bytes_accessed=int(x_flat.size * x_flat.dtype.itemsize
                           + w_mat.size * w_mat.dtype.itemsize
                           + b_mat.size * 4
                           + NHp * kH * Wp * L * jnp.dtype(out_dtype).itemsize),
    )

    def _call(single_buffer_params):
        # Weight / bias never change across the grid; single-buffer them so the
        # freed VMEM goes to bigger data tiles (matters most on v7x).
        opt = {"pipeline_mode": pl.Buffered(1)} if single_buffer_params else {}
        grid_spec = pltpu.PrefetchScalarGridSpec(
            num_scalar_prefetch=0,
            grid=(grid,),
            in_specs=[
                pl.BlockSpec((R * Wp, C_in), lambda i: (i, 0)),
                pl.BlockSpec((kH, C_in, L), lambda i: (0, 0, 0), **opt),
                pl.BlockSpec((1, L), lambda i: (0, 0), **opt),
            ],
            out_specs=pl.BlockSpec((R, kH, Wp, L), lambda i: (i, 0, 0, 0)),
        )
        return pl.pallas_call(
            _deconv_kernel,
            out_shape=jax.ShapeDtypeStruct((NHp, kH, Wp, L), out_dtype),
            grid_spec=grid_spec,
            compiler_params=pltpu.CompilerParams(
                dimension_semantics=("parallel",),
                vmem_limit_bytes=vmem_limit),
            cost_estimate=cost,
        )(x_flat, w_mat, b_mat)

    try:
        out_arr = _call(True)
    except Exception:
        # Fallback if this Pallas version rejects pipeline_mode=pl.Buffered(1).
        out_arr = _call(False)

    out_arr = out_arr[:NH, :, :W, :]                       # drop row / W padding
    out_nhwc = out_arr.reshape(N, H * kH, W * kW, C_out)   # pure reshape -> NHWC
    return jnp.transpose(out_nhwc, (0, 3, 1, 2))           # NHWC -> NCHW (torch layout)


def _reference_deconv(x_nchw, weight, bias):
    # Pure-JAX reference using the same mathematical identity (for verification).
    N, C_in, H, W = x_nchw.shape
    _, C_out, kH, kW = weight.shape
    y = jnp.einsum("nihw,iokl->nohkwl", x_nchw, weight) \
        + bias[None, :, None, None, None, None]
    return y.reshape(N, C_out, H * kH, W * kW)


if __name__ == "__main__":
    key = jax.random.PRNGKey(0)
    k_x, k_w, k_b = jax.random.split(key, 3)

    N, in_c, H, W = 2, 4, 16, 16
    out_c = 8

    x = jax.random.normal(k_x, (N, in_c, H, W), dtype=jnp.float32)
    # Deterministic synthetic parameters (shapes match nn.ConvTranspose2d(in_c, out_c, 2, 2)).
    weight = jax.random.normal(k_w, (in_c, out_c, 2, 2), dtype=jnp.float32) * 0.1
    bias = jax.random.normal(k_b, (out_c,), dtype=jnp.float32) * 0.1

    y = jax.block_until_ready(deconv_block(x, weight, bias))

    y_ref = _reference_deconv(x, weight, bias)
    assert y.shape == (N, out_c, 2 * H, 2 * W), y.shape
    assert jnp.allclose(y, y_ref, atol=1e-5, rtol=1e-5), "mismatch vs reference"

    print("KERNEL_OK")
</pallas_src>

<mosaic_0001>
module attributes {stable_mosaic.version = 11 : i64} {
  func.func @_deconv_kernel(%arg0: i32, %arg1: memref<256x4xf32, #tpu.memory_space<vmem>>, %arg2: memref<2x4x16xf32, #tpu.memory_space<vmem>>, %arg3: memref<1x16xf32, #tpu.memory_space<vmem>>, %arg4: memref<16x2x16x16xf32, #tpu.memory_space<vmem>>) attributes {dimension_semantics = [#tpu.dimension_semantics<parallel>], iteration_bounds = array<i64: 2>, scalar_prefetch = 0 : i64, scratch_operands = 0 : i64, tpu.core_type = #tpu.core_type<tc>, window_params = [{transform_indices = @transform_0, window_bounds = array<i64: 256, 4>}, {pipeline_mode = #tpu.pipeline_mode<synchronous>, transform_indices = @transform_1, window_bounds = array<i64: 2, 4, 16>}, {pipeline_mode = #tpu.pipeline_mode<synchronous>, transform_indices = @transform_2, window_bounds = array<i64: 1, 16>}, {transform_indices = @transform_3, window_bounds = array<i64: 16, 2, 16, 16>}]} {
    %c0 = arith.constant 0 : index
    %c0_0 = arith.constant 0 : index
    %0 = vector.load %arg1[%c0, %c0_0] : memref<256x4xf32, #tpu.memory_space<vmem>>, vector<256x4xf32>
    %c0_1 = arith.constant 0 : index
    %c0_2 = arith.constant 0 : index
    %1 = vector.load %arg3[%c0_1, %c0_2] : memref<1x16xf32, #tpu.memory_space<vmem>>, vector<1x16xf32>
    %c0_3 = arith.constant 0 : index
    %c0_4 = arith.constant 0 : index
    %c0_5 = arith.constant 0 : index
    %2 = vector.load %arg2[%c0_3, %c0_4, %c0_5] : memref<2x4x16xf32, #tpu.memory_space<vmem>>, vector<1x4x16xf32>
    %3 = vector.shape_cast %2 : vector<1x4x16xf32> to vector<4x16xf32>
    %cst = arith.constant 0.000000e+00 : f32
    %4 = vector.broadcast %cst : f32 to vector<256x16xf32>
    %5 = vector.extract_strided_slice %0 {offsets = [0, 0], sizes = [256, 1], strides = [1, 1]} : vector<256x4xf32> to vector<256x1xf32>
    %6 = vector.extract_strided_slice %3 {offsets = [0, 0], sizes = [1, 16], strides = [1, 1]} : vector<4x16xf32> to vector<1x16xf32>
    %7 = vector.broadcast %5 : vector<256x1xf32> to vector<256x16xf32>
    %8 = vector.broadcast %6 : vector<1x16xf32> to vector<256x16xf32>
    %9 = arith.mulf %7, %8 : vector<256x16xf32>
    %10 = arith.addf %4, %9 : vector<256x16xf32>
    %11 = vector.extract_strided_slice %0 {offsets = [0, 1], sizes = [256, 1], strides = [1, 1]} : vector<256x4xf32> to vector<256x1xf32>
    %12 = vector.extract_strided_slice %3 {offsets = [1, 0], sizes = [1, 16], strides = [1, 1]} : vector<4x16xf32> to vector<1x16xf32>
    %13 = vector.broadcast %11 : vector<256x1xf32> to vector<256x16xf32>
    %14 = vector.broadcast %12 : vector<1x16xf32> to vector<256x16xf32>
    %15 = arith.mulf %13, %14 : vector<256x16xf32>
    %16 = arith.addf %10, %15 : vector<256x16xf32>
    %17 = vector.extract_strided_slice %0 {offsets = [0, 2], sizes = [256, 1], strides = [1, 1]} : vector<256x4xf32> to vector<256x1xf32>
    %18 = vector.extract_strided_slice %3 {offsets = [2, 0], sizes = [1, 16], strides = [1, 1]} : vector<4x16xf32> to vector<1x16xf32>
    %19 = vector.broadcast %17 : vector<256x1xf32> to vector<256x16xf32>
    %20 = vector.broadcast %18 : vector<1x16xf32> to vector<256x16xf32>
    %21 = arith.mulf %19, %20 : vector<256x16xf32>
    %22 = arith.addf %16, %21 : vector<256x16xf32>
    %23 = vector.extract_strided_slice %0 {offsets = [0, 3], sizes = [256, 1], strides = [1, 1]} : vector<256x4xf32> to vector<256x1xf32>
    %24 = vector.extract_strided_slice %3 {offsets = [3, 0], sizes = [1, 16], strides = [1, 1]} : vector<4x16xf32> to vector<1x16xf32>
    %25 = vector.broadcast %23 : vector<256x1xf32> to vector<256x16xf32>
    %26 = vector.broadcast %24 : vector<1x16xf32> to vector<256x16xf32>
    %27 = arith.mulf %25, %26 : vector<256x16xf32>
    %28 = arith.addf %22, %27 : vector<256x16xf32>
    %29 = vector.broadcast %1 : vector<1x16xf32> to vector<256x16xf32>
    %30 = arith.addf %28, %29 : vector<256x16xf32>
    %31 = vector.shape_cast %30 : vector<256x16xf32> to vector<16x1x16x16xf32>
    %c0_6 = arith.constant 0 : index
    %c0_7 = arith.constant 0 : index
    %c0_8 = arith.constant 0 : index
    %c0_9 = arith.constant 0 : index
    %32 = vector.load %arg4[%c0_6, %c0_7, %c0_8, %c0_9] : memref<16x2x16x16xf32, #tpu.memory_space<vmem>>, vector<16x1x16x16xf32>
    tpu.vector_store %arg4[%c0_6, %c0_7, %c0_8, %c0_9], %31 {strides = array<i32>} : memref<16x2x16x16xf32, #tpu.memory_space<vmem>>, vector<16x1x16x16xf32>,
    %c1 = arith.constant 1 : index
    %c0_10 = arith.constant 0 : index
    %c0_11 = arith.constant 0 : index
    %33 = vector.load %arg2[%c1, %c0_10, %c0_11] : memref<2x4x16xf32, #tpu.memory_space<vmem>>, vector<1x4x16xf32>
    %34 = vector.shape_cast %33 : vector<1x4x16xf32> to vector<4x16xf32>
    %cst_12 = arith.constant 0.000000e+00 : f32
    %35 = vector.broadcast %cst_12 : f32 to vector<256x16xf32>
    %36 = vector.extract_strided_slice %0 {offsets = [0, 0], sizes = [256, 1], strides = [1, 1]} : vector<256x4xf32> to vector<256x1xf32>
    %37 = vector.extract_strided_slice %34 {offsets = [0, 0], sizes = [1, 16], strides = [1, 1]} : vector<4x16xf32> to vector<1x16xf32>
    %38 = vector.broadcast %36 : vector<256x1xf32> to vector<256x16xf32>
    %39 = vector.broadcast %37 : vector<1x16xf32> to vector<256x16xf32>
    %40 = arith.mulf %38, %39 : vector<256x16xf32>
    %41 = arith.addf %35, %40 : vector<256x16xf32>
    %42 = vector.extract_strided_slice %0 {offsets = [0, 1], sizes = [256, 1], strides = [1, 1]} : vector<256x4xf32> to vector<256x1xf32>
    %43 = vector.extract_strided_slice %34 {offsets = [1, 0], sizes = [1, 16], strides = [1, 1]} : vector<4x16xf32> to vector<1x16xf32>
    %44 = vector.broadcast %42 : vector<256x1xf32> to vector<256x16xf32>
    %45 = vector.broadcast %43 : vector<1x16xf32> to vector<256x16xf32>
    %46 = arith.mulf %44, %45 : vector<256x16xf32>
    %47 = arith.addf %41, %46 : vector<256x16xf32>
    %48 = vector.extract_strided_slice %0 {offsets = [0, 2], sizes = [256, 1], strides = [1, 1]} : vector<256x4xf32> to vector<256x1xf32>
    %49 = vector.extract_strided_slice %34 {offsets = [2, 0], sizes = [1, 16], strides = [1, 1]} : vector<4x16xf32> to vector<1x16xf32>
    %50 = vector.broadcast %48 : vector<256x1xf32> to vector<256x16xf32>
    %51 = vector.broadcast %49 : vector<1x16xf32> to vector<256x16xf32>
    %52 = arith.mulf %50, %51 : vector<256x16xf32>
    %53 = arith.addf %47, %52 : vector<256x16xf32>
    %54 = vector.extract_strided_slice %0 {offsets = [0, 3], sizes = [256, 1], strides = [1, 1]} : vector<256x4xf32> to vector<256x1xf32>
    %55 = vector.extract_strided_slice %34 {offsets = [3, 0], sizes = [1, 16], strides = [1, 1]} : vector<4x16xf32> to vector<1x16xf32>
    %56 = vector.broadcast %54 : vector<256x1xf32> to vector<256x16xf32>
    %57 = vector.broadcast %55 : vector<1x16xf32> to vector<256x16xf32>
    %58 = arith.mulf %56, %57 : vector<256x16xf32>
    %59 = arith.addf %53, %58 : vector<256x16xf32>
    %60 = vector.broadcast %1 : vector<1x16xf32> to vector<256x16xf32>
    %61 = arith.addf %59, %60 : vector<256x16xf32>
    %62 = vector.shape_cast %61 : vector<256x16xf32> to vector<16x1x16x16xf32>
    %c0_13 = arith.constant 0 : index
    %c1_14 = arith.constant 1 : index
    %c0_15 = arith.constant 0 : index
    %c0_16 = arith.constant 0 : index
    %63 = vector.load %arg4[%c0_13, %c1_14, %c0_15, %c0_16] : memref<16x2x16x16xf32, #tpu.memory_space<vmem>>, vector<16x1x16x16xf32>
    tpu.vector_store %arg4[%c0_13, %c1_14, %c0_15, %c0_16], %62 {strides = array<i32>} : memref<16x2x16x16xf32, #tpu.memory_space<vmem>>, vector<16x1x16x16xf32>,
    return
  }
  func.func @transform_0(%arg0: i32) -> (i32, i32) {
    %c0_i32 = arith.constant 0 : i32
    %c0_i32_0 = arith.constant 0 : i32
    return %arg0, %c0_i32 : i32, i32
  }
  func.func @transform_1(%arg0: i32) -> (i32, i32, i32) {
    %c0_i32 = arith.constant 0 : i32
    %c0_i32_0 = arith.constant 0 : i32
    %c0_i32_1 = arith.constant 0 : i32
    %c0_i32_2 = arith.constant 0 : i32
    return %c0_i32, %c0_i32_0, %c0_i32_1 : i32, i32, i32
  }
  func.func @transform_2(%arg0: i32) -> (i32, i32) {
    %c0_i32 = arith.constant 0 : i32
    %c0_i32_0 = arith.constant 0 : i32
    %c0_i32_1 = arith.constant 0 : i32
    return %c0_i32, %c0_i32_0 : i32, i32
  }
  func.func @transform_3(%arg0: i32) -> (i32, i32, i32, i32) {
    %c0_i32 = arith.constant 0 : i32
    %c0_i32_0 = arith.constant 0 : i32
    %c0_i32_1 = arith.constant 0 : i32
    %c0_i32_2 = arith.constant 0 : i32
    return %arg0, %c0_i32, %c0_i32_0, %c0_i32_1 : i32, i32, i32, i32
  }
}

module attributes {stable_mosaic.version = 11 : i64} {
  func.func @_deconv_kernel(%arg0: i32, %arg1: memref<256x4xf32, #tpu.memory_space<vmem>>, %arg2: memref<2x4x16xf32, #tpu.memory_space<vmem>>, %arg3: memref<1x16xf32, #tpu.memory_space<vmem>>, %arg4: memref<16x2x16x16xf32, #tpu.memory_space<vmem>>) attributes {dimension_semantics = [#tpu.dimension_semantics<parallel>], iteration_bounds = array<i64: 2>, scalar_prefetch = 0 : i64, scratch_operands = 0 : i64, tpu.core_type = #tpu.core_type<tc>, window_params = [{transform_indices = @transform_0, window_bounds = array<i64: 256, 4>}, {pipeline_mode = #tpu.pipeline_mode<synchronous>, transform_indices = @transform_1, window_bounds = array<i64: 2, 4, 16>}, {pipeline_mode = #tpu.pipeline_mode<synchronous>, transform_indices = @transform_2, window_bounds = array<i64: 1, 16>}, {transform_indices = @transform_3, window_bounds = array<i64: 16, 2, 16, 16>}]} {
    %c0 = arith.constant 0 : index
    %c0_0 = arith.constant 0 : index
    %0 = vector.load %arg1[%c0, %c0_0] : memref<256x4xf32, #tpu.memory_space<vmem>>, vector<256x4xf32>
    %c0_1 = arith.constant 0 : index
    %c0_2 = arith.constant 0 : index
    %1 = vector.load %arg3[%c0_1, %c0_2] : memref<1x16xf32, #tpu.memory_space<vmem>>, vector<1x16xf32>
    %c0_3 = arith.constant 0 : index
    %c0_4 = arith.constant 0 : index
    %c0_5 = arith.constant 0 : index
    %2 = vector.load %arg2[%c0_3, %c0_4, %c0_5] : memref<2x4x16xf32, #tpu.memory_space<vmem>>, vector<1x4x16xf32>
    %3 = vector.shape_cast %2 : vector<1x4x16xf32> to vector<4x16xf32>
    %cst = arith.constant 0.000000e+00 : f32
    %4 = vector.broadcast %cst : f32 to vector<256x16xf32>
    %5 = vector.extract_strided_slice %0 {offsets = [0, 0], sizes = [256, 1], strides = [1, 1]} : vector<256x4xf32> to vector<256x1xf32>
    %6 = vector.extract_strided_slice %3 {offsets = [0, 0], sizes = [1, 16], strides = [1, 1]} : vector<4x16xf32> to vector<1x16xf32>
    %7 = vector.broadcast %5 : vector<256x1xf32> to vector<256x16xf32>
    %8 = vector.broadcast %6 : vector<1x16xf32> to vector<256x16xf32>
    %9 = arith.mulf %7, %8 : vector<256x16xf32>
    %10 = arith.addf %4, %9 : vector<256x16xf32>
    %11 = vector.extract_strided_slice %0 {offsets = [0, 1], sizes = [256, 1], strides = [1, 1]} : vector<256x4xf32> to vector<256x1xf32>
    %12 = vector.extract_strided_slice %3 {offsets = [1, 0], sizes = [1, 16], strides = [1, 1]} : vector<4x16xf32> to vector<1x16xf32>
    %13 = vector.broadcast %11 : vector<256x1xf32> to vector<256x16xf32>
    %14 = vector.broadcast %12 : vector<1x16xf32> to vector<256x16xf32>
    %15 = arith.mulf %13, %14 : vector<256x16xf32>
    %16 = arith.addf %10, %15 : vector<256x16xf32>
    %17 = vector.extract_strided_slice %0 {offsets = [0, 2], sizes = [256, 1], strides = [1, 1]} : vector<256x4xf32> to vector<256x1xf32>
    %18 = vector.extract_strided_slice %3 {offsets = [2, 0], sizes = [1, 16], strides = [1, 1]} : vector<4x16xf32> to vector<1x16xf32>
    %19 = vector.broadcast %17 : vector<256x1xf32> to vector<256x16xf32>
    %20 = vector.broadcast %18 : vector<1x16xf32> to vector<256x16xf32>
    %21 = arith.mulf %19, %20 : vector<256x16xf32>
    %22 = arith.addf %16, %21 : vector<256x16xf32>
    %23 = vector.extract_strided_slice %0 {offsets = [0, 3], sizes = [256, 1], strides = [1, 1]} : vector<256x4xf32> to vector<256x1xf32>
    %24 = vector.extract_strided_slice %3 {offsets = [3, 0], sizes = [1, 16], strides = [1, 1]} : vector<4x16xf32> to vector<1x16xf32>
    %25 = vector.broadcast %23 : vector<256x1xf32> to vector<256x16xf32>
    %26 = vector.broadcast %24 : vector<1x16xf32> to vector<256x16xf32>
    %27 = arith.mulf %25, %26 : vector<256x16xf32>
    %28 = arith.addf %22, %27 : vector<256x16xf32>
    %29 = vector.broadcast %1 : vector<1x16xf32> to vector<256x16xf32>
    %30 = arith.addf %28, %29 : vector<256x16xf32>
    %31 = vector.shape_cast %30 : vector<256x16xf32> to vector<16x1x16x16xf32>
    %c0_6 = arith.constant 0 : index
    %c0_7 = arith.constant 0 : index
    %c0_8 = arith.constant 0 : index
    %c0_9 = arith.constant 0 : index
    %32 = vector.load %arg4[%c0_6, %c0_7, %c0_8, %c0_9] : memref<16x2x16x16xf32, #tpu.memory_space<vmem>>, vector<16x1x16x16xf32>
    tpu.vector_store %arg4[%c0_6, %c0_7, %c0_8, %c0_9], %31 {strides = array<i32>} : memref<16x2x16x16xf32, #tpu.memory_space<vmem>>, vector<16x1x16x16xf32>,
    %c1 = arith.constant 1 : index
    %c0_10 = arith.constant 0 : index
    %c0_11 = arith.constant 0 : index
    %33 = vector.load %arg2[%c1, %c0_10, %c0_11] : memref<2x4x16xf32, #tpu.memory_space<vmem>>, vector<1x4x16xf32>
    %34 = vector.shape_cast %33 : vector<1x4x16xf32> to vector<4x16xf32>
    %cst_12 = arith.constant 0.000000e+00 : f32
    %35 = vector.broadcast %cst_12 : f32 to vector<256x16xf32>
    %36 = vector.extract_strided_slice %0 {offsets = [0, 0], sizes = [256, 1], strides = [1, 1]} : vector<256x4xf32> to vector<256x1xf32>
    %37 = vector.extract_strided_slice %34 {offsets = [0, 0], sizes = [1, 16], strides = [1, 1]} : vector<4x16xf32> to vector<1x16xf32>
    %38 = vector.broadcast %36 : vector<256x1xf32> to vector<256x16xf32>
    %39 = vector.broadcast %37 : vector<1x16xf32> to vector<256x16xf32>
    %40 = arith.mulf %38, %39 : vector<256x16xf32>
    %41 = arith.addf %35, %40 : vector<256x16xf32>
    %42 = vector.extract_strided_slice %0 {offsets = [0, 1], sizes = [256, 1], strides = [1, 1]} : vector<256x4xf32> to vector<256x1xf32>
    %43 = vector.extract_strided_slice %34 {offsets = [1, 0], sizes = [1, 16], strides = [1, 1]} : vector<4x16xf32> to vector<1x16xf32>
    %44 = vector.broadcast %42 : vector<256x1xf32> to vector<256x16xf32>
    %45 = vector.broadcast %43 : vector<1x16xf32> to vector<256x16xf32>
    %46 = arith.mulf %44, %45 : vector<256x16xf32>
    %47 = arith.addf %41, %46 : vector<256x16xf32>
    %48 = vector.extract_strided_slice %0 {offsets = [0, 2], sizes = [256, 1], strides = [1, 1]} : vector<256x4xf32> to vector<256x1xf32>
    %49 = vector.extract_strided_slice %34 {offsets = [2, 0], sizes = [1, 16], strides = [1, 1]} : vector<4x16xf32> to vector<1x16xf32>
    %50 = vector.broadcast %48 : vector<256x1xf32> to vector<256x16xf32>
    %51 = vector.broadcast %49 : vector<1x16xf32> to vector<256x16xf32>
    %52 = arith.mulf %50, %51 : vector<256x16xf32>
    %53 = arith.addf %47, %52 : vector<256x16xf32>
    %54 = vector.extract_strided_slice %0 {offsets = [0, 3], sizes = [256, 1], strides = [1, 1]} : vector<256x4xf32> to vector<256x1xf32>
    %55 = vector.extract_strided_slice %34 {offsets = [3, 0], sizes = [1, 16], strides = [1, 1]} : vector<4x16xf32> to vector<1x16xf32>
    %56 = vector.broadcast %54 : vector<256x1xf32> to vector<256x16xf32>
    %57 = vector.broadcast %55 : vector<1x16xf32> to vector<256x16xf32>
    %58 = arith.mulf %56, %57 : vector<256x16xf32>
    %59 = arith.addf %53, %58 : vector<256x16xf32>
    %60 = vector.broadcast %1 : vector<1x16xf32> to vector<256x16xf32>
    %61 = arith.addf %59, %60 : vector<256x16xf32>
    %62 = vector.shape_cast %61 : vector<256x16xf32> to vector<16x1x16x16xf32>
    %c0_13 = arith.constant 0 : index
    %c1_14 = arith.constant 1 : index
    %c0_15 = arith.constant 0 : index
    %c0_16 = arith.constant 0 : index
    %63 = vector.load %arg4[%c0_13, %c1_14, %c0_15, %c0_16] : memref<16x2x16x16xf32, #tpu.memory_space<vmem>>, vector<16x1x16x16xf32>
    tpu.vector_store %arg4[%c0_13, %c1_14, %c0_15, %c0_16], %62 {strides = array<i32>} : memref<16x2x16x16xf32, #tpu.memory_space<vmem>>, vector<16x1x16x16xf32>,
    return
  }
  func.func @transform_0(%arg0: i32) -> (i32, i32) {
    %c0_i32 = arith.constant 0 : i32
    %c0_i32_0 = arith.constant 0 : i32
    return %arg0, %c0_i32 : i32, i32
  }
  func.func @transform_1(%arg0: i32) -> (i32, i32, i32) {
    %c0_i32 = arith.constant 0 : i32
    %c0_i32_0 = arith.constant 0 : i32
    %c0_i32_1 = arith.constant 0 : i32
    %c0_i32_2 = arith.constant 0 : i32
    return %c0_i32, %c0_i32_0, %c0_i32_1 : i32, i32, i32
  }
  func.func @transform_2(%arg0: i32) -> (i32, i32) {
    %c0_i32 = arith.constant 0 : i32
    %c0_i32_0 = arith.constant 0 : i32
    %c0_i32_1 = arith.constant 0 : i32
    return %c0_i32, %c0_i32_0 : i32, i32
  }
  func.func @transform_3(%arg0: i32) -> (i32, i32, i32, i32) {
    %c0_i32 = arith.constant 0 : i32
    %c0_i32_0 = arith.constant 0 : i32
    %c0_i32_1 = arith.constant 0 : i32
    %c0_i32_2 = arith.constant 0 : i32
    return %arg0, %c0_i32, %c0_i32_0, %c0_i32_1 : i32, i32, i32, i32
  }
}

</mosaic_0001>

<bundles_post_ra>
// kernel: tpu_custom_call.1
= control target key start
LH: loop header
LB: loop body
LE: loop exit
PB: predicated region body
PF: predicated region fallthrough
CT: control target
= control target key end

     0   :  { %s1593_s12 = smov 0   ;;  %s2960_s0 = inlined_call_operand.vmem [shape: f32[512,4], index: 0, kind: input, shape index: {}]   ;;  %s2961_s1 = inlined_call_operand.vmem [shape: f32[2,4,16], index: 1, kind: input, shape index: {}]   ;;  %s2962_s2 = inlined_call_operand.vmem [shape: f32[1,16], index: 2, kind: input, shape index: {}]   ;;  %s2963_s3 = inlined_call_operand.vmem [shape: f32[32,2,16,16], index: 3, kind: output, shape index: {}]  }
   0x1 LB: > { %s1494_s13 = sadd.s32 4294967295, %s1567_s12   ;;  %p1498_p0 = scmp.ge.s32.totalorder %s1567_s12, 1  ;;  %s1567_s12 = sphi %s1593_s12, %s13_s12  }
   0x2   : > { %p138_p1 = scmp.lt.s32.totalorder %s1567_s12, 3 }
   0x4   : > { %p139_p2 = pnand %p1498_p0, %p138_p1 }
   0x6   : > { %142 = sbr.rel (%p139_p2) target bundleno = 415 (0x19f), region = 32 }
   0xd   : > { %s1499_s14 = sshll.u32 %s1494_s13, 5  ;;  %v1569_v0 = vmov 0   ;;  %v1570_v33 = vmov 1   ;;  %v1571_v36 = vmov 2   ;;  %v370_v57 = vlaneseq  ;;  %s2420_s23 = sshll.u32 %s1494_s13, 4 }
   0xe   : > { %1554 = vset.pattern.permute.xlu1 %v1569_v0  ;;  %1553 = vset.pattern.permute.xlu0 %v1569_v0  ;;  %p164_p3 = scmp.lt.s32.totalorder %s1499_s14, 63  ;;  %v1852_v0 = vld [vmem:[%s2961_s1] sm:$0xf]  ;;  %p170_p4 = scmp.lt.s32.totalorder %s2420_s23, 31  ;;  %vm1064_vm0 = vcmask 130048  }
   0xf   : > { %v1838_v60 = vshrl.u32 %v370_v57, 7 }
  0x10   : > { %s3138_s14 = smov (!%p164_p3, %s1499_s14), 63  ;;  %s3140_s23 = smov (!%p170_p4, %s2420_s23), 31 }
  0x11   : > { %s1500_s15 = sshll.u32 %s3138_s14, 3  ;;  %v372_v63 = vsub.s32 0, %v1838_v60  ;;  %s1540_s24 = sshll.u32 %s3140_s23, 5 }
  0x12   : > { %s1606_s18 = scalar_lea.vmem %s2960_s0, %s1500_s15  ;;  %s2567_s29 = scalar_lea.vmem %s2963_s3, %s1540_s24 }
  0x13   : > { %v1609_v1 = vld [vmem:[%s1606_s18 + $0x10] sm:$0xff]  ;;  %v1612_v2 = vld [vmem:[%s1606_s18] sm:$0xff]  ;;  %v1617_v3 = vld [vmem:[%s1606_s18 + $0x18] sm:$0xff] }
  0x14   : > { %222 = vperm.xlu1 %1554, %v1609_v1   ;;  %212 = vperm.xlu0 %1553, %v1612_v2   ;;  %v1620_v4 = vld [vmem:[%s1606_s18 + $0x8] sm:$0xff]  ;;  %v1628_v6 = vld [vmem:[%s1606_s18 + $0x20] sm:$0xff]  ;;  %v1633_v7 = vld [vmem:[%s1606_s18 + $0x38] sm:$0xff] }
  0x15   : > { %v1625_v5 = vld [vmem:[%s1606_s18 + $0x28] sm:$0xff]  ;;  %v1636_v8 = vld [vmem:[%s1606_s18 + $0x30] sm:$0xff]  ;;  %v1644_v10 = vld [vmem:[%s1606_s18 + $0x40] sm:$0xff] }
  0x16   : > { %v1641_v9 = vld [vmem:[%s1606_s18 + $0x48] sm:$0xff]  ;;  %v1649_v11 = vld [vmem:[%s1606_s18 + $0x58] sm:$0xff]  ;;  %v1652_v12 = vld [vmem:[%s1606_s18 + $0x50] sm:$0xff] }
  0x17   : > { %v1657_v13 = vld [vmem:[%s1606_s18 + $0x68] sm:$0xff]  ;;  %v1660_v14 = vld [vmem:[%s1606_s18 + $0x60] sm:$0xff]  ;;  %v1665_v15 = vld [vmem:[%s1606_s18 + $0x78] sm:$0xff] }
  0x18   : > { %227 = vperm.xlu1 %1554, %v1617_v3   ;;  %217 = vperm.xlu0 %1553, %v1620_v4   ;;  %v1668_v16 = vld [vmem:[%s1606_s18 + $0x70] sm:$0xff]  ;;  %v1673_v17 = vld [vmem:[%s1606_s18 + $0x88] sm:$0xff]  ;;  %v1676_v18 = vld [vmem:[%s1606_s18 + $0x80] sm:$0xff] }
  0x19   : > { %v1681_v19 = vld [vmem:[%s1606_s18 + $0x98] sm:$0xff]  ;;  %v1684_v20 = vld [vmem:[%s1606_s18 + $0x90] sm:$0xff]  ;;  %v1689_v21 = vld [vmem:[%s1606_s18 + $0xa8] sm:$0xff] }
  0x1a   : > { %v1692_v22 = vld [vmem:[%s1606_s18 + $0xa0] sm:$0xff]  ;;  %v1697_v23 = vld [vmem:[%s1606_s18 + $0xb8] sm:$0xff]  ;;  %v1700_v24 = vld [vmem:[%s1606_s18 + $0xb0] sm:$0xff] }
  0x1b   : > { %v1705_v25 = vld [vmem:[%s1606_s18 + $0xc8] sm:$0xff]  ;;  %v1708_v26 = vld [vmem:[%s1606_s18 + $0xc0] sm:$0xff]  ;;  %v1713_v27 = vld [vmem:[%s1606_s18 + $0xd8] sm:$0xff] }
  0x1c   : > { %237 = vperm.xlu1 %1554, %v1625_v5   ;;  %232 = vperm.xlu0 %1553, %v1628_v6   ;;  %v1716_v28 = vld [vmem:[%s1606_s18 + $0xd0] sm:$0xff]  ;;  %v1721_v29 = vld [vmem:[%s1606_s18 + $0xe8] sm:$0xff]  ;;  %v1724_v30 = vld [vmem:[%s1606_s18 + $0xe0] sm:$0xff] }
  0x1d   : > { %v1729_v31 = vld [vmem:[%s1606_s18 + $0xf8] sm:$0xff]  ;;  %v1732_v32 = vld [vmem:[%s1606_s18 + $0xf0] sm:$0xff] }
  0x20   : > { %247 = vperm.xlu1 %1554, %v1633_v7   ;;  %242 = vperm.xlu0 %1553, %v1636_v8  }
  0x24   : > { %257 = vperm.xlu1 %1554, %v1641_v9   ;;  %252 = vperm.xlu0 %1553, %v1644_v10  }
  0x28   : > { %267 = vperm.xlu1 %1554, %v1649_v11   ;;  %262 = vperm.xlu0 %1553, %v1652_v12  }
  0x2c   : > { %277 = vperm.xlu1 %1554, %v1657_v13   ;;  %272 = vperm.xlu0 %1553, %v1660_v14  }
  0x30   : > { %287 = vperm.xlu1 %1554, %v1665_v15   ;;  %282 = vperm.xlu0 %1553, %v1668_v16  }
  0x34   : > { %297 = vperm.xlu1 %1554, %v1673_v17   ;;  %292 = vperm.xlu0 %1553, %v1676_v18  }
  0x38   : > { %307 = vperm.xlu1 %1554, %v1681_v19   ;;  %302 = vperm.xlu0 %1553, %v1684_v20  }
  0x3c   : > { %317 = vperm.xlu1 %1554, %v1689_v21   ;;  %312 = vperm.xlu0 %1553, %v1692_v22  }
  0x40   : > { %327 = vperm.xlu1 %1554, %v1697_v23   ;;  %322 = vperm.xlu0 %1553, %v1700_v24  }
  0x44   : > { %337 = vperm.xlu1 %1554, %v1705_v25   ;;  %332 = vperm.xlu0 %1553, %v1708_v26  }
  0x48   : > { %347 = vperm.xlu1 %1554, %v1713_v27   ;;  %342 = vperm.xlu0 %1553, %v1716_v28  }
  0x4c   : > { %357 = vperm.xlu1 %1554, %v1721_v29   ;;  %352 = vperm.xlu0 %1553, %v1724_v30  }
  0x50   : > { %367 = vperm.xlu1 %1554, %v1729_v31   ;;  %362 = vperm.xlu0 %1553, %v1732_v32  }
  0x54   : > { %1556 = vset.pattern.permute.xlu1 %v1570_v33  ;;  %1555 = vset.pattern.permute.xlu0 %v1570_v33  ;;  %v1857_v33 = vld [vmem:[%s2961_s1 + $0x4] sm:$0xf] }
  0x55   : > { %443 = vperm.xlu1 %1556, %v1620_v4   ;;  %439 = vperm.xlu0 %1555, %v1612_v2  }
  0x59   : > { %447 = vperm.xlu1 %1556, %v1609_v1   ;;  %451 = vperm.xlu0 %1555, %v1617_v3  }
  0x5d   : > { %455 = vperm.xlu1 %1556, %v1628_v6   ;;  %459 = vperm.xlu0 %1555, %v1625_v5  }
  0x61   : > { %463 = vperm.xlu1 %1556, %v1636_v8   ;;  %467 = vperm.xlu0 %1555, %v1633_v7  }
  0x65   : > { %471 = vperm.xlu1 %1556, %v1644_v10   ;;  %475 = vperm.xlu0 %1555, %v1641_v9  }
  0x69   : > { %479 = vperm.xlu1 %1556, %v1652_v12   ;;  %483 = vperm.xlu0 %1555, %v1649_v11  }
  0x6d   : > { %487 = vperm.xlu1 %1556, %v1660_v14   ;;  %491 = vperm.xlu0 %1555, %v1657_v13  }
  0x71   : > { %495 = vperm.xlu1 %1556, %v1668_v16   ;;  %499 = vperm.xlu0 %1555, %v1665_v15  }
  0x75   : > { %503 = vperm.xlu1 %1556, %v1676_v18   ;;  %507 = vperm.xlu0 %1555, %v1673_v17  }
  0x79   : > { %511 = vperm.xlu1 %1556, %v1684_v20   ;;  %515 = vperm.xlu0 %1555, %v1681_v19  }
  0x7d   : > { %519 = vperm.xlu1 %1556, %v1692_v22   ;;  %523 = vperm.xlu0 %1555, %v1689_v21  }
  0x81   : > { %527 = vperm.xlu1 %1556, %v1700_v24   ;;  %531 = vperm.xlu0 %1555, %v1697_v23  }
  0x85   : > { %535 = vperm.xlu1 %1556, %v1708_v26   ;;  %539 = vperm.xlu0 %1555, %v1705_v25  }
  0x89   : > { %543 = vperm.xlu1 %1556, %v1716_v28   ;;  %547 = vperm.xlu0 %1555, %v1713_v27  }
  0x8d   : > { %551 = vperm.xlu1 %1556, %v1724_v30   ;;  %555 = vperm.xlu0 %1555, %v1721_v29  }
  0x91   : > { %559 = vperm.xlu1 %1556, %v1732_v32   ;;  %563 = vperm.xlu0 %1555, %v1729_v31  }
  0x93   : > { %v1768_v34 = vpop.permute.xlu1 %222  ;;  %v1770_v35 = vpop.permute.xlu0 %212 }
  0x95   : > { %1557 = vset.pattern.permute.xlu1 %v1571_v36  ;;  %1558 = vset.pattern.permute.xlu0 %v1571_v36 }
  0x96   : > { %635 = vperm.xlu1 %1557, %v1612_v2   ;;  %639 = vperm.xlu0 %1558, %v1620_v4  }
  0x97   : > { %v1774_v37 = vpop.permute.xlu1 %227  ;;  %v1776_v38 = vpop.permute.xlu0 %217 }
  0x9a   : > { %643 = vperm.xlu1 %1557, %v1609_v1   ;;  %651 = vperm.xlu0 %1558, %v1628_v6  }
  0x9b   : > { %v1780_v39 = vpop.permute.xlu1 %237  ;;  %v1782_v40 = vpop.permute.xlu0 %232 }
  0x9e   : > { %647 = vperm.xlu1 %1557, %v1617_v3   ;;  %659 = vperm.xlu0 %1558, %v1636_v8  }
  0x9f   : > { %v1786_v41 = vpop.permute.xlu1 %247  ;;  %v1788_v42 = vpop.permute.xlu0 %242 }
  0xa2   : > { %655 = vperm.xlu1 %1557, %v1625_v5   ;;  %667 = vperm.xlu0 %1558, %v1644_v10  }
  0xa3   : > { %v1792_v43 = vpop.permute.xlu1 %257  ;;  %v1794_v44 = vpop.permute.xlu0 %252 }
  0xa6   : > { %663 = vperm.xlu1 %1557, %v1633_v7   ;;  %675 = vperm.xlu0 %1558, %v1652_v12  }
  0xa7   : > { %v1798_v45 = vpop.permute.xlu1 %267  ;;  %v1800_v46 = vpop.permute.xlu0 %262 }
  0xaa   : > { %671 = vperm.xlu1 %1557, %v1641_v9   ;;  %683 = vperm.xlu0 %1558, %v1660_v14  }
  0xab   : > { %v1804_v47 = vpop.permute.xlu1 %277  ;;  %v1806_v48 = vpop.permute.xlu0 %272 }
  0xae   : > { %679 = vperm.xlu1 %1557, %v1649_v11   ;;  %691 = vperm.xlu0 %1558, %v1668_v16  }
  0xaf   : > { %v1810_v49 = vpop.permute.xlu1 %287  ;;  %v1812_v50 = vpop.permute.xlu0 %282 }
  0xb2   : > { %687 = vperm.xlu1 %1557, %v1657_v13   ;;  %699 = vperm.xlu0 %1558, %v1676_v18  }
  0xb3   : > { %v1816_v51 = vpop.permute.xlu1 %297  ;;  %v1818_v52 = vpop.permute.xlu0 %292 }
  0xb4   : > { %2997 = vst [vmem:[#allocation2_spill] sm:$0xff] %v1816_v51 }
  0xb6   : > { %695 = vperm.xlu1 %1557, %v1665_v15   ;;  %707 = vperm.xlu0 %1558, %v1684_v20  }
  0xb7   : > { %v1822_v53 = vpop.permute.xlu1 %307  ;;  %v1824_v54 = vpop.permute.xlu0 %302 }
  0xb8   : > { %2998 = vst [vmem:[#allocation3_spill] sm:$0xff] %v1822_v53  ;;  %2999 = vst [vmem:[#allocation4_spill] sm:$0xff] %v1824_v54 }
  0xba   : > { %703 = vperm.xlu1 %1557, %v1673_v17   ;;  %715 = vperm.xlu0 %1558, %v1692_v22  }
  0xbb   : > { %v1828_v55 = vpop.permute.xlu1 %317  ;;  %v1830_v56 = vpop.permute.xlu0 %312 }
  0xbc   : > { %3000 = vst [vmem:[#allocation5_spill] sm:$0xff] %v1828_v55  ;;  %3001 = vst [vmem:[#allocation6_spill] sm:$0xff] %v1830_v56 }
  0xbe   : > { %711 = vperm.xlu1 %1557, %v1681_v19   ;;  %723 = vperm.xlu0 %1558, %v1700_v24  }
  0xbf   : > { %v1834_v58 = vpop.permute.xlu1 %327  ;;  %v1836_v59 = vpop.permute.xlu0 %322 }
  0xc0   : > { %3002 = vst [vmem:[#allocation7_spill] sm:$0xff] %v1834_v58  ;;  %3003 = vst [vmem:[#allocation8_spill] sm:$0xff] %v1836_v59 }
  0xc2   : > { %719 = vperm.xlu1 %1557, %v1689_v21   ;;  %731 = vperm.xlu0 %1558, %v1708_v26  }
  0xc3   : > { %v1842_v61 = vpop.permute.xlu1 %337  ;;  %v1844_v62 = vpop.permute.xlu0 %332 }
  0xc4   : > { %3004 = vst [vmem:[#allocation9_spill] sm:$0xff] %v1842_v61  ;;  %3005 = vst [vmem:[#allocation10_spill] sm:$0xff] %v1844_v62  ;;  %v1864_v62 = vrot.slane %v1852_v0, %v372_v63  ;;  %v1867_v61 = vrot.slane %v1857_v33, %v372_v63 }
  0xc6   : > { %727 = vperm.xlu1 %1557, %v1697_v23   ;;  %739 = vperm.xlu0 %1558, %v1716_v28  }
  0xc7   : > { %v1859_v36 = vpop.permute.xlu1 %347  ;;  %v1861_v57 = vpop.permute.xlu0 %342 }
  0xc8   : > { %3006 = vst [vmem:[#allocation11_spill] sm:$0xff] %v1859_v36  ;;  %3007 = vst [vmem:[#allocation12_spill] sm:$0xff] %v1861_v57 }
  0xca   : > { %735 = vperm.xlu1 %1557, %v1705_v25   ;;  %747 = vperm.xlu0 %1558, %v1724_v30  }
  0xcb   : > { %v1871_v59 = vpop.permute.xlu1 %357  ;;  %v353_v58 = vpop.permute.xlu0 %352 }
  0xcc   : > { %3008 = vst [vmem:[#allocation13_spill] sm:$0xff] %v1871_v59  ;;  %v1874_v56 = vmul.f32 %v1864_v62, %v353_v58  ;;  %v1877_v36 = vmul.f32 %v1867_v61, %v353_v58  ;;  %v1572_v59 = vmov 3  }
  0xce   : > { %743 = vperm.xlu1 %1557, %v1713_v27   ;;  %755 = vperm.xlu0 %1558, %v1732_v32  }
  0xcf   : > { %v1881_v57 = vpop.permute.xlu1 %367  ;;  %v363_v63 = vpop.permute.xlu0 %362 }
  0xd0   : > { %3009 = vst [vmem:[#allocation14_spill] sm:$0xff] %v1881_v57  ;;  %v1884_v55 = vmul.f32 %v1864_v62, %v363_v63  ;;  %v1887_v54 = vmul.f32 %v1867_v61, %v363_v63 }
  0xd2   : > { %751 = vperm.xlu1 %1557, %v1721_v29   ;;  %1559 = vset.pattern.permute.xlu0 %v1572_v59 }
  0xd3   : > { %831 = vperm.xlu0 %1559, %v1612_v2  }
  0xd4   : > { %v1891_v58 = vpop.permute.xlu1 %443  ;;  %v1893_v53 = vpop.permute.xlu0 %439 }
  0xd5   : > { %3010 = vst [vmem:[#allocation15_spill] sm:$0xff] %v1893_v53 }
  0xd6   : > { %759 = vperm.xlu1 %1557, %v1729_v31  }
  0xd7   : > { %843 = vperm.xlu0 %1559, %v1617_v3  }
  0xd8   : > { %v1897_v57 = vpop.permute.xlu1 %447  ;;  %v1899_v51 = vpop.permute.xlu0 %451 }
  0xda   : > { %1560 = vset.pattern.permute.xlu1 %v1572_v59 }
  0xdb   : > { %835 = vperm.xlu1 %1560, %v1620_v4   ;;  %851 = vperm.xlu0 %1559, %v1625_v5  }
  0xdc   : > { %v1903_v63 = vpop.permute.xlu1 %455  ;;  %v1905_v2 = vpop.permute.xlu0 %459 }
  0xdf   : > { %839 = vperm.xlu1 %1560, %v1609_v1   ;;  %859 = vperm.xlu0 %1559, %v1633_v7  }
  0xe0   : > { %v1909_v53 = vpop.permute.xlu1 %463  ;;  %v1911_v3 = vpop.permute.xlu0 %467 }
  0xe3   : > { %847 = vperm.xlu1 %1560, %v1628_v6   ;;  %867 = vperm.xlu0 %1559, %v1641_v9  }
  0xe4   : > { %v1915_v59 = vpop.permute.xlu1 %471  ;;  %v1917_v4 = vpop.permute.xlu0 %475 }
  0xe7   : > { %855 = vperm.xlu1 %1560, %v1636_v8   ;;  %875 = vperm.xlu0 %1559, %v1649_v11  }
  0xe8   : > { %v1921_v5 = vpop.permute.xlu1 %479  ;;  %v1923_v1 = vpop.permute.xlu0 %483 }
  0xeb   : > { %863 = vperm.xlu1 %1560, %v1644_v10   ;;  %883 = vperm.xlu0 %1559, %v1657_v13  }
  0xec   : > { %v1927_v7 = vpop.permute.xlu1 %487  ;;  %v1929_v6 = vpop.permute.xlu0 %491 }
  0xef   : > { %871 = vperm.xlu1 %1560, %v1652_v12   ;;  %891 = vperm.xlu0 %1559, %v1665_v15  }
  0xf0   : > { %v1933_v9 = vpop.permute.xlu1 %495  ;;  %v1935_v8 = vpop.permute.xlu0 %499 }
  0xf1   : > { %3011 = vst [vmem:[#allocation16_spill] sm:$0xff] %v1935_v8 }
  0xf3   : > { %879 = vperm.xlu1 %1560, %v1660_v14   ;;  %899 = vperm.xlu0 %1559, %v1673_v17  }
  0xf4   : > { %v1939_v11 = vpop.permute.xlu1 %503  ;;  %v1941_v10 = vpop.permute.xlu0 %507 }
  0xf5   : > { %3012 = vst [vmem:[#allocation17_spill] sm:$0xff] %v1941_v10 }
  0xf7   : > { %887 = vperm.xlu1 %1560, %v1668_v16   ;;  %907 = vperm.xlu0 %1559, %v1681_v19  }
  0xf8   : > { %v1945_v13 = vpop.permute.xlu1 %511  ;;  %v1947_v12 = vpop.permute.xlu0 %515 }
  0xf9   : > { %3013 = vst [vmem:[#allocation18_spill] sm:$0xff] %v1947_v12 }
  0xfb   : > { %895 = vperm.xlu1 %1560, %v1676_v18   ;;  %915 = vperm.xlu0 %1559, %v1689_v21   ;;  %v568_v21 = vsub.s32 1, %v1838_v60 }
  0xfc   : > { %v1951_v15 = vpop.permute.xlu1 %519  ;;  %v1953_v14 = vpop.permute.xlu0 %523 }
  0xfd   : > { %3014 = vst [vmem:[#allocation19_spill] sm:$0xff] %v1953_v14  ;;  %v764_v14 = vsub.s32 2, %v1838_v60 }
  0xff   : > { %903 = vperm.xlu1 %1560, %v1684_v20   ;;  %923 = vperm.xlu0 %1559, %v1697_v23  }
 0x100   : > { %v1957_v17 = vpop.permute.xlu1 %527  ;;  %v1959_v16 = vpop.permute.xlu0 %531 }
 0x101   : > { %3015 = vst [vmem:[#allocation20_spill] sm:$0xff] %v1959_v16  ;;  %v1975_v16 = vrot.slane %v1852_v0, %v568_v21 }
 0x103   : > { %911 = vperm.xlu1 %1560, %v1692_v22   ;;  %931 = vperm.xlu0 %1559, %v1705_v25   ;;  %v1978_v22 = vrot.slane %v1857_v33, %v568_v21 }
 0x104   : > { %v1963_v19 = vpop.permute.xlu1 %535  ;;  %v1965_v18 = vpop.permute.xlu0 %539 }
 0x105   : > { %3016 = vst [vmem:[#allocation21_spill] sm:$0xff] %v1965_v18 }
 0x107   : > { %919 = vperm.xlu1 %1560, %v1700_v24   ;;  %939 = vperm.xlu0 %1559, %v1713_v27  }
 0x108   : > { %v1970_v20 = vpop.permute.xlu1 %543  ;;  %v1972_v23 = vpop.permute.xlu0 %547 }
 0x109   : > { %3017 = vst [vmem:[#allocation22_spill] sm:$0xff] %v1972_v23 }
 0x10b   : > { %927 = vperm.xlu1 %1560, %v1708_v26   ;;  %947 = vperm.xlu0 %1559, %v1721_v29  }
 0x10c   : > { %v552_v25 = vpop.permute.xlu1 %551  ;;  %v1982_v18 = vpop.permute.xlu0 %555 }
 0x10d   : > { %3018 = vst [vmem:[#allocation23_spill] sm:$0xff] %v1982_v18  ;;  %v598_v24 = vmul.f32 %v1975_v16, %v552_v25  ;;  %v1199_v27 = vmul.f32 %v1978_v22, %v552_v25  ;;  %v571_v25 = vmul.f32 %v1975_v16, %v1891_v58 }
 0x10f   : > { %v1988_v23 = vadd.f32 %v598_v24, %v1874_v56  ;;  %v1991_v12 = vadd.f32 %v1199_v27, %v1877_v36  ;;  %935 = vperm.xlu1 %1560, %v1716_v28   ;;  %955 = vperm.xlu0 %1559, %v1729_v31   ;;  %v1172_v56 = vmul.f32 %v1978_v22, %v1891_v58 }
 0x110   : > { %v560_v26 = vpop.permute.xlu1 %559  ;;  %v1995_v29 = vpop.permute.xlu0 %563  ;;  %v2004_v36 = vrot.slane %v1852_v0, %v764_v14  ;;  %v2007_v28 = vrot.slane %v1857_v33, %v764_v14  ;;  %v375_v27 = vmul.f32 %v1864_v62, %v1776_v38  ;;  %v1104_v58 = vmul.f32 %v1867_v61, %v1776_v38 }
 0x111   : > { %3019 = vst [vmem:[#allocation24_spill] sm:$0xff] %v1988_v23  ;;  %3020 = vst [vmem:[#allocation25_spill] sm:$0xff] %v1991_v12  ;;  %v600_v21 = vmul.f32 %v1975_v16, %v560_v26  ;;  %v1201_v18 = vmul.f32 %v1978_v22, %v560_v26  ;;  %v572_v26 = vmul.f32 %v1975_v16, %v1897_v57 }
 0x112   : > { %3021 = vst [vmem:[#allocation26_spill] sm:$0xff] %v1995_v29  ;;  %v1173_v14 = vmul.f32 %v1978_v22, %v1897_v57  ;;  %v603_v29 = vadd.f32 %v571_v25, %v375_v27  ;;  %v378_v12 = vmul.f32 %v1864_v62, %v1782_v40  ;;  %v576_v27 = vmul.f32 %v1975_v16, %v1909_v53 }
 0x113   : > { %v2010_v31 = vadd.f32 %v600_v21, %v1884_v55  ;;  %v2013_v24 = vadd.f32 %v1201_v18, %v1887_v54  ;;  %943 = vperm.xlu1 %1560, %v1724_v30   ;;  %v376_v55 = vmul.f32 %v1864_v62, %v1768_v34  ;;  %v1105_v54 = vmul.f32 %v1867_v61, %v1768_v34 }
 0x114   : > { %v574_v30 = vmul.f32 %v1975_v16, %v1903_v63  ;;  %v1175_v18 = vmul.f32 %v1978_v22, %v1903_v63  ;;  %v1107_v34 = vmul.f32 %v1867_v61, %v1782_v40 }
 0x115   : > { %3022 = vst [vmem:[#allocation27_spill] sm:$0xff] %v2010_v31  ;;  %3023 = vst [vmem:[#allocation28_spill] sm:$0xff] %v2013_v24  ;;  %v2032_v21 = vpop.permute.xlu1 %635  ;;  %v640_v38 = vpop.permute.xlu0 %639  ;;  %v1204_v24 = vadd.f32 %v1172_v56, %v1104_v58  ;;  %v604_v23 = vadd.f32 %v572_v26, %v376_v55  ;;  %v1205_v10 = vadd.f32 %v1173_v14, %v1105_v54 }
 0x116   : > { %3024 = vst [vmem:[#allocation29_spill] sm:$0xff] %v2032_v21  ;;  %v767_v31 = vmul.f32 %v2004_v36, %v640_v38  ;;  %v1240_v57 = vmul.f32 %v2007_v28, %v640_v38  ;;  %v606_v25 = vadd.f32 %v574_v30, %v378_v12  ;;  %v1207_v56 = vadd.f32 %v1175_v18, %v1107_v34 }
 0x117   : > { %951 = vperm.xlu1 %1560, %v1732_v32   ;;  %v1177_v58 = vmul.f32 %v1978_v22, %v1909_v53  ;;  %v380_v12 = vmul.f32 %v1864_v62, %v1788_v42  ;;  %v578_v54 = vmul.f32 %v1975_v16, %v1915_v59 }
 0x118   : > { %v2041_v63 = vadd.f32 %v767_v31, %v603_v29  ;;  %v2043_v21 = vadd.f32 %v1240_v57, %v1204_v24  ;;  %v1109_v31 = vmul.f32 %v1867_v61, %v1788_v42 }
 0x119   : > { %v644_v38 = vpop.permute.xlu1 %643  ;;  %v652_v8 = vpop.permute.xlu0 %651  ;;  %v608_v57 = vadd.f32 %v576_v27, %v380_v12 }
 0x11a   : > { %3025 = vst [vmem:[#allocation30_spill] sm:$0xff] %v2041_v63  ;;  %3026 = vst [vmem:[#allocation31_spill] sm:$0xff] %v2043_v21  ;;  %v768_v40 = vmul.f32 %v2004_v36, %v644_v38  ;;  %v1241_v32 = vmul.f32 %v2007_v28, %v644_v38  ;;  %v770_v26 = vmul.f32 %v2004_v36, %v652_v8 }
 0x11b   : > { %v1243_v29 = vmul.f32 %v2007_v28, %v652_v8  ;;  %v1179_v8 = vmul.f32 %v1978_v22, %v1915_v59  ;;  %v1209_v34 = vadd.f32 %v1177_v58, %v1109_v31  ;;  %v580_v58 = vmul.f32 %v1975_v16, %v1921_v5 }
 0x11c   : > { %v2057_v24 = vadd.f32 %v768_v40, %v604_v23  ;;  %v2059_v14 = vadd.f32 %v1241_v32, %v1205_v10  ;;  %v2061_v53 = vadd.f32 %v770_v26, %v606_v25  ;;  %v382_v23 = vmul.f32 %v1864_v62, %v1794_v44 }
 0x11d   : > { %v2063_v55 = vadd.f32 %v1243_v29, %v1207_v56  ;;  %v2069_v30 = vpop.permute.xlu1 %647  ;;  %v660_v18 = vpop.permute.xlu0 %659  ;;  %v1111_v25 = vmul.f32 %v1867_v61, %v1794_v44  ;;  %v1181_v26 = vmul.f32 %v1978_v22, %v1921_v5  ;;  %v384_v44 = vmul.f32 %v1864_v62, %v1800_v46 }
 0x11e   : > { %3027 = vst [vmem:[#allocation32_spill] sm:$0xff] %v2057_v24  ;;  %3028 = vst [vmem:[#allocation33_spill] sm:$0xff] %v2059_v14  ;;  %v772_v42 = vmul.f32 %v2004_v36, %v660_v18  ;;  %v1245_v10 = vmul.f32 %v2007_v28, %v660_v18  ;;  %v610_v59 = vadd.f32 %v578_v54, %v382_v23  ;;  %v3054_v14 = vld [vmem:[#allocation7_spill] sm:$0xff] }
 0x11f   : > { %3029 = vst [vmem:[#allocation34_spill] sm:$0xff] %v2061_v53  ;;  %3030 = vst [vmem:[#allocation35_spill] sm:$0xff] %v2063_v55  ;;  %v1211_v40 = vadd.f32 %v1179_v8, %v1111_v25  ;;  %v1113_v31 = vmul.f32 %v1867_v61, %v1800_v46  ;;  %v2099_v18 = vmul.f32 %v1864_v62, %v1770_v35 }
 0x120   : > { %3031 = vst [vmem:[#allocation36_spill] sm:$0xff] %v2069_v30  ;;  %v2077_v56 = vadd.f32 %v772_v42, %v608_v57  ;;  %v2079_v38 = vadd.f32 %v1245_v10, %v1209_v34  ;;  %v582_v5 = vmul.f32 %v1975_v16, %v1927_v7  ;;  %v1183_v57 = vmul.f32 %v1978_v22, %v1927_v7 }
 0x121   : > { %v2081_v32 = vpop.permute.xlu1 %655  ;;  %v668_v27 = vpop.permute.xlu0 %667  ;;  %v612_v10 = vadd.f32 %v580_v58, %v384_v44  ;;  %v1213_v23 = vadd.f32 %v1181_v26, %v1113_v31  ;;  %v386_v7 = vmul.f32 %v1864_v62, %v1806_v48  ;;  %v2123_v58 = vmul.f32 %v1867_v61, %v1774_v37 }
 0x122   : > { %3032 = vst [vmem:[#allocation37_spill] sm:$0xff] %v2077_v56  ;;  %3033 = vst [vmem:[#allocation38_spill] sm:$0xff] %v2079_v38  ;;  %v774_v29 = vmul.f32 %v2004_v36, %v668_v27  ;;  %v1247_v12 = vmul.f32 %v2007_v28, %v668_v27  ;;  %v1115_v27 = vmul.f32 %v1867_v61, %v1806_v48  ;;  %v3047_v38 = vld [vmem:[#allocation3_spill] sm:$0xff] }
 0x123   : > { %3034 = vst [vmem:[#allocation39_spill] sm:$0xff] %v2081_v32  ;;  %v2127_v26 = vmul.f32 %v1864_v62, %v1780_v39  ;;  %v2139_v44 = vmul.f32 %v1864_v62, %v1786_v41  ;;  %v614_v48 = vadd.f32 %v582_v5, %v386_v7  ;;  %v2155_v5 = vmul.f32 %v1864_v62, %v1792_v43 }
 0x124   : > { %v2093_v54 = vadd.f32 %v774_v29, %v610_v59  ;;  %v2095_v8 = vadd.f32 %v1247_v12, %v1211_v40  ;;  %v2111_v59 = vmul.f32 %v1867_v61, %v1770_v35  ;;  %v2115_v40 = vmul.f32 %v1864_v62, %v1774_v37 }
 0x125   : > { %v2105_v34 = vpop.permute.xlu1 %663  ;;  %v676_v42 = vpop.permute.xlu0 %675  ;;  %v2135_v12 = vmul.f32 %v1867_v61, %v1780_v39  ;;  %v1215_v31 = vadd.f32 %v1183_v57, %v1115_v27  ;;  %v2159_v57 = vmul.f32 %v1867_v61, %v1792_v43  ;;  %v1117_v7 = vmul.f32 %v1867_v61, %v1812_v50 }
 0x126   : > { %3035 = vst [vmem:[#allocation40_spill] sm:$0xff] %v2093_v54  ;;  %3036 = vst [vmem:[#allocation41_spill] sm:$0xff] %v2095_v8  ;;  %v776_v46 = vmul.f32 %v2004_v36, %v676_v42  ;;  %v1249_v25 = vmul.f32 %v2007_v28, %v676_v42  ;;  %v584_v8 = vmul.f32 %v1975_v16, %v1933_v9 }
 0x127   : > { %3037 = vst [vmem:[#allocation42_spill] sm:$0xff] %v2105_v34  ;;  %v2179_v43 = vmul.f32 %v1864_v62, %v1804_v47  ;;  %v2219_v56 = vmul.f32 %v1864_v62, %v3047_v38  ;;  %v590_v24 = vmul.f32 %v1975_v16, %v1951_v15  ;;  %v3063_v34 = vld [vmem:[#allocation11_spill] sm:$0xff] }
 0x128   : > { %v2129_v35 = vadd.f32 %v776_v46, %v612_v10  ;;  %v2131_v29 = vadd.f32 %v1249_v25, %v1213_v23  ;;  %v1185_v10 = vmul.f32 %v1978_v22, %v1933_v9  ;;  %v2151_v46 = vmul.f32 %v1867_v61, %v1786_v41 }
 0x129   : > { %v2141_v37 = vpop.permute.xlu1 %671  ;;  %v684_v42 = vpop.permute.xlu0 %683  ;;  %v2163_v25 = vmul.f32 %v1864_v62, %v1798_v45  ;;  %v388_v9 = vmul.f32 %v1864_v62, %v1812_v50 }
 0x12a   : > { %3038 = vst [vmem:[#allocation43_spill] sm:$0xff] %v2129_v35  ;;  %3039 = vst [vmem:[#allocation44_spill] sm:$0xff] %v2131_v29  ;;  %v778_v23 = vmul.f32 %v2004_v36, %v684_v42  ;;  %v1251_v39 = vmul.f32 %v2007_v28, %v684_v42  ;;  %v2175_v42 = vmul.f32 %v1867_v61, %v1798_v45 }
 0x12b   : > { %3040 = vst [vmem:[#allocation45_spill] sm:$0xff] %v2141_v37  ;;  %v586_v29 = vmul.f32 %v1975_v16, %v1939_v11  ;;  %v1187_v35 = vmul.f32 %v1978_v22, %v1939_v11  ;;  %v390_v11 = vmul.f32 %v1864_v62, %v1818_v52 }
 0x12c   : > { %v2169_v41 = vadd.f32 %v778_v23, %v614_v48  ;;  %v2171_v27 = vadd.f32 %v1251_v39, %v1215_v31  ;;  %v616_v48 = vadd.f32 %v584_v8, %v388_v9  ;;  %v1217_v31 = vadd.f32 %v1185_v10, %v1117_v7  ;;  %v3044_v10 = vld [vmem:[#allocation2_spill] sm:$0xff] }
 0x12d   : > { %v2185_v54 = vpop.permute.xlu1 %679  ;;  %v692_v50 = vpop.permute.xlu0 %691  ;;  %v2191_v39 = vmul.f32 %v1867_v61, %v1804_v47  ;;  %v2203_v8 = vmul.f32 %v1867_v61, %v1810_v49  ;;  %v2207_v9 = vmul.f32 %v1864_v62, %v3044_v10 }
 0x12e   : > { %3041 = vst [vmem:[#allocation46_spill] sm:$0xff] %v2169_v41  ;;  %3042 = vst [vmem:[#allocation47_spill] sm:$0xff] %v2171_v27  ;;  %v780_v23 = vmul.f32 %v2004_v36, %v692_v50  ;;  %v1253_v45 = vmul.f32 %v2007_v28, %v692_v50  ;;  %v2195_v27 = vmul.f32 %v1864_v62, %v1810_v49 }
 0x12f   : > { %3043 = vst [vmem:[#allocation48_spill] sm:$0xff] %v2185_v54  ;;  %v1119_v41 = vmul.f32 %v1867_v61, %v1818_v52  ;;  %v2215_v50 = vmul.f32 %v1867_v61, %v3044_v10  ;;  %v618_v52 = vadd.f32 %v586_v29, %v390_v11  ;;  %v588_v54 = vmul.f32 %v1975_v16, %v1945_v13  ;;  %v3049_v10 = vld [vmem:[#allocation4_spill] sm:$0xff] }
 0x130   : > { %v2209_v47 = vadd.f32 %v780_v23, %v616_v48  ;;  %v2211_v7 = vadd.f32 %v1253_v45, %v1217_v31  ;;  %v1189_v48 = vmul.f32 %v1978_v22, %v1945_v13  ;;  %v2231_v45 = vmul.f32 %v1867_v61, %v3047_v38 }
 0x131   : > { %v1219_v55 = vadd.f32 %v1187_v35, %v1119_v41  ;;  %v2221_v49 = vpop.permute.xlu1 %687  ;;  %v700_v53 = vpop.permute.xlu0 %699  ;;  %v392_v35 = vmul.f32 %v1864_v62, %v3049_v10  ;;  %v1121_v29 = vmul.f32 %v1867_v61, %v3049_v10  ;;  %v3050_v41 = vld [vmem:[#allocation5_spill] sm:$0xff]  ;;  %v2255_v10 = vmul.f32 %v1864_v62, %v3054_v14 }
 0x132   : > { %3045 = vst [vmem:[#allocation2_spill] sm:$0xff] %v2209_v47  ;;  %3046 = vst [vmem:[#allocation49_spill] sm:$0xff] %v2211_v7  ;;  %v782_v31 = vmul.f32 %v2004_v36, %v700_v53  ;;  %v1255_v23 = vmul.f32 %v2007_v28, %v700_v53  ;;  %v2239_v11 = vmul.f32 %v1864_v62, %v3050_v41  ;;  %v3051_v7 = vld [vmem:[#allocation6_spill] sm:$0xff] }
 0x133   : > { %3048 = vst [vmem:[#allocation3_spill] sm:$0xff] %v2221_v49  ;;  %v2243_v13 = vmul.f32 %v1867_v61, %v3050_v41  ;;  %v394_v53 = vmul.f32 %v1864_v62, %v3051_v7  ;;  %v1123_v49 = vmul.f32 %v1867_v61, %v3051_v7  ;;  %v1191_v41 = vmul.f32 %v1978_v22, %v1951_v15  ;;  %v3057_v15 = vld [vmem:[#allocation9_spill] sm:$0xff] }
 0x134   : > { %v2247_v47 = vadd.f32 %v782_v31, %v618_v52  ;;  %v2249_v38 = vadd.f32 %v1255_v23, %v1219_v55  ;;  %v620_v52 = vadd.f32 %v588_v54, %v392_v35  ;;  %v1221_v31 = vadd.f32 %v1189_v48, %v1121_v29  ;;  %v3060_v48 = vld [vmem:[#allocation10_spill] sm:$0xff] }
 0x135   : > { %v2261_v21 = vpop.permute.xlu1 %695  ;;  %v708_v63 = vpop.permute.xlu0 %707  ;;  %v2267_v7 = vmul.f32 %v1867_v61, %v3054_v14  ;;  %v2279_v54 = vmul.f32 %v1867_v61, %v3057_v15  ;;  %v1127_v29 = vmul.f32 %v1867_v61, %v3060_v48  ;;  %v622_v32 = vadd.f32 %v590_v24, %v394_v53  ;;  %v3067_v53 = vld [vmem:[#allocation13_spill] sm:$0xff] }
 0x136   : > { %3052 = vst [vmem:[#allocation4_spill] sm:$0xff] %v2247_v47  ;;  %3053 = vst [vmem:[#allocation5_spill] sm:$0xff] %v2249_v38  ;;  %v784_v55 = vmul.f32 %v2004_v36, %v708_v63  ;;  %v1257_v23 = vmul.f32 %v2007_v28, %v708_v63  ;;  %v3056_v38 = vld [vmem:[#allocation8_spill] sm:$0xff]  ;;  %v398_v63 = vmul.f32 %v1864_v62, %v3060_v48 }
 0x137   : > { %3055 = vst [vmem:[#allocation6_spill] sm:$0xff] %v2261_v21  ;;  %v396_v47 = vmul.f32 %v1864_v62, %v3056_v38  ;;  %v1125_v37 = vmul.f32 %v1867_v61, %v3056_v38  ;;  %v2275_v21 = vmul.f32 %v1864_v62, %v3057_v15  ;;  %3059 = vst [vmem:[#allocation8_spill] sm:$0xff] %v2279_v54  ;;  %v3066_v48 = vld [vmem:[#allocation12_spill] sm:$0xff] }
 0x138   : > { %v2283_v35 = vadd.f32 %v784_v55, %v620_v52  ;;  %v2285_v14 = vadd.f32 %v1257_v23, %v1221_v31  ;;  %v2291_v38 = vmul.f32 %v1864_v62, %v3063_v34  ;;  %v592_v54 = vmul.f32 %v1975_v16, %v1957_v17 }
 0x139   : > { %3058 = vst [vmem:[#allocation7_spill] sm:$0xff] %v2275_v21  ;;  %v1223_v21 = vadd.f32 %v1191_v41, %v1123_v49  ;;  %v2293_v30 = vpop.permute.xlu1 %703  ;;  %v716_v15 = vpop.permute.xlu0 %715  ;;  %v1193_v52 = vmul.f32 %v1978_v22, %v1957_v17  ;;  %v2303_v23 = vmul.f32 %v1867_v61, %v3063_v34  ;;  %v400_v24 = vmul.f32 %v1864_v62, %v3066_v48 }
 0x13a   : > { %3061 = vst [vmem:[#allocation9_spill] sm:$0xff] %v2283_v35  ;;  %3062 = vst [vmem:[#allocation10_spill] sm:$0xff] %v2285_v14  ;;  %v786_v31 = vmul.f32 %v2004_v36, %v716_v15  ;;  %v1259_v55 = vmul.f32 %v2007_v28, %v716_v15  ;;  %v1129_v49 = vmul.f32 %v1867_v61, %v3066_v48  ;;  %v960_v34 = vsub.s32 3, %v1838_v60  ;;  %v3071_v35 = vld [vmem:[#allocation15_spill] sm:$0xff] }
 0x13b   : > { %3064 = vst [vmem:[#allocation11_spill] sm:$0xff] %v2293_v30  ;;  %3065 = vst [vmem:[#allocation50_spill] sm:$0xff] %v2303_v23  ;;  %v2311_v41 = vmul.f32 %v1864_v62, %v3067_v53  ;;  %v2315_v17 = vmul.f32 %v1867_v61, %v3067_v53  ;;  %v570_v30 = vmul.f32 %v1975_v16, %v3071_v35 }
 0x13c   : > { %v2317_v14 = vadd.f32 %v786_v31, %v622_v32  ;;  %v2319_v15 = vadd.f32 %v1259_v55, %v1223_v21  ;;  %v1171_v48 = vmul.f32 %v1978_v22, %v3071_v35  ;;  %v594_v23 = vmul.f32 %v1975_v16, %v1963_v19 }
 0x13d   : > { %3068 = vst [vmem:[#allocation12_spill] sm:$0xff] %v2311_v41  ;;  %v1195_v41 = vmul.f32 %v1978_v22, %v1963_v19  ;;  %v2330_v53 = vpop.permute.xlu1 %711  ;;  %v724_v32 = vpop.permute.xlu0 %723  ;;  %v624_v31 = vadd.f32 %v592_v54, %v396_v47  ;;  %v1225_v21 = vadd.f32 %v1193_v52, %v1125_v37  ;;  %v573_v19 = vmul.f32 %v1975_v16, %v1899_v51 }
 0x13e   : > { %3069 = vst [vmem:[#allocation13_spill] sm:$0xff] %v2317_v14  ;;  %3070 = vst [vmem:[#allocation51_spill] sm:$0xff] %v2319_v15  ;;  %v788_v55 = vmul.f32 %v2004_v36, %v724_v32  ;;  %v1261_v60 = vmul.f32 %v2007_v28, %v724_v32  ;;  %v3073_v15 = vld [vmem:[#allocation14_spill] sm:$0xff]  ;;  %v2351_v54 = vrot.slane %v1852_v0, %v960_v34 }
 0x13f   : > { %3072 = vst [vmem:[#allocation15_spill] sm:$0xff] %v2330_v53  ;;  %v2336_v14 = vmul.f32 %v1864_v62, %v3073_v15  ;;  %v2340_v35 = vmul.f32 %v1867_v61, %v3073_v15  ;;  %v1174_v53 = vmul.f32 %v1978_v22, %v1899_v51  ;;  %v2354_v62 = vrot.slane %v1857_v33, %v960_v34 }
 0x140   : > { %v2346_v47 = vadd.f32 %v788_v55, %v624_v31  ;;  %v2348_v37 = vadd.f32 %v1261_v60, %v1225_v21  ;;  %v2357_v52 = vadd.f32 %v570_v30, %v2099_v18  ;;  %v2360_v61 = vadd.f32 %v1171_v48, %v2111_v59 }
 0x141   : > { %3074 = vst [vmem:[#allocation14_spill] sm:$0xff] %v2340_v35  ;;  %v626_v15 = vadd.f32 %v594_v23, %v398_v63  ;;  %v1227_v32 = vadd.f32 %v1195_v41, %v1127_v29  ;;  %v2362_v35 = vpop.permute.xlu1 %719  ;;  %v732_v51 = vpop.permute.xlu0 %731  ;;  %v596_v31 = vmul.f32 %v1975_v16, %v1970_v20  ;;  %v1197_v0 = vmul.f32 %v1978_v22, %v1970_v20 }
 0x142   : > { %v790_v33 = vmul.f32 %v2004_v36, %v732_v51  ;;  %v1263_v34 = vmul.f32 %v2007_v28, %v732_v51  ;;  %v2371_v30 = vadd.f32 %v573_v19, %v2115_v40  ;;  %v2374_v18 = vadd.f32 %v1174_v53, %v2123_v58  ;;  %v3075_v51 = vld [vmem:[#allocation16_spill] sm:$0xff] }
 0x143   : > { %v575_v59 = vmul.f32 %v1975_v16, %v1905_v2  ;;  %v1176_v63 = vmul.f32 %v1978_v22, %v1905_v2  ;;  %v577_v29 = vmul.f32 %v1975_v16, %v1911_v3  ;;  %v1178_v20 = vmul.f32 %v1978_v22, %v1911_v3 }
 0x144   : > { %v2384_v23 = vadd.f32 %v790_v33, %v626_v15  ;;  %v2386_v41 = vadd.f32 %v1263_v34, %v1227_v32  ;;  %v579_v40 = vmul.f32 %v1975_v16, %v1917_v4  ;;  %v1180_v58 = vmul.f32 %v1978_v22, %v1917_v4 }
 0x145   : > { %v581_v48 = vmul.f32 %v1975_v16, %v1923_v1  ;;  %v1182_v2 = vmul.f32 %v1978_v22, %v1923_v1  ;;  %v2396_v53 = vpop.permute.xlu1 %727  ;;  %v740_v3 = vpop.permute.xlu0 %739  ;;  %v628_v21 = vadd.f32 %v596_v31, %v400_v24  ;;  %v1229_v55 = vadd.f32 %v1197_v0, %v1129_v49 }
 0x146   : > { %v792_v60 = vmul.f32 %v2004_v36, %v740_v3  ;;  %v1265_v19 = vmul.f32 %v2007_v28, %v740_v3  ;;  %v2401_v15 = vadd.f32 %v575_v59, %v2127_v26  ;;  %v2404_v4 = vadd.f32 %v1176_v63, %v2135_v12 }
 0x147   : > { %v583_v32 = vmul.f32 %v1975_v16, %v1929_v6  ;;  %v1184_v1 = vmul.f32 %v1978_v22, %v1929_v6  ;;  %v585_v24 = vmul.f32 %v1975_v16, %v3075_v51  ;;  %v1186_v49 = vmul.f32 %v1978_v22, %v3075_v51 }
 0x148   : > { %v2414_v31 = vadd.f32 %v792_v60, %v628_v21  ;;  %v2416_v0 = vadd.f32 %v1265_v19, %v1229_v55  ;;  %v2423_v26 = vadd.f32 %v577_v29, %v2139_v44  ;;  %v2426_v12 = vadd.f32 %v1178_v20, %v2151_v46  ;;  %v3084_v60 = vld [vmem:[#allocation19_spill] sm:$0xff] }
 0x149   : > { %v2429_v6 = vadd.f32 %v579_v40, %v2155_v5  ;;  %v2432_v33 = vadd.f32 %v1180_v58, %v2159_v57  ;;  %v2434_v34 = vpop.permute.xlu1 %735  ;;  %v748_v59 = vpop.permute.xlu0 %747  ;;  %v2437_v63 = vadd.f32 %v581_v48, %v2163_v25  ;;  %v2440_v3 = vadd.f32 %v1182_v2, %v2175_v42  ;;  %v3078_v57 = vld [vmem:[#allocation17_spill] sm:$0xff]  ;;  %v3079_v58 = vld [vmem:[#allocation24_spill] sm:$0xff] }
 0x14a   : > { %3076 = vst [vmem:[#allocation16_spill] sm:$0xff] %v2414_v31  ;;  %3077 = vst [vmem:[#allocation52_spill] sm:$0xff] %v2416_v0  ;;  %v794_v44 = vmul.f32 %v2004_v36, %v748_v59  ;;  %v1267_v46 = vmul.f32 %v2007_v28, %v748_v59  ;;  %v2445_v29 = vadd.f32 %v583_v32, %v2179_v43  ;;  %v3081_v43 = vld [vmem:[#allocation25_spill] sm:$0xff] }
 0x14b   : > { %v2448_v5 = vadd.f32 %v1184_v1, %v2191_v39  ;;  %v587_v20 = vmul.f32 %v1975_v16, %v3078_v57  ;;  %v1188_v25 = vmul.f32 %v1978_v22, %v3078_v57  ;;  %v2456_v42 = vadd.f32 %v585_v24, %v2195_v27  ;;  %v3083_v39 = vld [vmem:[#allocation18_spill] sm:$0xff]  ;;  %v3085_v1 = vld [vmem:[#allocation20_spill] sm:$0xff]  ;;  %v3086_v57 = vld [vmem:[#allocation29_spill] sm:$0xff] }
 0x14c   : > { %v2459_v40 = vadd.f32 %v1186_v49, %v2203_v8  ;;  %v2462_v48 = vadd.f32 %v794_v44, %v3079_v58  ;;  %v2465_v2 = vadd.f32 %v1267_v46, %v3081_v43  ;;  %v589_v21 = vmul.f32 %v1975_v16, %v3083_v39 }
 0x14d   : > { %v1190_v55 = vmul.f32 %v1978_v22, %v3083_v39  ;;  %v591_v27 = vmul.f32 %v1975_v16, %v3084_v60  ;;  %v1192_v8 = vmul.f32 %v1978_v22, %v3084_v60  ;;  %v2475_v19 = vpop.permute.xlu1 %743  ;;  %v756_v32 = vpop.permute.xlu0 %755  ;;  %v593_v51 = vmul.f32 %v1975_v16, %v3085_v1  ;;  %v3087_v39 = vld [vmem:[#allocation21_spill] sm:$0xff] }
 0x14e   : > { %3080 = vst [vmem:[#allocation17_spill] sm:$0xff] %v2462_v48  ;;  %3082 = vst [vmem:[#allocation24_spill] sm:$0xff] %v2465_v2  ;;  %v1194_v24 = vmul.f32 %v1978_v22, %v3085_v1  ;;  %v796_v49 = vmul.f32 %v2004_v36, %v756_v32  ;;  %v1269_v59 = vmul.f32 %v2007_v28, %v756_v32 }
 0x14f   : > { %v2484_v44 = vadd.f32 %v587_v20, %v2207_v9  ;;  %v2487_v46 = vadd.f32 %v1188_v25, %v2215_v50  ;;  %v766_v58 = vmul.f32 %v2004_v36, %v3086_v57  ;;  %v1239_v43 = vmul.f32 %v2007_v28, %v3086_v57  ;;  %v3088_v20 = vld [vmem:[#allocation27_spill] sm:$0xff]  ;;  %v3090_v50 = vld [vmem:[#allocation28_spill] sm:$0xff] }
 0x150   : > { %v595_v60 = vmul.f32 %v1975_v16, %v3087_v39  ;;  %v1196_v9 = vmul.f32 %v1978_v22, %v3087_v39  ;;  %v2503_v32 = vadd.f32 %v796_v49, %v3088_v20  ;;  %v2506_v25 = vadd.f32 %v1269_v59, %v3090_v50  ;;  %v3092_v39 = vld [vmem:[#allocation36_spill] sm:$0xff] }
 0x151   : > { %v2509_v1 = vadd.f32 %v589_v21, %v2219_v56  ;;  %v2512_v57 = vadd.f32 %v1190_v55, %v2231_v45  ;;  %v2515_v2 = vadd.f32 %v591_v27, %v2239_v11  ;;  %v2518_v48 = vadd.f32 %v1192_v8, %v2243_v13  ;;  %v2520_v0 = vpop.permute.xlu1 %751  ;;  %v3093_v27 = vld [vmem:[#allocation7_spill] sm:$0xff] }
 0x152   : > { %3089 = vst [vmem:[#allocation25_spill] sm:$0xff] %v2503_v32  ;;  %3091 = vst [vmem:[#allocation18_spill] sm:$0xff] %v2506_v25  ;;  %v2523_v49 = vadd.f32 %v593_v51, %v2255_v10  ;;  %v2526_v59 = vadd.f32 %v1194_v24, %v2267_v7  ;;  %v769_v56 = vmul.f32 %v2004_v36, %v3092_v39  ;;  %v832_v21 = vpop.permute.xlu0 %831  ;;  %v3094_v7 = vld [vmem:[#allocation8_spill] sm:$0xff]  ;;  %v3095_v24 = vld [vmem:[#allocation22_spill] sm:$0xff] }
 0x153   : > { %v1242_v45 = vmul.f32 %v2007_v28, %v3092_v39  ;;  %v798_v11 = vadd.f32 %v766_v58, %v2357_v52  ;;  %v1271_v13 = vadd.f32 %v1239_v43, %v2360_v61  ;;  %v962_v55 = vmul.f32 %v2351_v54, %v832_v21  ;;  %v2550_v52 = vld [vmem:[%s2962_s2] ss:$0 sm:$0xff]  ;;  %v3096_v61 = vld [vmem:[#allocation23_spill] sm:$0xff] }
 0x154   : > { %v1307_v10 = vmul.f32 %v2354_v62, %v832_v21  ;;  %v2538_v8 = vadd.f32 %v595_v60, %v3093_v27  ;;  %v2541_v51 = vadd.f32 %v1196_v9, %v3094_v7  ;;  %v597_v20 = vmul.f32 %v1975_v16, %v3095_v24  ;;  %v3097_v21 = vld [vmem:[#allocation26_spill] sm:$0xff] }
 0x155   : > { %v1198_v50 = vmul.f32 %v1978_v22, %v3095_v24  ;;  %v599_v58 = vmul.f32 %v1975_v16, %v3096_v61  ;;  %v1200_v43 = vmul.f32 %v1978_v22, %v3096_v61  ;;  %v994_v60 = vadd.f32 %v962_v55, %v798_v11  ;;  %v2556_v39 = vpop.permute.xlu1 %759 }
 0x156   : > { %v1339_v9 = vadd.f32 %v1307_v10, %v1271_v13  ;;  %v601_v27 = vmul.f32 %v1975_v16, %v3097_v21  ;;  %v1202_v7 = vmul.f32 %v1978_v22, %v3097_v21  ;;  %v801_v24 = vadd.f32 %v769_v56, %v2371_v30  ;;  %v844_v11 = vpop.permute.xlu0 %843  ;;  %v3100_v21 = vld [vmem:[#allocation12_spill] sm:$0xff] }
 0x157   : > { %v1274_v25 = vadd.f32 %v1242_v45, %v2374_v18  ;;  %v1032_v13 = vadd.f32 %v2550_v52, %v994_v60  ;;  %v965_v16 = vmul.f32 %v2351_v54, %v844_v11  ;;  %v1310_v22 = vmul.f32 %v2354_v62, %v844_v11  ;;  %v3098_v18 = vld [vmem:[#allocation50_spill] sm:$0xff]  ;;  %v3099_v45 = vld [vmem:[#allocation39_spill] sm:$0xff] }
 0x158   : > { %v1371_v55 = vadd.f32 %v2550_v52, %v1339_v9  ;;  %v2574_v30 = vadd.f32 %v597_v20, %v2291_v38  ;;  %v2577_v56 = vadd.f32 %v1198_v50, %v3098_v18  ;;  %v771_v10 = vmul.f32 %v2004_v36, %v3099_v45  ;;  %v3101_v11 = vld [vmem:[#allocation14_spill] sm:$0xff] }
 0x159   : > { %v1244_v61 = vmul.f32 %v2007_v28, %v3099_v45  ;;  %v2584_v60 = vadd.f32 %v599_v58, %v3100_v21  ;;  %v2587_v9 = vadd.f32 %v1200_v43, %v2315_v17  ;;  %1065 = vst.msk [vmem:[%s2567_s29] sm:$0xff] %vm1064_vm0, %v1032_v13  ;;  %v997_v38 = vadd.f32 %v965_v16, %v801_v24  ;;  %v3102_v45 = vld [vmem:[#allocation42_spill] sm:$0xff]  ;;  %v3103_v21 = vld [vmem:[#allocation45_spill] sm:$0xff] }
 0x15a   : > { %1506 = vst.msk [vmem:[%s2567_s29 + $0x10] sm:$0xff] %vm1064_vm0, %v1371_v55  ;;  %v1342_v20 = vadd.f32 %v1310_v22, %v1274_v25  ;;  %v2594_v50 = vadd.f32 %v601_v27, %v2336_v14  ;;  %v2597_v18 = vadd.f32 %v1202_v7, %v3101_v11  ;;  %v773_v58 = vmul.f32 %v2004_v36, %v3102_v45  ;;  %v836_v43 = vpop.permute.xlu1 %835  ;;  %v852_v27 = vpop.permute.xlu0 %851 }
 0x15b   : > { %v1246_v17 = vmul.f32 %v2007_v28, %v3102_v45  ;;  %v1035_v13 = vadd.f32 %v2550_v52, %v997_v38  ;;  %v963_v25 = vmul.f32 %v2351_v54, %v836_v43  ;;  %v1308_v14 = vmul.f32 %v2354_v62, %v836_v43  ;;  %v3105_v43 = vld [vmem:[#allocation31_spill] sm:$0xff] }
 0x15c   : > { %v1374_v24 = vadd.f32 %v2550_v52, %v1342_v20  ;;  %v803_v7 = vadd.f32 %v771_v10, %v2401_v15  ;;  %v1276_v55 = vadd.f32 %v1244_v61, %v2404_v4  ;;  %v967_v16 = vmul.f32 %v2351_v54, %v852_v27  ;;  %v3104_v20 = vld [vmem:[#allocation30_spill] sm:$0xff] }
 0x15d   : > { %v1312_v22 = vmul.f32 %v2354_v62, %v852_v27  ;;  %v775_v11 = vmul.f32 %v2004_v36, %v3103_v21  ;;  %v1248_v38 = vmul.f32 %v2007_v28, %v3103_v21  ;;  %1068 = vst.msk [vmem:[%s2567_s29 + $0x28] sm:$0xff] %vm1064_vm0, %v1035_v13  ;;  %v995_v45 = vadd.f32 %v963_v25, %v3104_v20  ;;  %v3108_v20 = vld [vmem:[#allocation48_spill] sm:$0xff] }
 0x15e   : > { %1509 = vst.msk [vmem:[%s2567_s29 + $0x38] sm:$0xff] %vm1064_vm0, %v1374_v24  ;;  %v1340_v15 = vadd.f32 %v1308_v14, %v3105_v43  ;;  %v805_v4 = vadd.f32 %v773_v58, %v2423_v26  ;;  %v1278_v10 = vadd.f32 %v1246_v17, %v2426_v12  ;;  %v999_v61 = vadd.f32 %v967_v16, %v803_v7  ;;  %v840_v32 = vpop.permute.xlu1 %839  ;;  %v860_v25 = vpop.permute.xlu0 %859 }
 0x15f   : > { %v1344_v27 = vadd.f32 %v1312_v22, %v1276_v55  ;;  %v1033_v31 = vadd.f32 %v2550_v52, %v995_v45  ;;  %v964_v13 = vmul.f32 %v2351_v54, %v840_v32  ;;  %v1309_v24 = vmul.f32 %v2354_v62, %v840_v32  ;;  %v3106_v55 = vld [vmem:[#allocation32_spill] sm:$0xff]  ;;  %v3107_v32 = vld [vmem:[#allocation33_spill] sm:$0xff] }
 0x160   : > { %v1372_v21 = vadd.f32 %v2550_v52, %v1340_v15  ;;  %v1037_v26 = vadd.f32 %v2550_v52, %v999_v61  ;;  %v969_v12 = vmul.f32 %v2351_v54, %v860_v25  ;;  %v1314_v17 = vmul.f32 %v2354_v62, %v860_v25 }
 0x161   : > { %v1376_v58 = vadd.f32 %v2550_v52, %v1344_v27  ;;  %v807_v14 = vadd.f32 %v775_v11, %v2429_v6  ;;  %v1280_v7 = vadd.f32 %v1248_v38, %v2432_v33  ;;  %1066 = vst.msk [vmem:[%s2567_s29 + $0x8] sm:$0xff] %vm1064_vm0, %v1033_v31  ;;  %v996_v16 = vadd.f32 %v964_v13, %v3106_v55 }
 0x162   : > { %1507 = vst.msk [vmem:[%s2567_s29 + $0x18] sm:$0xff] %vm1064_vm0, %v1372_v21  ;;  %v1341_v22 = vadd.f32 %v1309_v24, %v3107_v32  ;;  %v777_v45 = vmul.f32 %v2004_v36, %v3108_v20  ;;  %v1250_v43 = vmul.f32 %v2007_v28, %v3108_v20  ;;  %1070 = vst.msk [vmem:[%s2567_s29 + $0x48] sm:$0xff] %vm1064_vm0, %v1037_v26  ;;  %v848_v33 = vpop.permute.xlu1 %847  ;;  %v868_v27 = vpop.permute.xlu0 %867 }
 0x163   : > { %1511 = vst.msk [vmem:[%s2567_s29 + $0x58] sm:$0xff] %vm1064_vm0, %v1376_v58  ;;  %v1001_v6 = vadd.f32 %v969_v12, %v805_v4  ;;  %v1346_v31 = vadd.f32 %v1314_v17, %v1278_v10  ;;  %v1034_v11 = vadd.f32 %v2550_v52, %v996_v16  ;;  %v966_v15 = vmul.f32 %v2351_v54, %v848_v33  ;;  %v3109_v10 = vld [vmem:[#allocation3_spill] sm:$0xff]  ;;  %v3110_v58 = vld [vmem:[#allocation34_spill] sm:$0xff] }
 0x164   : > { %v1373_v38 = vadd.f32 %v2550_v52, %v1341_v22  ;;  %v1311_v61 = vmul.f32 %v2354_v62, %v848_v33  ;;  %v971_v24 = vmul.f32 %v2351_v54, %v868_v27  ;;  %v1316_v4 = vmul.f32 %v2354_v62, %v868_v27  ;;  %v3111_v17 = vld [vmem:[#allocation35_spill] sm:$0xff] }
 0x165   : > { %v1039_v21 = vadd.f32 %v2550_v52, %v1001_v6  ;;  %v1378_v13 = vadd.f32 %v2550_v52, %v1346_v31  ;;  %v779_v25 = vmul.f32 %v2004_v36, %v3109_v10  ;;  %v1252_v26 = vmul.f32 %v2007_v28, %v3109_v10  ;;  %1067 = vst.msk [vmem:[%s2567_s29 + $0x20] sm:$0xff] %vm1064_vm0, %v1034_v11 }
 0x166   : > { %1508 = vst.msk [vmem:[%s2567_s29 + $0x30] sm:$0xff] %vm1064_vm0, %v1373_v38  ;;  %v998_v12 = vadd.f32 %v966_v15, %v3110_v58  ;;  %v1343_v55 = vadd.f32 %v1311_v61, %v3111_v17  ;;  %v809_v16 = vadd.f32 %v777_v45, %v2437_v63  ;;  %v1282_v32 = vadd.f32 %v1250_v43, %v2440_v3  ;;  %v856_v6 = vpop.permute.xlu1 %855  ;;  %v876_v3 = vpop.permute.xlu0 %875  ;;  %v3112_v61 = vld [vmem:[#allocation37_spill] sm:$0xff] }
 0x167   : > { %1072 = vst.msk [vmem:[%s2567_s29 + $0x68] sm:$0xff] %vm1064_vm0, %v1039_v21  ;;  %1513 = vst.msk [vmem:[%s2567_s29 + $0x78] sm:$0xff] %vm1064_vm0, %v1378_v13  ;;  %v1003_v22 = vadd.f32 %v971_v24, %v807_v14  ;;  %v1348_v20 = vadd.f32 %v1316_v4, %v1280_v7  ;;  %v968_v11 = vmul.f32 %v2351_v54, %v856_v6  ;;  %v3113_v21 = vld [vmem:[#allocation38_spill] sm:$0xff] }
 0x168   : > { %v1036_v31 = vadd.f32 %v2550_v52, %v998_v12  ;;  %v1375_v33 = vadd.f32 %v2550_v52, %v1343_v55  ;;  %v1313_v63 = vmul.f32 %v2354_v62, %v856_v6  ;;  %v973_v38 = vmul.f32 %v2351_v54, %v876_v3  ;;  %v3114_v24 = vld [vmem:[#allocation6_spill] sm:$0xff] }
 0x169   : > { %v1041_v45 = vadd.f32 %v2550_v52, %v1003_v22  ;;  %v1380_v43 = vadd.f32 %v2550_v52, %v1348_v20  ;;  %v1318_v14 = vmul.f32 %v2354_v62, %v876_v3  ;;  %v811_v7 = vadd.f32 %v779_v25, %v2445_v29  ;;  %v3117_v3 = vld [vmem:[#allocation41_spill] sm:$0xff] }
 0x16a   : > { %v1284_v15 = vadd.f32 %v1252_v26, %v2448_v5  ;;  %1069 = vst.msk [vmem:[%s2567_s29 + $0x40] sm:$0xff] %vm1064_vm0, %v1036_v31  ;;  %1510 = vst.msk [vmem:[%s2567_s29 + $0x50] sm:$0xff] %vm1064_vm0, %v1375_v33  ;;  %v1000_v27 = vadd.f32 %v968_v11, %v3112_v61  ;;  %v1345_v13 = vadd.f32 %v1313_v63, %v3113_v21  ;;  %v864_v25 = vpop.permute.xlu1 %863  ;;  %v884_v55 = vpop.permute.xlu0 %883  ;;  %v3116_v11 = vld [vmem:[#allocation40_spill] sm:$0xff] }
 0x16b   : > { %v781_v4 = vmul.f32 %v2004_v36, %v3114_v24  ;;  %v1254_v10 = vmul.f32 %v2007_v28, %v3114_v24  ;;  %1074 = vst.msk [vmem:[%s2567_s29 + $0x88] sm:$0xff] %vm1064_vm0, %v1041_v45  ;;  %1515 = vst.msk [vmem:[%s2567_s29 + $0x98] sm:$0xff] %vm1064_vm0, %v1380_v43  ;;  %v1005_v29 = vadd.f32 %v973_v38, %v809_v16 }
 0x16c   : > { %v1350_v5 = vadd.f32 %v1318_v14, %v1282_v32  ;;  %v1038_v26 = vadd.f32 %v2550_v52, %v1000_v27  ;;  %v1377_v58 = vadd.f32 %v2550_v52, %v1345_v13  ;;  %v970_v12 = vmul.f32 %v2351_v54, %v864_v25  ;;  %v3115_v32 = vld [vmem:[#allocation11_spill] sm:$0xff] }
 0x16d   : > { %v1315_v17 = vmul.f32 %v2354_v62, %v864_v25  ;;  %v1043_v22 = vadd.f32 %v2550_v52, %v1005_v29  ;;  %v975_v6 = vmul.f32 %v2351_v54, %v884_v55  ;;  %v1320_v16 = vmul.f32 %v2354_v62, %v884_v55  ;;  %v3118_v25 = vld [vmem:[#allocation43_spill] sm:$0xff] }
 0x16e   : > { %v1382_v20 = vadd.f32 %v2550_v52, %v1350_v5  ;;  %v783_v31 = vmul.f32 %v2004_v36, %v3115_v32  ;;  %v1256_v33 = vmul.f32 %v2007_v28, %v3115_v32  ;;  %1071 = vst.msk [vmem:[%s2567_s29 + $0x60] sm:$0xff] %vm1064_vm0, %v1038_v26  ;;  %1512 = vst.msk [vmem:[%s2567_s29 + $0x70] sm:$0xff] %vm1064_vm0, %v1377_v58  ;;  %v872_v27 = vpop.permute.xlu1 %871  ;;  %v3119_v58 = vld [vmem:[#allocation44_spill] sm:$0xff] }
 0x16f   : > { %v1002_v63 = vadd.f32 %v970_v12, %v3116_v11  ;;  %v1347_v45 = vadd.f32 %v1315_v17, %v3117_v3  ;;  %v813_v43 = vadd.f32 %v781_v4, %v2456_v42  ;;  %v1286_v38 = vadd.f32 %v1254_v10, %v2459_v40  ;;  %1076 = vst.msk [vmem:[%s2567_s29 + $0xa8] sm:$0xff] %vm1064_vm0, %v1043_v22  ;;  %v892_v40 = vpop.permute.xlu0 %891  ;;  %v3120_v17 = vld [vmem:[#allocation15_spill] sm:$0xff] }
 0x170   : > { %1517 = vst.msk [vmem:[%s2567_s29 + $0xb8] sm:$0xff] %vm1064_vm0, %v1382_v20  ;;  %v1007_v14 = vadd.f32 %v975_v6, %v811_v7  ;;  %v1352_v61 = vadd.f32 %v1320_v16, %v1284_v15  ;;  %v972_v24 = vmul.f32 %v2351_v54, %v872_v27  ;;  %v1317_v42 = vmul.f32 %v2354_v62, %v872_v27  ;;  %v3122_v27 = vld [vmem:[#allocation47_spill] sm:$0xff] }
 0x171   : > { %v1040_v21 = vadd.f32 %v2550_v52, %v1002_v63  ;;  %v1379_v13 = vadd.f32 %v2550_v52, %v1347_v45  ;;  %v977_v29 = vmul.f32 %v2351_v54, %v892_v40  ;;  %v1322_v7 = vmul.f32 %v2354_v62, %v892_v40 }
 0x172   : > { %v1045_v4 = vadd.f32 %v2550_v52, %v1007_v14  ;;  %v1384_v10 = vadd.f32 %v2550_v52, %v1352_v61  ;;  %v815_v15 = vadd.f32 %v783_v31, %v2484_v44  ;;  %v1288_v5 = vadd.f32 %v1256_v33, %v2487_v46  ;;  %v880_v20 = vpop.permute.xlu1 %879  ;;  %v3121_v14 = vld [vmem:[#allocation46_spill] sm:$0xff] }
 0x173   : > { %1073 = vst.msk [vmem:[%s2567_s29 + $0x80] sm:$0xff] %vm1064_vm0, %v1040_v21  ;;  %1514 = vst.msk [vmem:[%s2567_s29 + $0x90] sm:$0xff] %vm1064_vm0, %v1379_v13  ;;  %v1004_v26 = vadd.f32 %v972_v24, %v3118_v25  ;;  %v1349_v12 = vadd.f32 %v1317_v42, %v3119_v58  ;;  %v785_v55 = vmul.f32 %v2004_v36, %v3120_v17  ;;  %v900_v33 = vpop.permute.xlu0 %899 }
 0x174   : > { %v1258_v22 = vmul.f32 %v2007_v28, %v3120_v17  ;;  %1078 = vst.msk [vmem:[%s2567_s29 + $0xc8] sm:$0xff] %vm1064_vm0, %v1045_v4  ;;  %1519 = vst.msk [vmem:[%s2567_s29 + $0xd8] sm:$0xff] %vm1064_vm0, %v1384_v10  ;;  %v1009_v44 = vadd.f32 %v977_v29, %v813_v43  ;;  %v1354_v46 = vadd.f32 %v1322_v7, %v1286_v38 }
 0x175   : > { %v1042_v6 = vadd.f32 %v2550_v52, %v1004_v26  ;;  %v1381_v16 = vadd.f32 %v2550_v52, %v1349_v12  ;;  %v974_v32 = vmul.f32 %v2351_v54, %v880_v20  ;;  %v1319_v31 = vmul.f32 %v2354_v62, %v880_v20  ;;  %v3123_v12 = vld [vmem:[#allocation2_spill] sm:$0xff] }
 0x176   : > { %v1047_v11 = vadd.f32 %v2550_v52, %v1009_v44  ;;  %v1386_v63 = vadd.f32 %v2550_v52, %v1354_v46  ;;  %v979_v3 = vmul.f32 %v2351_v54, %v900_v33  ;;  %v1324_v45 = vmul.f32 %v2354_v62, %v900_v33  ;;  %v888_v40 = vpop.permute.xlu1 %887 }
 0x177   : > { %v787_v43 = vmul.f32 %v2004_v36, %v2362_v35  ;;  %v1260_v38 = vmul.f32 %v2007_v28, %v2362_v35  ;;  %1075 = vst.msk [vmem:[%s2567_s29 + $0xa0] sm:$0xff] %vm1064_vm0, %v1042_v6  ;;  %1516 = vst.msk [vmem:[%s2567_s29 + $0xb0] sm:$0xff] %vm1064_vm0, %v1381_v16  ;;  %v1006_v61 = vadd.f32 %v974_v32, %v3121_v14 }
 0x178   : > { %v1351_v21 = vadd.f32 %v1319_v31, %v3122_v27  ;;  %v817_v13 = vadd.f32 %v785_v55, %v2509_v1  ;;  %v1290_v24 = vadd.f32 %v1258_v22, %v2512_v57  ;;  %1080 = vst.msk [vmem:[%s2567_s29 + $0xe8] sm:$0xff] %vm1064_vm0, %v1047_v11  ;;  %1521 = vst.msk [vmem:[%s2567_s29 + $0xf8] sm:$0xff] %vm1064_vm0, %v1386_v63  ;;  %v908_v57 = vpop.permute.xlu0 %907  ;;  %v3124_v55 = vld [vmem:[#allocation49_spill] sm:$0xff] }
 0x179   : > { %v1011_v42 = vadd.f32 %v979_v3, %v815_v15  ;;  %v1356_v35 = vadd.f32 %v1324_v45, %v1288_v5  ;;  %v1044_v4 = vadd.f32 %v2550_v52, %v1006_v61  ;;  %v976_v29 = vmul.f32 %v2351_v54, %v888_v40  ;;  %v3126_v61 = vld [vmem:[#allocation5_spill] sm:$0xff] }
 0x17a   : > { %v1383_v10 = vadd.f32 %v2550_v52, %v1351_v21  ;;  %v1321_v1 = vmul.f32 %v2354_v62, %v888_v40  ;;  %v981_v26 = vmul.f32 %v2351_v54, %v908_v57  ;;  %v1326_v15 = vmul.f32 %v2354_v62, %v908_v57  ;;  %v896_v20 = vpop.permute.xlu1 %895 }
 0x17b   : > { %v1049_v7 = vadd.f32 %v2550_v52, %v1011_v42  ;;  %v1388_v25 = vadd.f32 %v2550_v52, %v1356_v35  ;;  %v819_v5 = vadd.f32 %v787_v43, %v2515_v2  ;;  %v1292_v58 = vadd.f32 %v1260_v38, %v2518_v48  ;;  %1077 = vst.msk [vmem:[%s2567_s29 + $0xc0] sm:$0xff] %vm1064_vm0, %v1044_v4  ;;  %v3125_v38 = vld [vmem:[#allocation4_spill] sm:$0xff] }
 0x17c   : > { %1518 = vst.msk [vmem:[%s2567_s29 + $0xd0] sm:$0xff] %vm1064_vm0, %v1383_v10  ;;  %v1008_v17 = vadd.f32 %v976_v29, %v3123_v12  ;;  %v1353_v22 = vadd.f32 %v1321_v1, %v3124_v55  ;;  %v789_v44 = vmul.f32 %v2004_v36, %v2396_v53  ;;  %v1262_v46 = vmul.f32 %v2007_v28, %v2396_v53  ;;  %v916_v53 = vpop.permute.xlu0 %915 }
 0x17d   : > { %1082 = vst.msk [vmem:[%s2567_s29 + $0x108] sm:$0xff] %vm1064_vm0, %v1049_v7  ;;  %1523 = vst.msk [vmem:[%s2567_s29 + $0x118] sm:$0xff] %vm1064_vm0, %v1388_v25  ;;  %v1013_v48 = vadd.f32 %v981_v26, %v817_v13  ;;  %v1358_v2 = vadd.f32 %v1326_v15, %v1290_v24  ;;  %v978_v32 = vmul.f32 %v2351_v54, %v896_v20  ;;  %v3127_v26 = vld [vmem:[#allocation9_spill] sm:$0xff] }
 0x17e   : > { %v1046_v6 = vadd.f32 %v2550_v52, %v1008_v17  ;;  %v1385_v16 = vadd.f32 %v2550_v52, %v1353_v22  ;;  %v1323_v31 = vmul.f32 %v2354_v62, %v896_v20  ;;  %v983_v63 = vmul.f32 %v2351_v54, %v916_v53  ;;  %v904_v42 = vpop.permute.xlu1 %903 }
 0x17f   : > { %v1051_v33 = vadd.f32 %v2550_v52, %v1013_v48  ;;  %v1390_v11 = vadd.f32 %v2550_v52, %v1358_v2  ;;  %v1328_v3 = vmul.f32 %v2354_v62, %v916_v53  ;;  %v791_v45 = vmul.f32 %v2004_v36, %v2434_v34  ;;  %v3129_v53 = vld [vmem:[#allocation13_spill] sm:$0xff] }
 0x180   : > { %v1264_v43 = vmul.f32 %v2007_v28, %v2434_v34  ;;  %1079 = vst.msk [vmem:[%s2567_s29 + $0xe0] sm:$0xff] %vm1064_vm0, %v1046_v6  ;;  %1520 = vst.msk [vmem:[%s2567_s29 + $0xf0] sm:$0xff] %vm1064_vm0, %v1385_v16  ;;  %v1010_v14 = vadd.f32 %v978_v32, %v3125_v38  ;;  %v1355_v27 = vadd.f32 %v1323_v31, %v3126_v61 }
 0x181   : > { %v821_v21 = vadd.f32 %v789_v44, %v2523_v49  ;;  %v1294_v13 = vadd.f32 %v1262_v46, %v2526_v59  ;;  %1084 = vst.msk [vmem:[%s2567_s29 + $0x128] sm:$0xff] %vm1064_vm0, %v1051_v33  ;;  %1525 = vst.msk [vmem:[%s2567_s29 + $0x138] sm:$0xff] %vm1064_vm0, %v1390_v11  ;;  %v1015_v24 = vadd.f32 %v983_v63, %v819_v5  ;;  %v924_v59 = vpop.permute.xlu0 %923  ;;  %v3128_v5 = vld [vmem:[#allocation10_spill] sm:$0xff]  ;;  %v3130_v11 = vld [vmem:[#allocation51_spill] sm:$0xff] }
 0x182   : > { %v1360_v34 = vadd.f32 %v1328_v3, %v1292_v58  ;;  %v1048_v35 = vadd.f32 %v2550_v52, %v1010_v14  ;;  %v1387_v40 = vadd.f32 %v2550_v52, %v1355_v27  ;;  %v980_v4 = vmul.f32 %v2351_v54, %v904_v42  ;;  %v912_v55 = vpop.permute.xlu1 %911 }
 0x183   : > { %v1325_v49 = vmul.f32 %v2354_v62, %v904_v42  ;;  %v1053_v10 = vadd.f32 %v2550_v52, %v1015_v24  ;;  %v985_v1 = vmul.f32 %v2351_v54, %v924_v59  ;;  %v1330_v57 = vmul.f32 %v2354_v62, %v924_v59 }
 0x184   : > { %v1392_v29 = vadd.f32 %v2550_v52, %v1360_v34  ;;  %v823_v7 = vadd.f32 %v791_v45, %v2538_v8  ;;  %v1296_v25 = vadd.f32 %v1264_v43, %v2541_v51  ;;  %1081 = vst.msk [vmem:[%s2567_s29 + $0x100] sm:$0xff] %vm1064_vm0, %v1048_v35  ;;  %1522 = vst.msk [vmem:[%s2567_s29 + $0x110] sm:$0xff] %vm1064_vm0, %v1387_v40 }
 0x185   : > { %v1012_v15 = vadd.f32 %v980_v4, %v3127_v26  ;;  %v1357_v58 = vadd.f32 %v1325_v49, %v3128_v5  ;;  %v793_v12 = vmul.f32 %v2004_v36, %v2475_v19  ;;  %v1266_v17 = vmul.f32 %v2007_v28, %v2475_v19  ;;  %1086 = vst.msk [vmem:[%s2567_s29 + $0x148] sm:$0xff] %vm1064_vm0, %v1053_v10  ;;  %v932_v19 = vpop.permute.xlu0 %931 }
 0x186   : > { %1527 = vst.msk [vmem:[%s2567_s29 + $0x158] sm:$0xff] %vm1064_vm0, %v1392_v29  ;;  %v1017_v8 = vadd.f32 %v985_v1, %v821_v21  ;;  %v1362_v51 = vadd.f32 %v1330_v57, %v1294_v13  ;;  %v982_v46 = vmul.f32 %v2351_v54, %v912_v55  ;;  %v1327_v48 = vmul.f32 %v2354_v62, %v912_v55  ;;  %v920_v38 = vpop.permute.xlu1 %919 }
 0x187   : > { %v1050_v22 = vadd.f32 %v2550_v52, %v1012_v15  ;;  %v1389_v44 = vadd.f32 %v2550_v52, %v1357_v58  ;;  %v987_v6 = vmul.f32 %v2351_v54, %v932_v19  ;;  %v1332_v16 = vmul.f32 %v2354_v62, %v932_v19  ;;  %v3132_v19 = vld [vmem:[#allocation52_spill] sm:$0xff] }
 0x188   : > { %v1055_v2 = vadd.f32 %v2550_v52, %v1017_v8  ;;  %v1394_v20 = vadd.f32 %v2550_v52, %v1362_v51  ;;  %v795_v32 = vmul.f32 %v2004_v36, %v2520_v0  ;;  %v1268_v31 = vmul.f32 %v2007_v28, %v2520_v0 }
 0x189   : > { %1083 = vst.msk [vmem:[%s2567_s29 + $0x120] sm:$0xff] %vm1064_vm0, %v1050_v22  ;;  %1524 = vst.msk [vmem:[%s2567_s29 + $0x130] sm:$0xff] %vm1064_vm0, %v1389_v44  ;;  %v1014_v33 = vadd.f32 %v982_v46, %v3129_v53  ;;  %v1359_v63 = vadd.f32 %v1327_v48, %v3130_v11  ;;  %v825_v3 = vadd.f32 %v793_v12, %v2574_v30  ;;  %v3131_v46 = vld [vmem:[#allocation16_spill] sm:$0xff] }
 0x18a   : > { %v1298_v45 = vadd.f32 %v1266_v17, %v2577_v56  ;;  %1088 = vst.msk [vmem:[%s2567_s29 + $0x168] sm:$0xff] %vm1064_vm0, %v1055_v2  ;;  %1529 = vst.msk [vmem:[%s2567_s29 + $0x178] sm:$0xff] %vm1064_vm0, %v1394_v20  ;;  %v1019_v43 = vadd.f32 %v987_v6, %v823_v7  ;;  %v1364_v0 = vadd.f32 %v1332_v16, %v1296_v25  ;;  %v940_v56 = vpop.permute.xlu0 %939  ;;  %v928_v10 = vpop.permute.xlu1 %927 }
 0x18b   : > { %v1052_v14 = vadd.f32 %v2550_v52, %v1014_v33  ;;  %v1391_v61 = vadd.f32 %v2550_v52, %v1359_v63  ;;  %v984_v27 = vmul.f32 %v2351_v54, %v920_v38  ;;  %v1329_v30 = vmul.f32 %v2354_v62, %v920_v38 }
 0x18c   : > { %v1057_v21 = vadd.f32 %v2550_v52, %v1019_v43  ;;  %v1396_v13 = vadd.f32 %v2550_v52, %v1364_v0  ;;  %v989_v24 = vmul.f32 %v2351_v54, %v940_v56  ;;  %v1334_v34 = vmul.f32 %v2354_v62, %v940_v56  ;;  %v3134_v43 = vld [vmem:[#allocation24_spill] sm:$0xff]  ;;  %v3135_v56 = vld [vmem:[#allocation25_spill] sm:$0xff] }
 0x18d   : > { %v827_v42 = vadd.f32 %v795_v32, %v2584_v60  ;;  %v1300_v35 = vadd.f32 %v1268_v31, %v2587_v9  ;;  %1085 = vst.msk [vmem:[%s2567_s29 + $0x140] sm:$0xff] %vm1064_vm0, %v1052_v14  ;;  %1526 = vst.msk [vmem:[%s2567_s29 + $0x150] sm:$0xff] %vm1064_vm0, %v1391_v61  ;;  %v1016_v40 = vadd.f32 %v984_v27, %v2346_v47 }
 0x18e   : > { %v1361_v4 = vadd.f32 %v1329_v30, %v2348_v37  ;;  %v797_v49 = vmul.f32 %v2004_v36, %v2556_v39  ;;  %v1270_v59 = vmul.f32 %v2007_v28, %v2556_v39  ;;  %1090 = vst.msk [vmem:[%s2567_s29 + $0x188] sm:$0xff] %vm1064_vm0, %v1057_v21  ;;  %1531 = vst.msk [vmem:[%s2567_s29 + $0x198] sm:$0xff] %vm1064_vm0, %v1396_v13  ;;  %v948_v1 = vpop.permute.xlu0 %947  ;;  %v936_v17 = vpop.permute.xlu1 %935  ;;  %v3136_v13 = vld [vmem:[#allocation18_spill] sm:$0xff] }
 0x18f   : > { %v1021_v60 = vadd.f32 %v989_v24, %v825_v3  ;;  %v1366_v9 = vadd.f32 %v1334_v34, %v1298_v45  ;;  %v1054_v47 = vadd.f32 %v2550_v52, %v1016_v40  ;;  %v986_v36 = vmul.f32 %v2351_v54, %v928_v10  ;;  %v3133_v3 = vld [vmem:[#allocation17_spill] sm:$0xff] }
 0x190   : > { %v1393_v37 = vadd.f32 %v2550_v52, %v1361_v4  ;;  %v1331_v29 = vmul.f32 %v2354_v62, %v928_v10  ;;  %v991_v57 = vmul.f32 %v2351_v54, %v948_v1  ;;  %v1336_v7 = vmul.f32 %v2354_v62, %v948_v1 }
 0x191   : > { %v1059_v28 = vadd.f32 %v2550_v52, %v1021_v60  ;;  %v1398_v39 = vadd.f32 %v2550_v52, %v1366_v9  ;;  %1087 = vst.msk [vmem:[%s2567_s29 + $0x160] sm:$0xff] %vm1064_vm0, %v1054_v47  ;;  %v1018_v25 = vadd.f32 %v986_v36, %v2384_v23  ;;  %v829_v15 = vadd.f32 %v797_v49, %v2594_v50 }
 0x192   : > { %1528 = vst.msk [vmem:[%s2567_s29 + $0x170] sm:$0xff] %vm1064_vm0, %v1393_v37  ;;  %v1363_v26 = vadd.f32 %v1331_v29, %v2386_v41  ;;  %v1302_v5 = vadd.f32 %v1270_v59, %v2597_v18  ;;  %v1023_v58 = vadd.f32 %v991_v57, %v827_v42  ;;  %v1368_v12 = vadd.f32 %v1336_v7, %v1300_v35  ;;  %v956_v51 = vpop.permute.xlu0 %955  ;;  %v944_v16 = vpop.permute.xlu1 %943 }
 0x193   : > { %1092 = vst.msk [vmem:[%s2567_s29 + $0x1a8] sm:$0xff] %vm1064_vm0, %v1059_v28  ;;  %1533 = vst.msk [vmem:[%s2567_s29 + $0x1b8] sm:$0xff] %vm1064_vm0, %v1398_v39  ;;  %v1056_v8 = vadd.f32 %v2550_v52, %v1018_v25  ;;  %v988_v41 = vmul.f32 %v2351_v54, %v936_v17  ;;  %v1333_v50 = vmul.f32 %v2354_v62, %v936_v17 }
 0x194   : > { %v1395_v23 = vadd.f32 %v2550_v52, %v1363_v26  ;;  %v1061_v18 = vadd.f32 %v2550_v52, %v1023_v58  ;;  %v1400_v55 = vadd.f32 %v2550_v52, %v1368_v12  ;;  %v993_v22 = vmul.f32 %v2351_v54, %v956_v51 }
 0x195   : > { %v1338_v44 = vmul.f32 %v2354_v62, %v956_v51  ;;  %1089 = vst.msk [vmem:[%s2567_s29 + $0x180] sm:$0xff] %vm1064_vm0, %v1056_v8  ;;  %v1020_v48 = vadd.f32 %v988_v41, %v3131_v46  ;;  %v1365_v2 = vadd.f32 %v1333_v50, %v3132_v19  ;;  %v990_v53 = vmul.f32 %v2351_v54, %v944_v16 }
 0x196   : > { %1530 = vst.msk [vmem:[%s2567_s29 + $0x190] sm:$0xff] %vm1064_vm0, %v1395_v23  ;;  %1094 = vst.msk [vmem:[%s2567_s29 + $0x1c8] sm:$0xff] %vm1064_vm0, %v1061_v18  ;;  %v1025_v20 = vadd.f32 %v993_v22, %v829_v15  ;;  %v1335_v33 = vmul.f32 %v2354_v62, %v944_v16  ;;  %v952_v38 = vpop.permute.xlu1 %951 }
 0x197   : > { %1535 = vst.msk [vmem:[%s2567_s29 + $0x1d8] sm:$0xff] %vm1064_vm0, %v1400_v55  ;;  %v1370_v6 = vadd.f32 %v1338_v44, %v1302_v5  ;;  %v1058_v32 = vadd.f32 %v2550_v52, %v1020_v48  ;;  %v1397_v31 = vadd.f32 %v2550_v52, %v1365_v2  ;;  %v1022_v45 = vadd.f32 %v990_v53, %v3133_v3 }
 0x198   : > { %v1063_v11 = vadd.f32 %v2550_v52, %v1025_v20  ;;  %v1367_v0 = vadd.f32 %v1335_v33, %v3134_v43  ;;  %v992_v27 = vmul.f32 %v2351_v54, %v952_v38  ;;  %v1337_v30 = vmul.f32 %v2354_v62, %v952_v38 }
 0x199   : > { %v1402_v63 = vadd.f32 %v2550_v52, %v1370_v6  ;;  %1091 = vst.msk [vmem:[%s2567_s29 + $0x1a0] sm:$0xff] %vm1064_vm0, %v1058_v32  ;;  %1532 = vst.msk [vmem:[%s2567_s29 + $0x1b0] sm:$0xff] %vm1064_vm0, %v1397_v31  ;;  %v1060_v14 = vadd.f32 %v2550_v52, %v1022_v45 }
 0x19a   : > { %1096 = vst.msk [vmem:[%s2567_s29 + $0x1e8] sm:$0xff] %vm1064_vm0, %v1063_v11  ;;  %v1399_v61 = vadd.f32 %v2550_v52, %v1367_v0  ;;  %v1024_v21 = vadd.f32 %v992_v27, %v3135_v56  ;;  %v1369_v24 = vadd.f32 %v1337_v30, %v3136_v13 }
 0x19b   : > { %1537 = vst.msk [vmem:[%s2567_s29 + $0x1f8] sm:$0xff] %vm1064_vm0, %v1402_v63  ;;  %1093 = vst.msk [vmem:[%s2567_s29 + $0x1c0] sm:$0xff] %vm1064_vm0, %v1060_v14 }
 0x19c   : > { %1534 = vst.msk [vmem:[%s2567_s29 + $0x1d0] sm:$0xff] %vm1064_vm0, %v1399_v61  ;;  %v1062_v34 = vadd.f32 %v2550_v52, %v1024_v21  ;;  %v1401_v42 = vadd.f32 %v2550_v52, %v1369_v24 }
 0x19e   : > { %1095 = vst.msk [vmem:[%s2567_s29 + $0x1e0] sm:$0xff] %vm1064_vm0, %v1062_v34  ;;  %1536 = vst.msk [vmem:[%s2567_s29 + $0x1f0] sm:$0xff] %vm1064_vm0, %v1401_v42 }
 0x19f PF: > { %s13_s12 = sadd.s32 1, %s1567_s12  }
 0x1a0   : > { %p10_p5 = scmp.ge.s32.totalorder %s13_s12, 4  }
 0x1a2   :  { %12 = sbr.rel (!%p10_p5) target bundleno = 1 (0x1), region = 64 }

// kernel: tpu_custom_call.1
= control target key start
LH: loop header
LB: loop body
LE: loop exit
PB: predicated region body
PF: predicated region fallthrough
CT: control target
= control target key end

     0   :  { %s1593_s12 = smov 0   ;;  %s2960_s0 = inlined_call_operand.vmem [shape: f32[512,4], index: 0, kind: input, shape index: {}]   ;;  %s2961_s1 = inlined_call_operand.vmem [shape: f32[2,4,16], index: 1, kind: input, shape index: {}]   ;;  %s2962_s2 = inlined_call_operand.vmem [shape: f32[1,16], index: 2, kind: input, shape index: {}]   ;;  %s2963_s3 = inlined_call_operand.vmem [shape: f32[32,2,16,16], index: 3, kind: output, shape index: {}]  }
   0x1 LB: > { %s1494_s13 = sadd.s32 4294967295, %s1567_s12   ;;  %p1498_p0 = scmp.ge.s32.totalorder %s1567_s12, 1  ;;  %s1567_s12 = sphi %s1593_s12, %s13_s12  }
   0x2   : > { %p138_p1 = scmp.lt.s32.totalorder %s1567_s12, 3 }
   0x4   : > { %p139_p2 = pnand %p1498_p0, %p138_p1 }
   0x6   : > { %142 = sbr.rel (%p139_p2) target bundleno = 415 (0x19f), region = 32 }
   0xd   : > { %s1499_s14 = sshll.u32 %s1494_s13, 5  ;;  %v1569_v0 = vmov 0   ;;  %v1570_v33 = vmov 1   ;;  %v1571_v36 = vmov 2   ;;  %v370_v57 = vlaneseq  ;;  %s2420_s23 = sshll.u32 %s1494_s13, 4 }
   0xe   : > { %1554 = vset.pattern.permute.xlu1 %v1569_v0  ;;  %1553 = vset.pattern.permute.xlu0 %v1569_v0  ;;  %p164_p3 = scmp.lt.s32.totalorder %s1499_s14, 63  ;;  %v1852_v0 = vld [vmem:[%s2961_s1] sm:$0xf]  ;;  %p170_p4 = scmp.lt.s32.totalorder %s2420_s23, 31  ;;  %vm1064_vm0 = vcmask 130048  }
   0xf   : > { %v1838_v60 = vshrl.u32 %v370_v57, 7 }
  0x10   : > { %s3138_s14 = smov (!%p164_p3, %s1499_s14), 63  ;;  %s3140_s23 = smov (!%p170_p4, %s2420_s23), 31 }
  0x11   : > { %s1500_s15 = sshll.u32 %s3138_s14, 3  ;;  %v372_v63 = vsub.s32 0, %v1838_v60  ;;  %s1540_s24 = sshll.u32 %s3140_s23, 5 }
  0x12   : > { %s1606_s18 = scalar_lea.vmem %s2960_s0, %s1500_s15  ;;  %s2567_s29 = scalar_lea.vmem %s2963_s3, %s1540_s24 }
  0x13   : > { %v1609_v1 = vld [vmem:[%s1606_s18 + $0x10] sm:$0xff]  ;;  %v1612_v2 = vld [vmem:[%s1606_s18] sm:$0xff]  ;;  %v1617_v3 = vld [vmem:[%s1606_s18 + $0x18] sm:$0xff] }
  0x14   : > { %222 = vperm.xlu1 %1554, %v1609_v1   ;;  %212 = vperm.xlu0 %1553, %v1612_v2   ;;  %v1620_v4 = vld [vmem:[%s1606_s18 + $0x8] sm:$0xff]  ;;  %v1628_v6 = vld [vmem:[%s1606_s18 + $0x20] sm:$0xff]  ;;  %v1633_v7 = vld [vmem:[%s1606_s18 + $0x38] sm:$0xff] }
  0x15   : > { %v1625_v5 = vld [vmem:[%s1606_s18 + $0x28] sm:$0xff]  ;;  %v1636_v8 = vld [vmem:[%s1606_s18 + $0x30] sm:$0xff]  ;;  %v1644_v10 = vld [vmem:[%s1606_s18 + $0x40] sm:$0xff] }
  0x16   : > { %v1641_v9 = vld [vmem:[%s1606_s18 + $0x48] sm:$0xff]  ;;  %v1649_v11 = vld [vmem:[%s1606_s18 + $0x58] sm:$0xff]  ;;  %v1652_v12 = vld [vmem:[%s1606_s18 + $0x50] sm:$0xff] }
  0x17   : > { %v1657_v13 = vld [vmem:[%s1606_s18 + $0x68] sm:$0xff]  ;;  %v1660_v14 = vld [vmem:[%s1606_s18 + $0x60] sm:$0xff]  ;;  %v1665_v15 = vld [vmem:[%s1606_s18 + $0x78] sm:$0xff] }
  0x18   : > { %227 = vperm.xlu1 %1554, %v1617_v3   ;;  %217 = vperm.xlu0 %1553, %v1620_v4   ;;  %v1668_v16 = vld [vmem:[%s1606_s18 + $0x70] sm:$0xff]  ;;  %v1673_v17 = vld [vmem:[%s1606_s18 + $0x88] sm:$0xff]  ;;  %v1676_v18 = vld [vmem:[%s1606_s18 + $0x80] sm:$0xff] }
  0x19   : > { %v1681_v19 = vld [vmem:[%s1606_s18 + $0x98] sm:$0xff]  ;;  %v1684_v20 = vld [vmem:[%s1606_s18 + $0x90] sm:$0xff]  ;;  %v1689_v21 = vld [vmem:[%s1606_s18 + $0xa8] sm:$0xff] }
  0x1a   : > { %v1692_v22 = vld [vmem:[%s1606_s18 + $0xa0] sm:$0xff]  ;;  %v1697_v23 = vld [vmem:[%s1606_s18 + $0xb8] sm:$0xff]  ;;  %v1700_v24 = vld [vmem:[%s1606_s18 + $0xb0] sm:$0xff] }
  0x1b   : > { %v1705_v25 = vld [vmem:[%s1606_s18 + $0xc8] sm:$0xff]  ;;  %v1708_v26 = vld [vmem:[%s1606_s18 + $0xc0] sm:$0xff]  ;;  %v1713_v27 = vld [vmem:[%s1606_s18 + $0xd8] sm:$0xff] }
  0x1c   : > { %237 = vperm.xlu1 %1554, %v1625_v5   ;;  %232 = vperm.xlu0 %1553, %v1628_v6   ;;  %v1716_v28 = vld [vmem:[%s1606_s18 + $0xd0] sm:$0xff]  ;;  %v1721_v29 = vld [vmem:[%s1606_s18 + $0xe8] sm:$0xff]  ;;  %v1724_v30 = vld [vmem:[%s1606_s18 + $0xe0] sm:$0xff] }
  0x1d   : > { %v1729_v31 = vld [vmem:[%s1606_s18 + $0xf8] sm:$0xff]  ;;  %v1732_v32 = vld [vmem:[%s1606_s18 + $0xf0] sm:$0xff] }
  0x20   : > { %247 = vperm.xlu1 %1554, %v1633_v7   ;;  %242 = vperm.xlu0 %1553, %v1636_v8  }
  0x24   : > { %257 = vperm.xlu1 %1554, %v1641_v9   ;;  %252 = vperm.xlu0 %1553, %v1644_v10  }
  0x28   : > { %267 = vperm.xlu1 %1554, %v1649_v11   ;;  %262 = vperm.xlu0 %1553, %v1652_v12  }
  0x2c   : > { %277 = vperm.xlu1 %1554, %v1657_v13   ;;  %272 = vperm.xlu0 %1553, %v1660_v14  }
  0x30   : > { %287 = vperm.xlu1 %1554, %v1665_v15   ;;  %282 = vperm.xlu0 %1553, %v1668_v16  }
  0x34   : > { %297 = vperm.xlu1 %1554, %v1673_v17   ;;  %292 = vperm.xlu0 %1553, %v1676_v18  }
  0x38   : > { %307 = vperm.xlu1 %1554, %v1681_v19   ;;  %302 = vperm.xlu0 %1553, %v1684_v20  }
  0x3c   : > { %317 = vperm.xlu1 %1554, %v1689_v21   ;;  %312 = vperm.xlu0 %1553, %v1692_v22  }
  0x40   : > { %327 = vperm.xlu1 %1554, %v1697_v23   ;;  %322 = vperm.xlu0 %1553, %v1700_v24  }
  0x44   : > { %337 = vperm.xlu1 %1554, %v1705_v25   ;;  %332 = vperm.xlu0 %1553, %v1708_v26  }
  0x48   : > { %347 = vperm.xlu1 %1554, %v1713_v27   ;;  %342 = vperm.xlu0 %1553, %v1716_v28  }
  0x4c   : > { %357 = vperm.xlu1 %1554, %v1721_v29   ;;  %352 = vperm.xlu0 %1553, %v1724_v30  }
  0x50   : > { %367 = vperm.xlu1 %1554, %v1729_v31   ;;  %362 = vperm.xlu0 %1553, %v1732_v32  }
  0x54   : > { %1556 = vset.pattern.permute.xlu1 %v1570_v33  ;;  %1555 = vset.pattern.permute.xlu0 %v1570_v33  ;;  %v1857_v33 = vld [vmem:[%s2961_s1 + $0x4] sm:$0xf] }
  0x55   : > { %443 = vperm.xlu1 %1556, %v1620_v4   ;;  %439 = vperm.xlu0 %1555, %v1612_v2  }
  0x59   : > { %447 = vperm.xlu1 %1556, %v1609_v1   ;;  %451 = vperm.xlu0 %1555, %v1617_v3  }
  0x5d   : > { %455 = vperm.xlu1 %1556, %v1628_v6   ;;  %459 = vperm.xlu0 %1555, %v1625_v5  }
  0x61   : > { %463 = vperm.xlu1 %1556, %v1636_v8   ;;  %467 = vperm.xlu0 %1555, %v1633_v7  }
  0x65   : > { %471 = vperm.xlu1 %1556, %v1644_v10   ;;  %475 = vperm.xlu0 %1555, %v1641_v9  }
  0x69   : > { %479 = vperm.xlu1 %1556, %v1652_v12   ;;  %483 = vperm.xlu0 %1555, %v1649_v11  }
  0x6d   : > { %487 = vperm.xlu1 %1556, %v1660_v14   ;;  %491 = vperm.xlu0 %1555, %v1657_v13  }
  0x71   : > { %495 = vperm.xlu1 %1556, %v1668_v16   ;;  %499 = vperm.xlu0 %1555, %v1665_v15  }
  0x75   : > { %503 = vperm.xlu1 %1556, %v1676_v18   ;;  %507 = vperm.xlu0 %1555, %v1673_v17  }
  0x79   : > { %511 = vperm.xlu1 %1556, %v1684_v20   ;;  %515 = vperm.xlu0 %1555, %v1681_v19  }
  0x7d   : > { %519 = vperm.xlu1 %1556, %v1692_v22   ;;  %523 = vperm.xlu0 %1555, %v1689_v21  }
  0x81   : > { %527 = vperm.xlu1 %1556, %v1700_v24   ;;  %531 = vperm.xlu0 %1555, %v1697_v23  }
  0x85   : > { %535 = vperm.xlu1 %1556, %v1708_v26   ;;  %539 = vperm.xlu0 %1555, %v1705_v25  }
  0x89   : > { %543 = vperm.xlu1 %1556, %v1716_v28   ;;  %547 = vperm.xlu0 %1555, %v1713_v27  }
  0x8d   : > { %551 = vperm.xlu1 %1556, %v1724_v30   ;;  %555 = vperm.xlu0 %1555, %v1721_v29  }
  0x91   : > { %559 = vperm.xlu1 %1556, %v1732_v32   ;;  %563 = vperm.xlu0 %1555, %v1729_v31  }
  0x93   : > { %v1768_v34 = vpop.permute.xlu1 %222  ;;  %v1770_v35 = vpop.permute.xlu0 %212 }
  0x95   : > { %1557 = vset.pattern.permute.xlu1 %v1571_v36  ;;  %1558 = vset.pattern.permute.xlu0 %v1571_v36 }
  0x96   : > { %635 = vperm.xlu1 %1557, %v1612_v2   ;;  %639 = vperm.xlu0 %1558, %v1620_v4  }
  0x97   : > { %v1774_v37 = vpop.permute.xlu1 %227  ;;  %v1776_v38 = vpop.permute.xlu0 %217 }
  0x9a   : > { %643 = vperm.xlu1 %1557, %v1609_v1   ;;  %651 = vperm.xlu0 %1558, %v1628_v6  }
  0x9b   : > { %v1780_v39 = vpop.permute.xlu1 %237  ;;  %v1782_v40 = vpop.permute.xlu0 %232 }
  0x9e   : > { %647 = vperm.xlu1 %1557, %v1617_v3   ;;  %659 = vperm.xlu0 %1558, %v1636_v8  }
  0x9f   : > { %v1786_v41 = vpop.permute.xlu1 %247  ;;  %v1788_v42 = vpop.permute.xlu0 %242 }
  0xa2   : > { %655 = vperm.xlu1 %1557, %v1625_v5   ;;  %667 = vperm.xlu0 %1558, %v1644_v10  }
  0xa3   : > { %v1792_v43 = vpop.permute.xlu1 %257  ;;  %v1794_v44 = vpop.permute.xlu0 %252 }
  0xa6   : > { %663 = vperm.xlu1 %1557, %v1633_v7   ;;  %675 = vperm.xlu0 %1558, %v1652_v12  }
  0xa7   : > { %v1798_v45 = vpop.permute.xlu1 %267  ;;  %v1800_v46 = vpop.permute.xlu0 %262 }
  0xaa   : > { %671 = vperm.xlu1 %1557, %v1641_v9   ;;  %683 = vperm.xlu0 %1558, %v1660_v14  }
  0xab   : > { %v1804_v47 = vpop.permute.xlu1 %277  ;;  %v1806_v48 = vpop.permute.xlu0 %272 }
  0xae   : > { %679 = vperm.xlu1 %1557, %v1649_v11   ;;  %691 = vperm.xlu0 %1558, %v1668_v16  }
  0xaf   : > { %v1810_v49 = vpop.permute.xlu1 %287  ;;  %v1812_v50 = vpop.permute.xlu0 %282 }
  0xb2   : > { %687 = vperm.xlu1 %1557, %v1657_v13   ;;  %699 = vperm.xlu0 %1558, %v1676_v18  }
  0xb3   : > { %v1816_v51 = vpop.permute.xlu1 %297  ;;  %v1818_v52 = vpop.permute.xlu0 %292 }
  0xb4   : > { %2997 = vst [vmem:[#allocation2_spill] sm:$0xff] %v1816_v51 }
  0xb6   : > { %695 = vperm.xlu1 %1557, %v1665_v15   ;;  %707 = vperm.xlu0 %1558, %v1684_v20  }
  0xb7   : > { %v1822_v53 = vpop.permute.xlu1 %307  ;;  %v1824_v54 = vpop.permute.xlu0 %302 }
  0xb8   : > { %2998 = vst [vmem:[#allocation3_spill] sm:$0xff] %v1822_v53  ;;  %2999 = vst [vmem:[#allocation4_spill] sm:$0xff] %v1824_v54 }
  0xba   : > { %703 = vperm.xlu1 %1557, %v1673_v17   ;;  %715 = vperm.xlu0 %1558, %v1692_v22  }
  0xbb   : > { %v1828_v55 = vpop.permute.xlu1 %317  ;;  %v1830_v56 = vpop.permute.xlu0 %312 }
  0xbc   : > { %3000 = vst [vmem:[#allocation5_spill] sm:$0xff] %v1828_v55  ;;  %3001 = vst [vmem:[#allocation6_spill] sm:$0xff] %v1830_v56 }
  0xbe   : > { %711 = vperm.xlu1 %1557, %v1681_v19   ;;  %723 = vperm.xlu0 %1558, %v1700_v24  }
  0xbf   : > { %v1834_v58 = vpop.permute.xlu1 %327  ;;  %v1836_v59 = vpop.permute.xlu0 %322 }
  0xc0   : > { %3002 = vst [vmem:[#allocation7_spill] sm:$0xff] %v1834_v58  ;;  %3003 = vst [vmem:[#allocation8_spill] sm:$0xff] %v1836_v59 }
  0xc2   : > { %719 = vperm.xlu1 %1557, %v1689_v21   ;;  %731 = vperm.xlu0 %1558, %v1708_v26  }
  0xc3   : > { %v1842_v61 = vpop.permute.xlu1 %337  ;;  %v1844_v62 = vpop.permute.xlu0 %332 }
  0xc4   : > { %3004 = vst [vmem:[#allocation9_spill] sm:$0xff] %v1842_v61  ;;  %3005 = vst [vmem:[#allocation10_spill] sm:$0xff] %v1844_v62  ;;  %v1864_v62 = vrot.slane %v1852_v0, %v372_v63  ;;  %v1867_v61 = vrot.slane %v1857_v33, %v372_v63 }
  0xc6   : > { %727 = vperm.xlu1 %1557, %v1697_v23   ;;  %739 = vperm.xlu0 %1558, %v1716_v28  }
  0xc7   : > { %v1859_v36 = vpop.permute.xlu1 %347  ;;  %v1861_v57 = vpop.permute.xlu0 %342 }
  0xc8   : > { %3006 = vst [vmem:[#allocation11_spill] sm:$0xff] %v1859_v36  ;;  %3007 = vst [vmem:[#allocation12_spill] sm:$0xff] %v1861_v57 }
  0xca   : > { %735 = vperm.xlu1 %1557, %v1705_v25   ;;  %747 = vperm.xlu0 %1558, %v1724_v30  }
  0xcb   : > { %v1871_v59 = vpop.permute.xlu1 %357  ;;  %v353_v58 = vpop.permute.xlu0 %352 }
  0xcc   : > { %3008 = vst [vmem:[#allocation13_spill] sm:$0xff] %v1871_v59  ;;  %v1874_v56 = vmul.f32 %v1864_v62, %v353_v58  ;;  %v1877_v36 = vmul.f32 %v1867_v61, %v353_v58  ;;  %v1572_v59 = vmov 3  }
  0xce   : > { %743 = vperm.xlu1 %1557, %v1713_v27   ;;  %755 = vperm.xlu0 %1558, %v1732_v32  }
  0xcf   : > { %v1881_v57 = vpop.permute.xlu1 %367  ;;  %v363_v63 = vpop.permute.xlu0 %362 }
  0xd0   : > { %3009 = vst [vmem:[#allocation14_spill] sm:$0xff] %v1881_v57  ;;  %v1884_v55 = vmul.f32 %v1864_v62, %v363_v63  ;;  %v1887_v54 = vmul.f32 %v1867_v61, %v363_v63 }
  0xd2   : > { %751 = vperm.xlu1 %1557, %v1721_v29   ;;  %1559 = vset.pattern.permute.xlu0 %v1572_v59 }
  0xd3   : > { %831 = vperm.xlu0 %1559, %v1612_v2  }
  0xd4   : > { %v1891_v58 = vpop.permute.xlu1 %443  ;;  %v1893_v53 = vpop.permute.xlu0 %439 }
  0xd5   : > { %3010 = vst [vmem:[#allocation15_spill] sm:$0xff] %v1893_v53 }
  0xd6   : > { %759 = vperm.xlu1 %1557, %v1729_v31  }
  0xd7   : > { %843 = vperm.xlu0 %1559, %v1617_v3  }
  0xd8   : > { %v1897_v57 = vpop.permute.xlu1 %447  ;;  %v1899_v51 = vpop.permute.xlu0 %451 }
  0xda   : > { %1560 = vset.pattern.permute.xlu1 %v1572_v59 }
  0xdb   : > { %835 = vperm.xlu1 %1560, %v1620_v4   ;;  %851 = vperm.xlu0 %1559, %v1625_v5  }
  0xdc   : > { %v1903_v63 = vpop.permute.xlu1 %455  ;;  %v1905_v2 = vpop.permute.xlu0 %459 }
  0xdf   : > { %839 = vperm.xlu1 %1560, %v1609_v1   ;;  %859 = vperm.xlu0 %1559, %v1633_v7  }
  0xe0   : > { %v1909_v53 = vpop.permute.xlu1 %463  ;;  %v1911_v3 = vpop.permute.xlu0 %467 }
  0xe3   : > { %847 = vperm.xlu1 %1560, %v1628_v6   ;;  %867 = vperm.xlu0 %1559, %v1641_v9  }
  0xe4   : > { %v1915_v59 = vpop.permute.xlu1 %471  ;;  %v1917_v4 = vpop.permute.xlu0 %475 }
  0xe7   : > { %855 = vperm.xlu1 %1560, %v1636_v8   ;;  %875 = vperm.xlu0 %1559, %v1649_v11  }
  0xe8   : > { %v1921_v5 = vpop.permute.xlu1 %479  ;;  %v1923_v1 = vpop.permute.xlu0 %483 }
  0xeb   : > { %863 = vperm.xlu1 %1560, %v1644_v10   ;;  %883 = vperm.xlu0 %1559, %v1657_v13  }
  0xec   : > { %v1927_v7 = vpop.permute.xlu1 %487  ;;  %v1929_v6 = vpop.permute.xlu0 %491 }
  0xef   : > { %871 = vperm.xlu1 %1560, %v1652_v12   ;;  %891 = vperm.xlu0 %1559, %v1665_v15  }
  0xf0   : > { %v1933_v9 = vpop.permute.xlu1 %495  ;;  %v1935_v8 = vpop.permute.xlu0 %499 }
  0xf1   : > { %3011 = vst [vmem:[#allocation16_spill] sm:$0xff] %v1935_v8 }
  0xf3   : > { %879 = vperm.xlu1 %1560, %v1660_v14   ;;  %899 = vperm.xlu0 %1559, %v1673_v17  }
  0xf4   : > { %v1939_v11 = vpop.permute.xlu1 %503  ;;  %v1941_v10 = vpop.permute.xlu0 %507 }
  0xf5   : > { %3012 = vst [vmem:[#allocation17_spill] sm:$0xff] %v1941_v10 }
  0xf7   : > { %887 = vperm.xlu1 %1560, %v1668_v16   ;;  %907 = vperm.xlu0 %1559, %v1681_v19  }
  0xf8   : > { %v1945_v13 = vpop.permute.xlu1 %511  ;;  %v1947_v12 = vpop.permute.xlu0 %515 }
  0xf9   : > { %3013 = vst [vmem:[#allocation18_spill] sm:$0xff] %v1947_v12 }
  0xfb   : > { %895 = vperm.xlu1 %1560, %v1676_v18   ;;  %915 = vperm.xlu0 %1559, %v1689_v21   ;;  %v568_v21 = vsub.s32 1, %v1838_v60 }
  0xfc   : > { %v1951_v15 = vpop.permute.xlu1 %519  ;;  %v1953_v14 = vpop.permute.xlu0 %523 }
  0xfd   : > { %3014 = vst [vmem:[#allocation19_spill] sm:$0xff] %v1953_v14  ;;  %v764_v14 = vsub.s32 2, %v1838_v60 }
  0xff   : > { %903 = vperm.xlu1 %1560, %v1684_v20   ;;  %923 = vperm.xlu0 %1559, %v1697_v23  }
 0x100   : > { %v1957_v17 = vpop.permute.xlu1 %527  ;;  %v1959_v16 = vpop.permute.xlu0 %531 }
 0x101   : > { %3015 = vst [vmem:[#allocation20_spill] sm:$0xff] %v1959_v16  ;;  %v1975_v16 = vrot.slane %v1852_v0, %v568_v21 }
 0x103   : > { %911 = vperm.xlu1 %1560, %v1692_v22   ;;  %931 = vperm.xlu0 %1559, %v1705_v25   ;;  %v1978_v22 = vrot.slane %v1857_v33, %v568_v21 }
 0x104   : > { %v1963_v19 = vpop.permute.xlu1 %535  ;;  %v1965_v18 = vpop.permute.xlu0 %539 }
 0x105   : > { %3016 = vst [vmem:[#allocation21_spill] sm:$0xff] %v1965_v18 }
 0x107   : > { %919 = vperm.xlu1 %1560, %v1700_v24   ;;  %939 = vperm.xlu0 %1559, %v1713_v27  }
 0x108   : > { %v1970_v20 = vpop.permute.xlu1 %543  ;;  %v1972_v23 = vpop.permute.xlu0 %547 }
 0x109   : > { %3017 = vst [vmem:[#allocation22_spill] sm:$0xff] %v1972_v23 }
 0x10b   : > { %927 = vperm.xlu1 %1560, %v1708_v26   ;;  %947 = vperm.xlu0 %1559, %v1721_v29  }
 0x10c   : > { %v552_v25 = vpop.permute.xlu1 %551  ;;  %v1982_v18 = vpop.permute.xlu0 %555 }
 0x10d   : > { %3018 = vst [vmem:[#allocation23_spill] sm:$0xff] %v1982_v18  ;;  %v598_v24 = vmul.f32 %v1975_v16, %v552_v25  ;;  %v1199_v27 = vmul.f32 %v1978_v22, %v552_v25  ;;  %v571_v25 = vmul.f32 %v1975_v16, %v1891_v58 }
 0x10f   : > { %v1988_v23 = vadd.f32 %v598_v24, %v1874_v56  ;;  %v1991_v12 = vadd.f32 %v1199_v27, %v1877_v36  ;;  %935 = vperm.xlu1 %1560, %v1716_v28   ;;  %955 = vperm.xlu0 %1559, %v1729_v31   ;;  %v1172_v56 = vmul.f32 %v1978_v22, %v1891_v58 }
 0x110   : > { %v560_v26 = vpop.permute.xlu1 %559  ;;  %v1995_v29 = vpop.permute.xlu0 %563  ;;  %v2004_v36 = vrot.slane %v1852_v0, %v764_v14  ;;  %v2007_v28 = vrot.slane %v1857_v33, %v764_v14  ;;  %v375_v27 = vmul.f32 %v1864_v62, %v1776_v38  ;;  %v1104_v58 = vmul.f32 %v1867_v61, %v1776_v38 }
 0x111   : > { %3019 = vst [vmem:[#allocation24_spill] sm:$0xff] %v1988_v23  ;;  %3020 = vst [vmem:[#allocation25_spill] sm:$0xff] %v1991_v12  ;;  %v600_v21 = vmul.f32 %v1975_v16, %v560_v26  ;;  %v1201_v18 = vmul.f32 %v1978_v22, %v560_v26  ;;  %v572_v26 = vmul.f32 %v1975_v16, %v1897_v57 }
 0x112   : > { %3021 = vst [vmem:[#allocation26_spill] sm:$0xff] %v1995_v29  ;;  %v1173_v14 = vmul.f32 %v1978_v22, %v1897_v57  ;;  %v603_v29 = vadd.f32 %v571_v25, %v375_v27  ;;  %v378_v12 = vmul.f32 %v1864_v62, %v1782_v40  ;;  %v576_v27 = vmul.f32 %v1975_v16, %v1909_v53 }
 0x113   : > { %v2010_v31 = vadd.f32 %v600_v21, %v1884_v55  ;;  %v2013_v24 = vadd.f32 %v1201_v18, %v1887_v54  ;;  %943 = vperm.xlu1 %1560, %v1724_v30   ;;  %v376_v55 = vmul.f32 %v1864_v62, %v1768_v34  ;;  %v1105_v54 = vmul.f32 %v1867_v61, %v1768_v34 }
 0x114   : > { %v574_v30 = vmul.f32 %v1975_v16, %v1903_v63  ;;  %v1175_v18 = vmul.f32 %v1978_v22, %v1903_v63  ;;  %v1107_v34 = vmul.f32 %v1867_v61, %v1782_v40 }
 0x115   : > { %3022 = vst [vmem:[#allocation27_spill] sm:$0xff] %v2010_v31  ;;  %3023 = vst [vmem:[#allocation28_spill] sm:$0xff] %v2013_v24  ;;  %v2032_v21 = vpop.permute.xlu1 %635  ;;  %v640_v38 = vpop.permute.xlu0 %639  ;;  %v1204_v24 = vadd.f32 %v1172_v56, %v1104_v58  ;;  %v604_v23 = vadd.f32 %v572_v26, %v376_v55  ;;  %v1205_v10 = vadd.f32 %v1173_v14, %v1105_v54 }
 0x116   : > { %3024 = vst [vmem:[#allocation29_spill] sm:$0xff] %v2032_v21  ;;  %v767_v31 = vmul.f32 %v2004_v36, %v640_v38  ;;  %v1240_v57 = vmul.f32 %v2007_v28, %v640_v38  ;;  %v606_v25 = vadd.f32 %v574_v30, %v378_v12  ;;  %v1207_v56 = vadd.f32 %v1175_v18, %v1107_v34 }
 0x117   : > { %951 = vperm.xlu1 %1560, %v1732_v32   ;;  %v1177_v58 = vmul.f32 %v1978_v22, %v1909_v53  ;;  %v380_v12 = vmul.f32 %v1864_v62, %v1788_v42  ;;  %v578_v54 = vmul.f32 %v1975_v16, %v1915_v59 }
 0x118   : > { %v2041_v63 = vadd.f32 %v767_v31, %v603_v29  ;;  %v2043_v21 = vadd.f32 %v1240_v57, %v1204_v24  ;;  %v1109_v31 = vmul.f32 %v1867_v61, %v1788_v42 }
 0x119   : > { %v644_v38 = vpop.permute.xlu1 %643  ;;  %v652_v8 = vpop.permute.xlu0 %651  ;;  %v608_v57 = vadd.f32 %v576_v27, %v380_v12 }
 0x11a   : > { %3025 = vst [vmem:[#allocation30_spill] sm:$0xff] %v2041_v63  ;;  %3026 = vst [vmem:[#allocation31_spill] sm:$0xff] %v2043_v21  ;;  %v768_v40 = vmul.f32 %v2004_v36, %v644_v38  ;;  %v1241_v32 = vmul.f32 %v2007_v28, %v644_v38  ;;  %v770_v26 = vmul.f32 %v2004_v36, %v652_v8 }
 0x11b   : > { %v1243_v29 = vmul.f32 %v2007_v28, %v652_v8  ;;  %v1179_v8 = vmul.f32 %v1978_v22, %v1915_v59  ;;  %v1209_v34 = vadd.f32 %v1177_v58, %v1109_v31  ;;  %v580_v58 = vmul.f32 %v1975_v16, %v1921_v5 }
 0x11c   : > { %v2057_v24 = vadd.f32 %v768_v40, %v604_v23  ;;  %v2059_v14 = vadd.f32 %v1241_v32, %v1205_v10  ;;  %v2061_v53 = vadd.f32 %v770_v26, %v606_v25  ;;  %v382_v23 = vmul.f32 %v1864_v62, %v1794_v44 }
 0x11d   : > { %v2063_v55 = vadd.f32 %v1243_v29, %v1207_v56  ;;  %v2069_v30 = vpop.permute.xlu1 %647  ;;  %v660_v18 = vpop.permute.xlu0 %659  ;;  %v1111_v25 = vmul.f32 %v1867_v61, %v1794_v44  ;;  %v1181_v26 = vmul.f32 %v1978_v22, %v1921_v5  ;;  %v384_v44 = vmul.f32 %v1864_v62, %v1800_v46 }
 0x11e   : > { %3027 = vst [vmem:[#allocation32_spill] sm:$0xff] %v2057_v24  ;;  %3028 = vst [vmem:[#allocation33_spill] sm:$0xff] %v2059_v14  ;;  %v772_v42 = vmul.f32 %v2004_v36, %v660_v18  ;;  %v1245_v10 = vmul.f32 %v2007_v28, %v660_v18  ;;  %v610_v59 = vadd.f32 %v578_v54, %v382_v23  ;;  %v3054_v14 = vld [vmem:[#allocation7_spill] sm:$0xff] }
 0x11f   : > { %3029 = vst [vmem:[#allocation34_spill] sm:$0xff] %v2061_v53  ;;  %3030 = vst [vmem:[#allocation35_spill] sm:$0xff] %v2063_v55  ;;  %v1211_v40 = vadd.f32 %v1179_v8, %v1111_v25  ;;  %v1113_v31 = vmul.f32 %v1867_v61, %v1800_v46  ;;  %v2099_v18 = vmul.f32 %v1864_v62, %v1770_v35 }
 0x120   : > { %3031 = vst [vmem:[#allocation36_spill] sm:$0xff] %v2069_v30  ;;  %v2077_v56 = vadd.f32 %v772_v42, %v608_v57  ;;  %v2079_v38 = vadd.f32 %v1245_v10, %v1209_v34  ;;  %v582_v5 = vmul.f32 %v1975_v16, %v1927_v7  ;;  %v1183_v57 = vmul.f32 %v1978_v22, %v1927_v7 }
 0x121   : > { %v2081_v32 = vpop.permute.xlu1 %655  ;;  %v668_v27 = vpop.permute.xlu0 %667  ;;  %v612_v10 = vadd.f32 %v580_v58, %v384_v44  ;;  %v1213_v23 = vadd.f32 %v1181_v26, %v1113_v31  ;;  %v386_v7 = vmul.f32 %v1864_v62, %v1806_v48  ;;  %v2123_v58 = vmul.f32 %v1867_v61, %v1774_v37 }
 0x122   : > { %3032 = vst [vmem:[#allocation37_spill] sm:$0xff] %v2077_v56  ;;  %3033 = vst [vmem:[#allocation38_spill] sm:$0xff] %v2079_v38  ;;  %v774_v29 = vmul.f32 %v2004_v36, %v668_v27  ;;  %v1247_v12 = vmul.f32 %v2007_v28, %v668_v27  ;;  %v1115_v27 = vmul.f32 %v1867_v61, %v1806_v48  ;;  %v3047_v38 = vld [vmem:[#allocation3_spill] sm:$0xff] }
 0x123   : > { %3034 = vst [vmem:[#allocation39_spill] sm:$0xff] %v2081_v32  ;;  %v2127_v26 = vmul.f32 %v1864_v62, %v1780_v39  ;;  %v2139_v44 = vmul.f32 %v1864_v62, %v1786_v41  ;;  %v614_v48 = vadd.f32 %v582_v5, %v386_v7  ;;  %v2155_v5 = vmul.f32 %v1864_v62, %v1792_v43 }
 0x124   : > { %v2093_v54 = vadd.f32 %v774_v29, %v610_v59  ;;  %v2095_v8 = vadd.f32 %v1247_v12, %v1211_v40  ;;  %v2111_v59 = vmul.f32 %v1867_v61, %v1770_v35  ;;  %v2115_v40 = vmul.f32 %v1864_v62, %v1774_v37 }
 0x125   : > { %v2105_v34 = vpop.permute.xlu1 %663  ;;  %v676_v42 = vpop.permute.xlu0 %675  ;;  %v2135_v12 = vmul.f32 %v1867_v61, %v1780_v39  ;;  %v1215_v31 = vadd.f32 %v1183_v57, %v1115_v27  ;;  %v2159_v57 = vmul.f32 %v1867_v61, %v1792_v43  ;;  %v1117_v7 = vmul.f32 %v1867_v61, %v1812_v50 }
 0x126   : > { %3035 = vst [vmem:[#allocation40_spill] sm:$0xff] %v2093_v54  ;;  %3036 = vst [vmem:[#allocation41_spill] sm:$0xff] %v2095_v8  ;;  %v776_v46 = vmul.f32 %v2004_v36, %v676_v42  ;;  %v1249_v25 = vmul.f32 %v2007_v28, %v676_v42  ;;  %v584_v8 = vmul.f32 %v1975_v16, %v1933_v9 }
 0x127   : > { %3037 = vst [vmem:[#allocation42_spill] sm:$0xff] %v2105_v34  ;;  %v2179_v43 = vmul.f32 %v1864_v62, %v1804_v47  ;;  %v2219_v56 = vmul.f32 %v1864_v62, %v3047_v38  ;;  %v590_v24 = vmul.f32 %v1975_v16, %v1951_v15  ;;  %v3063_v34 = vld [vmem:[#allocation11_spill] sm:$0xff] }
 0x128   : > { %v2129_v35 = vadd.f32 %v776_v46, %v612_v10  ;;  %v2131_v29 = vadd.f32 %v1249_v25, %v1213_v23  ;;  %v1185_v10 = vmul.f32 %v1978_v22, %v1933_v9  ;;  %v2151_v46 = vmul.f32 %v1867_v61, %v1786_v41 }
 0x129   : > { %v2141_v37 = vpop.permute.xlu1 %671  ;;  %v684_v42 = vpop.permute.xlu0 %683  ;;  %v2163_v25 = vmul.f32 %v1864_v62, %v1798_v45  ;;  %v388_v9 = vmul.f32 %v1864_v62, %v1812_v50 }
 0x12a   : > { %3038 = vst [vmem:[#allocation43_spill] sm:$0xff] %v2129_v35  ;;  %3039 = vst [vmem:[#allocation44_spill] sm:$0xff] %v2131_v29  ;;  %v778_v23 = vmul.f32 %v2004_v36, %v684_v42  ;;  %v1251_v39 = vmul.f32 %v2007_v28, %v684_v42  ;;  %v2175_v42 = vmul.f32 %v1867_v61, %v1798_v45 }
 0x12b   : > { %3040 = vst [vmem:[#allocation45_spill] sm:$0xff] %v2141_v37  ;;  %v586_v29 = vmul.f32 %v1975_v16, %v1939_v11  ;;  %v1187_v35 = vmul.f32 %v1978_v22, %v1939_v11  ;;  %v390_v11 = vmul.f32 %v1864_v62, %v1818_v52 }
 0x12c   : > { %v2169_v41 = vadd.f32 %v778_v23, %v614_v48  ;;  %v2171_v27 = vadd.f32 %v1251_v39, %v1215_v31  ;;  %v616_v48 = vadd.f32 %v584_v8, %v388_v9  ;;  %v1217_v31 = vadd.f32 %v1185_v10, %v1117_v7  ;;  %v3044_v10 = vld [vmem:[#allocation2_spill] sm:$0xff] }
 0x12d   : > { %v2185_v54 = vpop.permute.xlu1 %679  ;;  %v692_v50 = vpop.permute.xlu0 %691  ;;  %v2191_v39 = vmul.f32 %v1867_v61, %v1804_v47  ;;  %v2203_v8 = vmul.f32 %v1867_v61, %v1810_v49  ;;  %v2207_v9 = vmul.f32 %v1864_v62, %v3044_v10 }
 0x12e   : > { %3041 = vst [vmem:[#allocation46_spill] sm:$0xff] %v2169_v41  ;;  %3042 = vst [vmem:[#allocation47_spill] sm:$0xff] %v2171_v27  ;;  %v780_v23 = vmul.f32 %v2004_v36, %v692_v50  ;;  %v1253_v45 = vmul.f32 %v2007_v28, %v692_v50  ;;  %v2195_v27 = vmul.f32 %v1864_v62, %v1810_v49 }
 0x12f   : > { %3043 = vst [vmem:[#allocation48_spill] sm:$0xff] %v2185_v54  ;;  %v1119_v41 = vmul.f32 %v1867_v61, %v1818_v52  ;;  %v2215_v50 = vmul.f32 %v1867_v61, %v3044_v10  ;;  %v618_v52 = vadd.f32 %v586_v29, %v390_v11  ;;  %v588_v54 = vmul.f32 %v1975_v16, %v1945_v13  ;;  %v3049_v10 = vld [vmem:[#allocation4_spill] sm:$0xff] }
 0x130   : > { %v2209_v47 = vadd.f32 %v780_v23, %v616_v48  ;;  %v2211_v7 = vadd.f32 %v1253_v45, %v1217_v31  ;;  %v1189_v48 = vmul.f32 %v1978_v22, %v1945_v13  ;;  %v2231_v45 = vmul.f32 %v1867_v61, %v3047_v38 }
 0x131   : > { %v1219_v55 = vadd.f32 %v1187_v35, %v1119_v41  ;;  %v2221_v49 = vpop.permute.xlu1 %687  ;;  %v700_v53 = vpop.permute.xlu0 %699  ;;  %v392_v35 = vmul.f32 %v1864_v62, %v3049_v10  ;;  %v1121_v29 = vmul.f32 %v1867_v61, %v3049_v10  ;;  %v3050_v41 = vld [vmem:[#allocation5_spill] sm:$0xff]  ;;  %v2255_v10 = vmul.f32 %v1864_v62, %v3054_v14 }
 0x132   : > { %3045 = vst [vmem:[#allocation2_spill] sm:$0xff] %v2209_v47  ;;  %3046 = vst [vmem:[#allocation49_spill] sm:$0xff] %v2211_v7  ;;  %v782_v31 = vmul.f32 %v2004_v36, %v700_v53  ;;  %v1255_v23 = vmul.f32 %v2007_v28, %v700_v53  ;;  %v2239_v11 = vmul.f32 %v1864_v62, %v3050_v41  ;;  %v3051_v7 = vld [vmem:[#allocation6_spill] sm:$0xff] }
 0x133   : > { %3048 = vst [vmem:[#allocation3_spill] sm:$0xff] %v2221_v49  ;;  %v2243_v13 = vmul.f32 %v1867_v61, %v3050_v41  ;;  %v394_v53 = vmul.f32 %v1864_v62, %v3051_v7  ;;  %v1123_v49 = vmul.f32 %v1867_v61, %v3051_v7  ;;  %v1191_v41 = vmul.f32 %v1978_v22, %v1951_v15  ;;  %v3057_v15 = vld [vmem:[#allocation9_spill] sm:$0xff] }
 0x134   : > { %v2247_v47 = vadd.f32 %v782_v31, %v618_v52  ;;  %v2249_v38 = vadd.f32 %v1255_v23, %v1219_v55  ;;  %v620_v52 = vadd.f32 %v588_v54, %v392_v35  ;;  %v1221_v31 = vadd.f32 %v1189_v48, %v1121_v29  ;;  %v3060_v48 = vld [vmem:[#allocation10_spill] sm:$0xff] }
 0x135   : > { %v2261_v21 = vpop.permute.xlu1 %695  ;;  %v708_v63 = vpop.permute.xlu0 %707  ;;  %v2267_v7 = vmul.f32 %v1867_v61, %v3054_v14  ;;  %v2279_v54 = vmul.f32 %v1867_v61, %v3057_v15  ;;  %v1127_v29 = vmul.f32 %v1867_v61, %v3060_v48  ;;  %v622_v32 = vadd.f32 %v590_v24, %v394_v53  ;;  %v3067_v53 = vld [vmem:[#allocation13_spill] sm:$0xff] }
 0x136   : > { %3052 = vst [vmem:[#allocation4_spill] sm:$0xff] %v2247_v47  ;;  %3053 = vst [vmem:[#allocation5_spill] sm:$0xff] %v2249_v38  ;;  %v784_v55 = vmul.f32 %v2004_v36, %v708_v63  ;;  %v1257_v23 = vmul.f32 %v2007_v28, %v708_v63  ;;  %v3056_v38 = vld [vmem:[#allocation8_spill] sm:$0xff]  ;;  %v398_v63 = vmul.f32 %v1864_v62, %v3060_v48 }
 0x137   : > { %3055 = vst [vmem:[#allocation6_spill] sm:$0xff] %v2261_v21  ;;  %v396_v47 = vmul.f32 %v1864_v62, %v3056_v38  ;;  %v1125_v37 = vmul.f32 %v1867_v61, %v3056_v38  ;;  %v2275_v21 = vmul.f32 %v1864_v62, %v3057_v15  ;;  %3059 = vst [vmem:[#allocation8_spill] sm:$0xff] %v2279_v54  ;;  %v3066_v48 = vld [vmem:[#allocation12_spill] sm:$0xff] }
 0x138   : > { %v2283_v35 = vadd.f32 %v784_v55, %v620_v52  ;;  %v2285_v14 = vadd.f32 %v1257_v23, %v1221_v31  ;;  %v2291_v38 = vmul.f32 %v1864_v62, %v3063_v34  ;;  %v592_v54 = vmul.f32 %v1975_v16, %v1957_v17 }
 0x139   : > { %3058 = vst [vmem:[#allocation7_spill] sm:$0xff] %v2275_v21  ;;  %v1223_v21 = vadd.f32 %v1191_v41, %v1123_v49  ;;  %v2293_v30 = vpop.permute.xlu1 %703  ;;  %v716_v15 = vpop.permute.xlu0 %715  ;;  %v1193_v52 = vmul.f32 %v1978_v22, %v1957_v17  ;;  %v2303_v23 = vmul.f32 %v1867_v61, %v3063_v34  ;;  %v400_v24 = vmul.f32 %v1864_v62, %v3066_v48 }
 0x13a   : > { %3061 = vst [vmem:[#allocation9_spill] sm:$0xff] %v2283_v35  ;;  %3062 = vst [vmem:[#allocation10_spill] sm:$0xff] %v2285_v14  ;;  %v786_v31 = vmul.f32 %v2004_v36, %v716_v15  ;;  %v1259_v55 = vmul.f32 %v2007_v28, %v716_v15  ;;  %v1129_v49 = vmul.f32 %v1867_v61, %v3066_v48  ;;  %v960_v34 = vsub.s32 3, %v1838_v60  ;;  %v3071_v35 = vld [vmem:[#allocation15_spill] sm:$0xff] }
 0x13b   : > { %3064 = vst [vmem:[#allocation11_spill] sm:$0xff] %v2293_v30  ;;  %3065 = vst [vmem:[#allocation50_spill] sm:$0xff] %v2303_v23  ;;  %v2311_v41 = vmul.f32 %v1864_v62, %v3067_v53  ;;  %v2315_v17 = vmul.f32 %v1867_v61, %v3067_v53  ;;  %v570_v30 = vmul.f32 %v1975_v16, %v3071_v35 }
 0x13c   : > { %v2317_v14 = vadd.f32 %v786_v31, %v622_v32  ;;  %v2319_v15 = vadd.f32 %v1259_v55, %v1223_v21  ;;  %v1171_v48 = vmul.f32 %v1978_v22, %v3071_v35  ;;  %v594_v23 = vmul.f32 %v1975_v16, %v1963_v19 }
 0x13d   : > { %3068 = vst [vmem:[#allocation12_spill] sm:$0xff] %v2311_v41  ;;  %v1195_v41 = vmul.f32 %v1978_v22, %v1963_v19  ;;  %v2330_v53 = vpop.permute.xlu1 %711  ;;  %v724_v32 = vpop.permute.xlu0 %723  ;;  %v624_v31 = vadd.f32 %v592_v54, %v396_v47  ;;  %v1225_v21 = vadd.f32 %v1193_v52, %v1125_v37  ;;  %v573_v19 = vmul.f32 %v1975_v16, %v1899_v51 }
 0x13e   : > { %3069 = vst [vmem:[#allocation13_spill] sm:$0xff] %v2317_v14  ;;  %3070 = vst [vmem:[#allocation51_spill] sm:$0xff] %v2319_v15  ;;  %v788_v55 = vmul.f32 %v2004_v36, %v724_v32  ;;  %v1261_v60 = vmul.f32 %v2007_v28, %v724_v32  ;;  %v3073_v15 = vld [vmem:[#allocation14_spill] sm:$0xff]  ;;  %v2351_v54 = vrot.slane %v1852_v0, %v960_v34 }
 0x13f   : > { %3072 = vst [vmem:[#allocation15_spill] sm:$0xff] %v2330_v53  ;;  %v2336_v14 = vmul.f32 %v1864_v62, %v3073_v15  ;;  %v2340_v35 = vmul.f32 %v1867_v61, %v3073_v15  ;;  %v1174_v53 = vmul.f32 %v1978_v22, %v1899_v51  ;;  %v2354_v62 = vrot.slane %v1857_v33, %v960_v34 }
 0x140   : > { %v2346_v47 = vadd.f32 %v788_v55, %v624_v31  ;;  %v2348_v37 = vadd.f32 %v1261_v60, %v1225_v21  ;;  %v2357_v52 = vadd.f32 %v570_v30, %v2099_v18  ;;  %v2360_v61 = vadd.f32 %v1171_v48, %v2111_v59 }
 0x141   : > { %3074 = vst [vmem:[#allocation14_spill] sm:$0xff] %v2340_v35  ;;  %v626_v15 = vadd.f32 %v594_v23, %v398_v63  ;;  %v1227_v32 = vadd.f32 %v1195_v41, %v1127_v29  ;;  %v2362_v35 = vpop.permute.xlu1 %719  ;;  %v732_v51 = vpop.permute.xlu0 %731  ;;  %v596_v31 = vmul.f32 %v1975_v16, %v1970_v20  ;;  %v1197_v0 = vmul.f32 %v1978_v22, %v1970_v20 }
 0x142   : > { %v790_v33 = vmul.f32 %v2004_v36, %v732_v51  ;;  %v1263_v34 = vmul.f32 %v2007_v28, %v732_v51  ;;  %v2371_v30 = vadd.f32 %v573_v19, %v2115_v40  ;;  %v2374_v18 = vadd.f32 %v1174_v53, %v2123_v58  ;;  %v3075_v51 = vld [vmem:[#allocation16_spill] sm:$0xff] }
 0x143   : > { %v575_v59 = vmul.f32 %v1975_v16, %v1905_v2  ;;  %v1176_v63 = vmul.f32 %v1978_v22, %v1905_v2  ;;  %v577_v29 = vmul.f32 %v1975_v16, %v1911_v3  ;;  %v1178_v20 = vmul.f32 %v1978_v22, %v1911_v3 }
 0x144   : > { %v2384_v23 = vadd.f32 %v790_v33, %v626_v15  ;;  %v2386_v41 = vadd.f32 %v1263_v34, %v1227_v32  ;;  %v579_v40 = vmul.f32 %v1975_v16, %v1917_v4  ;;  %v1180_v58 = vmul.f32 %v1978_v22, %v1917_v4 }
 0x145   : > { %v581_v48 = vmul.f32 %v1975_v16, %v1923_v1  ;;  %v1182_v2 = vmul.f32 %v1978_v22, %v1923_v1  ;;  %v2396_v53 = vpop.permute.xlu1 %727  ;;  %v740_v3 = vpop.permute.xlu0 %739  ;;  %v628_v21 = vadd.f32 %v596_v31, %v400_v24  ;;  %v1229_v55 = vadd.f32 %v1197_v0, %v1129_v49 }
 0x146   : > { %v792_v60 = vmul.f32 %v2004_v36, %v740_v3  ;;  %v1265_v19 = vmul.f32 %v2007_v28, %v740_v3  ;;  %v2401_v15 = vadd.f32 %v575_v59, %v2127_v26  ;;  %v2404_v4 = vadd.f32 %v1176_v63, %v2135_v12 }
 0x147   : > { %v583_v32 = vmul.f32 %v1975_v16, %v1929_v6  ;;  %v1184_v1 = vmul.f32 %v1978_v22, %v1929_v6  ;;  %v585_v24 = vmul.f32 %v1975_v16, %v3075_v51  ;;  %v1186_v49 = vmul.f32 %v1978_v22, %v3075_v51 }
 0x148   : > { %v2414_v31 = vadd.f32 %v792_v60, %v628_v21  ;;  %v2416_v0 = vadd.f32 %v1265_v19, %v1229_v55  ;;  %v2423_v26 = vadd.f32 %v577_v29, %v2139_v44  ;;  %v2426_v12 = vadd.f32 %v1178_v20, %v2151_v46  ;;  %v3084_v60 = vld [vmem:[#allocation19_spill] sm:$0xff] }
 0x149   : > { %v2429_v6 = vadd.f32 %v579_v40, %v2155_v5  ;;  %v2432_v33 = vadd.f32 %v1180_v58, %v2159_v57  ;;  %v2434_v34 = vpop.permute.xlu1 %735  ;;  %v748_v59 = vpop.permute.xlu0 %747  ;;  %v2437_v63 = vadd.f32 %v581_v48, %v2163_v25  ;;  %v2440_v3 = vadd.f32 %v1182_v2, %v2175_v42  ;;  %v3078_v57 = vld [vmem:[#allocation17_spill] sm:$0xff]  ;;  %v3079_v58 = vld [vmem:[#allocation24_spill] sm:$0xff] }
 0x14a   : > { %3076 = vst [vmem:[#allocation16_spill] sm:$0xff] %v2414_v31  ;;  %3077 = vst [vmem:[#allocation52_spill] sm:$0xff] %v2416_v0  ;;  %v794_v44 = vmul.f32 %v2004_v36, %v748_v59  ;;  %v1267_v46 = vmul.f32 %v2007_v28, %v748_v59  ;;  %v2445_v29 = vadd.f32 %v583_v32, %v2179_v43  ;;  %v3081_v43 = vld [vmem:[#allocation25_spill] sm:$0xff] }
 0x14b   : > { %v2448_v5 = vadd.f32 %v1184_v1, %v2191_v39  ;;  %v587_v20 = vmul.f32 %v1975_v16, %v3078_v57  ;;  %v1188_v25 = vmul.f32 %v1978_v22, %v3078_v57  ;;  %v2456_v42 = vadd.f32 %v585_v24, %v2195_v27  ;;  %v3083_v39 = vld [vmem:[#allocation18_spill] sm:$0xff]  ;;  %v3085_v1 = vld [vmem:[#allocation20_spill] sm:$0xff]  ;;  %v3086_v57 = vld [vmem:[#allocation29_spill] sm:$0xff] }
 0x14c   : > { %v2459_v40 = vadd.f32 %v1186_v49, %v2203_v8  ;;  %v2462_v48 = vadd.f32 %v794_v44, %v3079_v58  ;;  %v2465_v2 = vadd.f32 %v1267_v46, %v3081_v43  ;;  %v589_v21 = vmul.f32 %v1975_v16, %v3083_v39 }
 0x14d   : > { %v1190_v55 = vmul.f32 %v1978_v22, %v3083_v39  ;;  %v591_v27 = vmul.f32 %v1975_v16, %v3084_v60  ;;  %v1192_v8 = vmul.f32 %v1978_v22, %v3084_v60  ;;  %v2475_v19 = vpop.permute.xlu1 %743  ;;  %v756_v32 = vpop.permute.xlu0 %755  ;;  %v593_v51 = vmul.f32 %v1975_v16, %v3085_v1  ;;  %v3087_v39 = vld [vmem:[#allocation21_spill] sm:$0xff] }
 0x14e   : > { %3080 = vst [vmem:[#allocation17_spill] sm:$0xff] %v2462_v48  ;;  %3082 = vst [vmem:[#allocation24_spill] sm:$0xff] %v2465_v2  ;;  %v1194_v24 = vmul.f32 %v1978_v22, %v3085_v1  ;;  %v796_v49 = vmul.f32 %v2004_v36, %v756_v32  ;;  %v1269_v59 = vmul.f32 %v2007_v28, %v756_v32 }
 0x14f   : > { %v2484_v44 = vadd.f32 %v587_v20, %v2207_v9  ;;  %v2487_v46 = vadd.f32 %v1188_v25, %v2215_v50  ;;  %v766_v58 = vmul.f32 %v2004_v36, %v3086_v57  ;;  %v1239_v43 = vmul.f32 %v2007_v28, %v3086_v57  ;;  %v3088_v20 = vld [vmem:[#allocation27_spill] sm:$0xff]  ;;  %v3090_v50 = vld [vmem:[#allocation28_spill] sm:$0xff] }
 0x150   : > { %v595_v60 = vmul.f32 %v1975_v16, %v3087_v39  ;;  %v1196_v9 = vmul.f32 %v1978_v22, %v3087_v39  ;;  %v2503_v32 = vadd.f32 %v796_v49, %v3088_v20  ;;  %v2506_v25 = vadd.f32 %v1269_v59, %v3090_v50  ;;  %v3092_v39 = vld [vmem:[#allocation36_spill] sm:$0xff] }
 0x151   : > { %v2509_v1 = vadd.f32 %v589_v21, %v2219_v56  ;;  %v2512_v57 = vadd.f32 %v1190_v55, %v2231_v45  ;;  %v2515_v2 = vadd.f32 %v591_v27, %v2239_v11  ;;  %v2518_v48 = vadd.f32 %v1192_v8, %v2243_v13  ;;  %v2520_v0 = vpop.permute.xlu1 %751  ;;  %v3093_v27 = vld [vmem:[#allocation7_spill] sm:$0xff] }
 0x152   : > { %3089 = vst [vmem:[#allocation25_spill] sm:$0xff] %v2503_v32  ;;  %3091 = vst [vmem:[#allocation18_spill] sm:$0xff] %v2506_v25  ;;  %v2523_v49 = vadd.f32 %v593_v51, %v2255_v10  ;;  %v2526_v59 = vadd.f32 %v1194_v24, %v2267_v7  ;;  %v769_v56 = vmul.f32 %v2004_v36, %v3092_v39  ;;  %v832_v21 = vpop.permute.xlu0 %831  ;;  %v3094_v7 = vld [vmem:[#allocation8_spill] sm:$0xff]  ;;  %v3095_v24 = vld [vmem:[#allocation22_spill] sm:$0xff] }
 0x153   : > { %v1242_v45 = vmul.f32 %v2007_v28, %v3092_v39  ;;  %v798_v11 = vadd.f32 %v766_v58, %v2357_v52  ;;  %v1271_v13 = vadd.f32 %v1239_v43, %v2360_v61  ;;  %v962_v55 = vmul.f32 %v2351_v54, %v832_v21  ;;  %v2550_v52 = vld [vmem:[%s2962_s2] ss:$0 sm:$0xff]  ;;  %v3096_v61 = vld [vmem:[#allocation23_spill] sm:$0xff] }
 0x154   : > { %v1307_v10 = vmul.f32 %v2354_v62, %v832_v21  ;;  %v2538_v8 = vadd.f32 %v595_v60, %v3093_v27  ;;  %v2541_v51 = vadd.f32 %v1196_v9, %v3094_v7  ;;  %v597_v20 = vmul.f32 %v1975_v16, %v3095_v24  ;;  %v3097_v21 = vld [vmem:[#allocation26_spill] sm:$0xff] }
 0x155   : > { %v1198_v50 = vmul.f32 %v1978_v22, %v3095_v24  ;;  %v599_v58 = vmul.f32 %v1975_v16, %v3096_v61  ;;  %v1200_v43 = vmul.f32 %v1978_v22, %v3096_v61  ;;  %v994_v60 = vadd.f32 %v962_v55, %v798_v11  ;;  %v2556_v39 = vpop.permute.xlu1 %759 }
 0x156   : > { %v1339_v9 = vadd.f32 %v1307_v10, %v1271_v13  ;;  %v601_v27 = vmul.f32 %v1975_v16, %v3097_v21  ;;  %v1202_v7 = vmul.f32 %v1978_v22, %v3097_v21  ;;  %v801_v24 = vadd.f32 %v769_v56, %v2371_v30  ;;  %v844_v11 = vpop.permute.xlu0 %843  ;;  %v3100_v21 = vld [vmem:[#allocation12_spill] sm:$0xff] }
 0x157   : > { %v1274_v25 = vadd.f32 %v1242_v45, %v2374_v18  ;;  %v1032_v13 = vadd.f32 %v2550_v52, %v994_v60  ;;  %v965_v16 = vmul.f32 %v2351_v54, %v844_v11  ;;  %v1310_v22 = vmul.f32 %v2354_v62, %v844_v11  ;;  %v3098_v18 = vld [vmem:[#allocation50_spill] sm:$0xff]  ;;  %v3099_v45 = vld [vmem:[#allocation39_spill] sm:$0xff] }
 0x158   : > { %v1371_v55 = vadd.f32 %v2550_v52, %v1339_v9  ;;  %v2574_v30 = vadd.f32 %v597_v20, %v2291_v38  ;;  %v2577_v56 = vadd.f32 %v1198_v50, %v3098_v18  ;;  %v771_v10 = vmul.f32 %v2004_v36, %v3099_v45  ;;  %v3101_v11 = vld [vmem:[#allocation14_spill] sm:$0xff] }
 0x159   : > { %v1244_v61 = vmul.f32 %v2007_v28, %v3099_v45  ;;  %v2584_v60 = vadd.f32 %v599_v58, %v3100_v21  ;;  %v2587_v9 = vadd.f32 %v1200_v43, %v2315_v17  ;;  %1065 = vst.msk [vmem:[%s2567_s29] sm:$0xff] %vm1064_vm0, %v1032_v13  ;;  %v997_v38 = vadd.f32 %v965_v16, %v801_v24  ;;  %v3102_v45 = vld [vmem:[#allocation42_spill] sm:$0xff]  ;;  %v3103_v21 = vld [vmem:[#allocation45_spill] sm:$0xff] }
 0x15a   : > { %1506 = vst.msk [vmem:[%s2567_s29 + $0x10] sm:$0xff] %vm1064_vm0, %v1371_v55  ;;  %v1342_v20 = vadd.f32 %v1310_v22, %v1274_v25  ;;  %v2594_v50 = vadd.f32 %v601_v27, %v2336_v14  ;;  %v2597_v18 = vadd.f32 %v1202_v7, %v3101_v11  ;;  %v773_v58 = vmul.f32 %v2004_v36, %v3102_v45  ;;  %v836_v43 = vpop.permute.xlu1 %835  ;;  %v852_v27 = vpop.permute.xlu0 %851 }
 0x15b   : > { %v1246_v17 = vmul.f32 %v2007_v28, %v3102_v45  ;;  %v1035_v13 = vadd.f32 %v2550_v52, %v997_v38  ;;  %v963_v25 = vmul.f32 %v2351_v54, %v836_v43  ;;  %v1308_v14 = vmul.f32 %v2354_v62, %v836_v43  ;;  %v3105_v43 = vld [vmem:[#allocation31_spill] sm:$0xff] }
 0x15c   : > { %v1374_v24 = vadd.f32 %v2550_v52, %v1342_v20  ;;  %v803_v7 = vadd.f32 %v771_v10, %v2401_v15  ;;  %v1276_v55 = vadd.f32 %v1244_v61, %v2404_v4  ;;  %v967_v16 = vmul.f32 %v2351_v54, %v852_v27  ;;  %v3104_v20 = vld [vmem:[#allocation30_spill] sm:$0xff] }
 0x15d   : > { %v1312_v22 = vmul.f32 %v2354_v62, %v852_v27  ;;  %v775_v11 = vmul.f32 %v2004_v36, %v3103_v21  ;;  %v1248_v38 = vmul.f32 %v2007_v28, %v3103_v21  ;;  %1068 = vst.msk [vmem:[%s2567_s29 + $0x28] sm:$0xff] %vm1064_vm0, %v1035_v13  ;;  %v995_v45 = vadd.f32 %v963_v25, %v3104_v20  ;;  %v3108_v20 = vld [vmem:[#allocation48_spill] sm:$0xff] }
 0x15e   : > { %1509 = vst.msk [vmem:[%s2567_s29 + $0x38] sm:$0xff] %vm1064_vm0, %v1374_v24  ;;  %v1340_v15 = vadd.f32 %v1308_v14, %v3105_v43  ;;  %v805_v4 = vadd.f32 %v773_v58, %v2423_v26  ;;  %v1278_v10 = vadd.f32 %v1246_v17, %v2426_v12  ;;  %v999_v61 = vadd.f32 %v967_v16, %v803_v7  ;;  %v840_v32 = vpop.permute.xlu1 %839  ;;  %v860_v25 = vpop.permute.xlu0 %859 }
 0x15f   : > { %v1344_v27 = vadd.f32 %v1312_v22, %v1276_v55  ;;  %v1033_v31 = vadd.f32 %v2550_v52, %v995_v45  ;;  %v964_v13 = vmul.f32 %v2351_v54, %v840_v32  ;;  %v1309_v24 = vmul.f32 %v2354_v62, %v840_v32  ;;  %v3106_v55 = vld [vmem:[#allocation32_spill] sm:$0xff]  ;;  %v3107_v32 = vld [vmem:[#allocation33_spill] sm:$0xff] }
 0x160   : > { %v1372_v21 = vadd.f32 %v2550_v52, %v1340_v15  ;;  %v1037_v26 = vadd.f32 %v2550_v52, %v999_v61  ;;  %v969_v12 = vmul.f32 %v2351_v54, %v860_v25  ;;  %v1314_v17 = vmul.f32 %v2354_v62, %v860_v25 }
 0x161   : > { %v1376_v58 = vadd.f32 %v2550_v52, %v1344_v27  ;;  %v807_v14 = vadd.f32 %v775_v11, %v2429_v6  ;;  %v1280_v7 = vadd.f32 %v1248_v38, %v2432_v33  ;;  %1066 = vst.msk [vmem:[%s2567_s29 + $0x8] sm:$0xff] %vm1064_vm0, %v1033_v31  ;;  %v996_v16 = vadd.f32 %v964_v13, %v3106_v55 }
 0x162   : > { %1507 = vst.msk [vmem:[%s2567_s29 + $0x18] sm:$0xff] %vm1064_vm0, %v1372_v21  ;;  %v1341_v22 = vadd.f32 %v1309_v24, %v3107_v32  ;;  %v777_v45 = vmul.f32 %v2004_v36, %v3108_v20  ;;  %v1250_v43 = vmul.f32 %v2007_v28, %v3108_v20  ;;  %1070 = vst.msk [vmem:[%s2567_s29 + $0x48] sm:$0xff] %vm1064_vm0, %v1037_v26  ;;  %v848_v33 = vpop.permute.xlu1 %847  ;;  %v868_v27 = vpop.permute.xlu0 %867 }
 0x163   : > { %1511 = vst.msk [vmem:[%s2567_s29 + $0x58] sm:$0xff] %vm1064_vm0, %v1376_v58  ;;  %v1001_v6 = vadd.f32 %v969_v12, %v805_v4  ;;  %v1346_v31 = vadd.f32 %v1314_v17, %v1278_v10  ;;  %v1034_v11 = vadd.f32 %v2550_v52, %v996_v16  ;;  %v966_v15 = vmul.f32 %v2351_v54, %v848_v33  ;;  %v3109_v10 = vld [vmem:[#allocation3_spill] sm:$0xff]  ;;  %v3110_v58 = vld [vmem:[#allocation34_spill] sm:$0xff] }
 0x164   : > { %v1373_v38 = vadd.f32 %v2550_v52, %v1341_v22  ;;  %v1311_v61 = vmul.f32 %v2354_v62, %v848_v33  ;;  %v971_v24 = vmul.f32 %v2351_v54, %v868_v27  ;;  %v1316_v4 = vmul.f32 %v2354_v62, %v868_v27  ;;  %v3111_v17 = vld [vmem:[#allocation35_spill] sm:$0xff] }
 0x165   : > { %v1039_v21 = vadd.f32 %v2550_v52, %v1001_v6  ;;  %v1378_v13 = vadd.f32 %v2550_v52, %v1346_v31  ;;  %v779_v25 = vmul.f32 %v2004_v36, %v3109_v10  ;;  %v1252_v26 = vmul.f32 %v2007_v28, %v3109_v10  ;;  %1067 = vst.msk [vmem:[%s2567_s29 + $0x20] sm:$0xff] %vm1064_vm0, %v1034_v11 }
 0x166   : > { %1508 = vst.msk [vmem:[%s2567_s29 + $0x30] sm:$0xff] %vm1064_vm0, %v1373_v38  ;;  %v998_v12 = vadd.f32 %v966_v15, %v3110_v58  ;;  %v1343_v55 = vadd.f32 %v1311_v61, %v3111_v17  ;;  %v809_v16 = vadd.f32 %v777_v45, %v2437_v63  ;;  %v1282_v32 = vadd.f32 %v1250_v43, %v2440_v3  ;;  %v856_v6 = vpop.permute.xlu1 %855  ;;  %v876_v3 = vpop.permute.xlu0 %875  ;;  %v3112_v61 = vld [vmem:[#allocation37_spill] sm:$0xff] }
 0x167   : > { %1072 = vst.msk [vmem:[%s2567_s29 + $0x68] sm:$0xff] %vm1064_vm0, %v1039_v21  ;;  %1513 = vst.msk [vmem:[%s2567_s29 + $0x78] sm:$0xff] %vm1064_vm0, %v1378_v13  ;;  %v1003_v22 = vadd.f32 %v971_v24, %v807_v14  ;;  %v1348_v20 = vadd.f32 %v1316_v4, %v1280_v7  ;;  %v968_v11 = vmul.f32 %v2351_v54, %v856_v6  ;;  %v3113_v21 = vld [vmem:[#allocation38_spill] sm:$0xff] }
 0x168   : > { %v1036_v31 = vadd.f32 %v2550_v52, %v998_v12  ;;  %v1375_v33 = vadd.f32 %v2550_v52, %v1343_v55  ;;  %v1313_v63 = vmul.f32 %v2354_v62, %v856_v6  ;;  %v973_v38 = vmul.f32 %v2351_v54, %v876_v3  ;;  %v3114_v24 = vld [vmem:[#allocation6_spill] sm:$0xff] }
 0x169   : > { %v1041_v45 = vadd.f32 %v2550_v52, %v1003_v22  ;;  %v1380_v43 = vadd.f32 %v2550_v52, %v1348_v20  ;;  %v1318_v14 = vmul.f32 %v2354_v62, %v876_v3  ;;  %v811_v7 = vadd.f32 %v779_v25, %v2445_v29  ;;  %v3117_v3 = vld [vmem:[#allocation41_spill] sm:$0xff] }
 0x16a   : > { %v1284_v15 = vadd.f32 %v1252_v26, %v2448_v5  ;;  %1069 = vst.msk [vmem:[%s2567_s29 + $0x40] sm:$0xff] %vm1064_vm0, %v1036_v31  ;;  %1510 = vst.msk [vmem:[%s2567_s29 + $0x50] sm:$0xff] %vm1064_vm0, %v1375_v33  ;;  %v1000_v27 = vadd.f32 %v968_v11, %v3112_v61  ;;  %v1345_v13 = vadd.f32 %v1313_v63, %v3113_v21  ;;  %v864_v25 = vpop.permute.xlu1 %863  ;;  %v884_v55 = vpop.permute.xlu0 %883  ;;  %v3116_v11 = vld [vmem:[#allocation40_spill] sm:$0xff] }
 0x16b   : > { %v781_v4 = vmul.f32 %v2004_v36, %v3114_v24  ;;  %v1254_v10 = vmul.f32 %v2007_v28, %v3114_v24  ;;  %1074 = vst.msk [vmem:[%s2567_s29 + $0x88] sm:$0xff] %vm1064_vm0, %v1041_v45  ;;  %1515 = vst.msk [vmem:[%s2567_s29 + $0x98] sm:$0xff] %vm1064_vm0, %v1380_v43  ;;  %v1005_v29 = vadd.f32 %v973_v38, %v809_v16 }
 0x16c   : > { %v1350_v5 = vadd.f32 %v1318_v14, %v1282_v32  ;;  %v1038_v26 = vadd.f32 %v2550_v52, %v1000_v27  ;;  %v1377_v58 = vadd.f32 %v2550_v52, %v1345_v13  ;;  %v970_v12 = vmul.f32 %v2351_v54, %v864_v25  ;;  %v3115_v32 = vld [vmem:[#allocation11_spill] sm:$0xff] }
 0x16d   : > { %v1315_v17 = vmul.f32 %v2354_v62, %v864_v25  ;;  %v1043_v22 = vadd.f32 %v2550_v52, %v1005_v29  ;;  %v975_v6 = vmul.f32 %v2351_v54, %v884_v55  ;;  %v1320_v16 = vmul.f32 %v2354_v62, %v884_v55  ;;  %v3118_v25 = vld [vmem:[#allocation43_spill] sm:$0xff] }
 0x16e   : > { %v1382_v20 = vadd.f32 %v2550_v52, %v1350_v5  ;;  %v783_v31 = vmul.f32 %v2004_v36, %v3115_v32  ;;  %v1256_v33 = vmul.f32 %v2007_v28, %v3115_v32  ;;  %1071 = vst.msk [vmem:[%s2567_s29 + $0x60] sm:$0xff] %vm1064_vm0, %v1038_v26  ;;  %1512 = vst.msk [vmem:[%s2567_s29 + $0x70] sm:$0xff] %vm1064_vm0, %v1377_v58  ;;  %v872_v27 = vpop.permute.xlu1 %871  ;;  %v3119_v58 = vld [vmem:[#allocation44_spill] sm:$0xff] }
 0x16f   : > { %v1002_v63 = vadd.f32 %v970_v12, %v3116_v11  ;;  %v1347_v45 = vadd.f32 %v1315_v17, %v3117_v3  ;;  %v813_v43 = vadd.f32 %v781_v4, %v2456_v42  ;;  %v1286_v38 = vadd.f32 %v1254_v10, %v2459_v40  ;;  %1076 = vst.msk [vmem:[%s2567_s29 + $0xa8] sm:$0xff] %vm1064_vm0, %v1043_v22  ;;  %v892_v40 = vpop.permute.xlu0 %891  ;;  %v3120_v17 = vld [vmem:[#allocation15_spill] sm:$0xff] }
 0x170   : > { %1517 = vst.msk [vmem:[%s2567_s29 + $0xb8] sm:$0xff] %vm1064_vm0, %v1382_v20  ;;  %v1007_v14 = vadd.f32 %v975_v6, %v811_v7  ;;  %v1352_v61 = vadd.f32 %v1320_v16, %v1284_v15  ;;  %v972_v24 = vmul.f32 %v2351_v54, %v872_v27  ;;  %v1317_v42 = vmul.f32 %v2354_v62, %v872_v27  ;;  %v3122_v27 = vld [vmem:[#allocation47_spill] sm:$0xff] }
 0x171   : > { %v1040_v21 = vadd.f32 %v2550_v52, %v1002_v63  ;;  %v1379_v13 = vadd.f32 %v2550_v52, %v1347_v45  ;;  %v977_v29 = vmul.f32 %v2351_v54, %v892_v40  ;;  %v1322_v7 = vmul.f32 %v2354_v62, %v892_v40 }
 0x172   : > { %v1045_v4 = vadd.f32 %v2550_v52, %v1007_v14  ;;  %v1384_v10 = vadd.f32 %v2550_v52, %v1352_v61  ;;  %v815_v15 = vadd.f32 %v783_v31, %v2484_v44  ;;  %v1288_v5 = vadd.f32 %v1256_v33, %v2487_v46  ;;  %v880_v20 = vpop.permute.xlu1 %879  ;;  %v3121_v14 = vld [vmem:[#allocation46_spill] sm:$0xff] }
 0x173   : > { %1073 = vst.msk [vmem:[%s2567_s29 + $0x80] sm:$0xff] %vm1064_vm0, %v1040_v21  ;;  %1514 = vst.msk [vmem:[%s2567_s29 + $0x90] sm:$0xff] %vm1064_vm0, %v1379_v13  ;;  %v1004_v26 = vadd.f32 %v972_v24, %v3118_v25  ;;  %v1349_v12 = vadd.f32 %v1317_v42, %v3119_v58  ;;  %v785_v55 = vmul.f32 %v2004_v36, %v3120_v17  ;;  %v900_v33 = vpop.permute.xlu0 %899 }
 0x174   : > { %v1258_v22 = vmul.f32 %v2007_v28, %v3120_v17  ;;  %1078 = vst.msk [vmem:[%s2567_s29 + $0xc8] sm:$0xff] %vm1064_vm0, %v1045_v4  ;;  %1519 = vst.msk [vmem:[%s2567_s29 + $0xd8] sm:$0xff] %vm1064_vm0, %v1384_v10  ;;  %v1009_v44 = vadd.f32 %v977_v29, %v813_v43  ;;  %v1354_v46 = vadd.f32 %v1322_v7, %v1286_v38 }
 0x175   : > { %v1042_v6 = vadd.f32 %v2550_v52, %v1004_v26  ;;  %v1381_v16 = vadd.f32 %v2550_v52, %v1349_v12  ;;  %v974_v32 = vmul.f32 %v2351_v54, %v880_v20  ;;  %v1319_v31 = vmul.f32 %v2354_v62, %v880_v20  ;;  %v3123_v12 = vld [vmem:[#allocation2_spill] sm:$0xff] }
 0x176   : > { %v1047_v11 = vadd.f32 %v2550_v52, %v1009_v44  ;;  %v1386_v63 = vadd.f32 %v2550_v52, %v1354_v46  ;;  %v979_v3 = vmul.f32 %v2351_v54, %v900_v33  ;;  %v1324_v45 = vmul.f32 %v2354_v62, %v900_v33  ;;  %v888_v40 = vpop.permute.xlu1 %887 }
 0x177   : > { %v787_v43 = vmul.f32 %v2004_v36, %v2362_v35  ;;  %v1260_v38 = vmul.f32 %v2007_v28, %v2362_v35  ;;  %1075 = vst.msk [vmem:[%s2567_s29 + $0xa0] sm:$0xff] %vm1064_vm0, %v1042_v6  ;;  %1516 = vst.msk [vmem:[%s2567_s29 + $0xb0] sm:$0xff] %vm1064_vm0, %v1381_v16  ;;  %v1006_v61 = vadd.f32 %v974_v32, %v3121_v14 }
 0x178   : > { %v1351_v21 = vadd.f32 %v1319_v31, %v3122_v27  ;;  %v817_v13 = vadd.f32 %v785_v55, %v2509_v1  ;;  %v1290_v24 = vadd.f32 %v1258_v22, %v2512_v57  ;;  %1080 = vst.msk [vmem:[%s2567_s29 + $0xe8] sm:$0xff] %vm1064_vm0, %v1047_v11  ;;  %1521 = vst.msk [vmem:[%s2567_s29 + $0xf8] sm:$0xff] %vm1064_vm0, %v1386_v63  ;;  %v908_v57 = vpop.permute.xlu0 %907  ;;  %v3124_v55 = vld [vmem:[#allocation49_spill] sm:$0xff] }
 0x179   : > { %v1011_v42 = vadd.f32 %v979_v3, %v815_v15  ;;  %v1356_v35 = vadd.f32 %v1324_v45, %v1288_v5  ;;  %v1044_v4 = vadd.f32 %v2550_v52, %v1006_v61  ;;  %v976_v29 = vmul.f32 %v2351_v54, %v888_v40  ;;  %v3126_v61 = vld [vmem:[#allocation5_spill] sm:$0xff] }
 0x17a   : > { %v1383_v10 = vadd.f32 %v2550_v52, %v1351_v21  ;;  %v1321_v1 = vmul.f32 %v2354_v62, %v888_v40  ;;  %v981_v26 = vmul.f32 %v2351_v54, %v908_v57  ;;  %v1326_v15 = vmul.f32 %v2354_v62, %v908_v57  ;;  %v896_v20 = vpop.permute.xlu1 %895 }
 0x17b   : > { %v1049_v7 = vadd.f32 %v2550_v52, %v1011_v42  ;;  %v1388_v25 = vadd.f32 %v2550_v52, %v1356_v35  ;;  %v819_v5 = vadd.f32 %v787_v43, %v2515_v2  ;;  %v1292_v58 = vadd.f32 %v1260_v38, %v2518_v48  ;;  %1077 = vst.msk [vmem:[%s2567_s29 + $0xc0] sm:$0xff] %vm1064_vm0, %v1044_v4  ;;  %v3125_v38 = vld [vmem:[#allocation4_spill] sm:$0xff] }
 0x17c   : > { %1518 = vst.msk [vmem:[%s2567_s29 + $0xd0] sm:$0xff] %vm1064_vm0, %v1383_v10  ;;  %v1008_v17 = vadd.f32 %v976_v29, %v3123_v12  ;;  %v1353_v22 = vadd.f32 %v1321_v1, %v3124_v55  ;;  %v789_v44 = vmul.f32 %v2004_v36, %v2396_v53  ;;  %v1262_v46 = vmul.f32 %v2007_v28, %v2396_v53  ;;  %v916_v53 = vpop.permute.xlu0 %915 }
 0x17d   : > { %1082 = vst.msk [vmem:[%s2567_s29 + $0x108] sm:$0xff] %vm1064_vm0, %v1049_v7  ;;  %1523 = vst.msk [vmem:[%s2567_s29 + $0x118] sm:$0xff] %vm1064_vm0, %v1388_v25  ;;  %v1013_v48 = vadd.f32 %v981_v26, %v817_v13  ;;  %v1358_v2 = vadd.f32 %v1326_v15, %v1290_v24  ;;  %v978_v32 = vmul.f32 %v2351_v54, %v896_v20  ;;  %v3127_v26 = vld [vmem:[#allocation9_spill] sm:$0xff] }
 0x17e   : > { %v1046_v6 = vadd.f32 %v2550_v52, %v1008_v17  ;;  %v1385_v16 = vadd.f32 %v2550_v52, %v1353_v22  ;;  %v1323_v31 = vmul.f32 %v2354_v62, %v896_v20  ;;  %v983_v63 = vmul.f32 %v2351_v54, %v916_v53  ;;  %v904_v42 = vpop.permute.xlu1 %903 }
 0x17f   : > { %v1051_v33 = vadd.f32 %v2550_v52, %v1013_v48  ;;  %v1390_v11 = vadd.f32 %v2550_v52, %v1358_v2  ;;  %v1328_v3 = vmul.f32 %v2354_v62, %v916_v53  ;;  %v791_v45 = vmul.f32 %v2004_v36, %v2434_v34  ;;  %v3129_v53 = vld [vmem:[#allocation13_spill] sm:$0xff] }
 0x180   : > { %v1264_v43 = vmul.f32 %v2007_v28, %v2434_v34  ;;  %1079 = vst.msk [vmem:[%s2567_s29 + $0xe0] sm:$0xff] %vm1064_vm0, %v1046_v6  ;;  %1520 = vst.msk [vmem:[%s2567_s29 + $0xf0] sm:$0xff] %vm1064_vm0, %v1385_v16  ;;  %v1010_v14 = vadd.f32 %v978_v32, %v3125_v38  ;;  %v1355_v27 = vadd.f32 %v1323_v31, %v3126_v61 }
 0x181   : > { %v821_v21 = vadd.f32 %v789_v44, %v2523_v49  ;;  %v1294_v13 = vadd.f32 %v1262_v46, %v2526_v59  ;;  %1084 = vst.msk [vmem:[%s2567_s29 + $0x128] sm:$0xff] %vm1064_vm0, %v1051_v33  ;;  %1525 = vst.msk [vmem:[%s2567_s29 + $0x138] sm:$0xff] %vm1064_vm0, %v1390_v11  ;;  %v1015_v24 = vadd.f32 %v983_v63, %v819_v5  ;;  %v924_v59 = vpop.permute.xlu0 %923  ;;  %v3128_v5 = vld [vmem:[#allocation10_spill] sm:$0xff]  ;;  %v3130_v11 = vld [vmem:[#allocation51_spill] sm:$0xff] }
 0x182   : > { %v1360_v34 = vadd.f32 %v1328_v3, %v1292_v58  ;;  %v1048_v35 = vadd.f32 %v2550_v52, %v1010_v14  ;;  %v1387_v40 = vadd.f32 %v2550_v52, %v1355_v27  ;;  %v980_v4 = vmul.f32 %v2351_v54, %v904_v42  ;;  %v912_v55 = vpop.permute.xlu1 %911 }
 0x183   : > { %v1325_v49 = vmul.f32 %v2354_v62, %v904_v42  ;;  %v1053_v10 = vadd.f32 %v2550_v52, %v1015_v24  ;;  %v985_v1 = vmul.f32 %v2351_v54, %v924_v59  ;;  %v1330_v57 = vmul.f32 %v2354_v62, %v924_v59 }
 0x184   : > { %v1392_v29 = vadd.f32 %v2550_v52, %v1360_v34  ;;  %v823_v7 = vadd.f32 %v791_v45, %v2538_v8  ;;  %v1296_v25 = vadd.f32 %v1264_v43, %v2541_v51  ;;  %1081 = vst.msk [vmem:[%s2567_s29 + $0x100] sm:$0xff] %vm1064_vm0, %v1048_v35  ;;  %1522 = vst.msk [vmem:[%s2567_s29 + $0x110] sm:$0xff] %vm1064_vm0, %v1387_v40 }
 0x185   : > { %v1012_v15 = vadd.f32 %v980_v4, %v3127_v26  ;;  %v1357_v58 = vadd.f32 %v1325_v49, %v3128_v5  ;;  %v793_v12 = vmul.f32 %v2004_v36, %v2475_v19  ;;  %v1266_v17 = vmul.f32 %v2007_v28, %v2475_v19  ;;  %1086 = vst.msk [vmem:[%s2567_s29 + $0x148] sm:$0xff] %vm1064_vm0, %v1053_v10  ;;  %v932_v19 = vpop.permute.xlu0 %931 }
 0x186   : > { %1527 = vst.msk [vmem:[%s2567_s29 + $0x158] sm:$0xff] %vm1064_vm0, %v1392_v29  ;;  %v1017_v8 = vadd.f32 %v985_v1, %v821_v21  ;;  %v1362_v51 = vadd.f32 %v1330_v57, %v1294_v13  ;;  %v982_v46 = vmul.f32 %v2351_v54, %v912_v55  ;;  %v1327_v48 = vmul.f32 %v2354_v62, %v912_v55  ;;  %v920_v38 = vpop.permute.xlu1 %919 }
 0x187   : > { %v1050_v22 = vadd.f32 %v2550_v52, %v1012_v15  ;;  %v1389_v44 = vadd.f32 %v2550_v52, %v1357_v58  ;;  %v987_v6 = vmul.f32 %v2351_v54, %v932_v19  ;;  %v1332_v16 = vmul.f32 %v2354_v62, %v932_v19  ;;  %v3132_v19 = vld [vmem:[#allocation52_spill] sm:$0xff] }
 0x188   : > { %v1055_v2 = vadd.f32 %v2550_v52, %v1017_v8  ;;  %v1394_v20 = vadd.f32 %v2550_v52, %v1362_v51  ;;  %v795_v32 = vmul.f32 %v2004_v36, %v2520_v0  ;;  %v1268_v31 = vmul.f32 %v2007_v28, %v2520_v0 }
 0x189   : > { %1083 = vst.msk [vmem:[%s2567_s29 + $0x120] sm:$0xff] %vm1064_vm0, %v1050_v22  ;;  %1524 = vst.msk [vmem:[%s2567_s29 + $0x130] sm:$0xff] %vm1064_vm0, %v1389_v44  ;;  %v1014_v33 = vadd.f32 %v982_v46, %v3129_v53  ;;  %v1359_v63 = vadd.f32 %v1327_v48, %v3130_v11  ;;  %v825_v3 = vadd.f32 %v793_v12, %v2574_v30  ;;  %v3131_v46 = vld [vmem:[#allocation16_spill] sm:$0xff] }
 0x18a   : > { %v1298_v45 = vadd.f32 %v1266_v17, %v2577_v56  ;;  %1088 = vst.msk [vmem:[%s2567_s29 + $0x168] sm:$0xff] %vm1064_vm0, %v1055_v2  ;;  %1529 = vst.msk [vmem:[%s2567_s29 + $0x178] sm:$0xff] %vm1064_vm0, %v1394_v20  ;;  %v1019_v43 = vadd.f32 %v987_v6, %v823_v7  ;;  %v1364_v0 = vadd.f32 %v1332_v16, %v1296_v25  ;;  %v940_v56 = vpop.permute.xlu0 %939  ;;  %v928_v10 = vpop.permute.xlu1 %927 }
 0x18b   : > { %v1052_v14 = vadd.f32 %v2550_v52, %v1014_v33  ;;  %v1391_v61 = vadd.f32 %v2550_v52, %v1359_v63  ;;  %v984_v27 = vmul.f32 %v2351_v54, %v920_v38  ;;  %v1329_v30 = vmul.f32 %v2354_v62, %v920_v38 }
 0x18c   : > { %v1057_v21 = vadd.f32 %v2550_v52, %v1019_v43  ;;  %v1396_v13 = vadd.f32 %v2550_v52, %v1364_v0  ;;  %v989_v24 = vmul.f32 %v2351_v54, %v940_v56  ;;  %v1334_v34 = vmul.f32 %v2354_v62, %v940_v56  ;;  %v3134_v43 = vld [vmem:[#allocation24_spill] sm:$0xff]  ;;  %v3135_v56 = vld [vmem:[#allocation25_spill] sm:$0xff] }
 0x18d   : > { %v827_v42 = vadd.f32 %v795_v32, %v2584_v60  ;;  %v1300_v35 = vadd.f32 %v1268_v31, %v2587_v9  ;;  %1085 = vst.msk [vmem:[%s2567_s29 + $0x140] sm:$0xff] %vm1064_vm0, %v1052_v14  ;;  %1526 = vst.msk [vmem:[%s2567_s29 + $0x150] sm:$0xff] %vm1064_vm0, %v1391_v61  ;;  %v1016_v40 = vadd.f32 %v984_v27, %v2346_v47 }
 0x18e   : > { %v1361_v4 = vadd.f32 %v1329_v30, %v2348_v37  ;;  %v797_v49 = vmul.f32 %v2004_v36, %v2556_v39  ;;  %v1270_v59 = vmul.f32 %v2007_v28, %v2556_v39  ;;  %1090 = vst.msk [vmem:[%s2567_s29 + $0x188] sm:$0xff] %vm1064_vm0, %v1057_v21  ;;  %1531 = vst.msk [vmem:[%s2567_s29 + $0x198] sm:$0xff] %vm1064_vm0, %v1396_v13  ;;  %v948_v1 = vpop.permute.xlu0 %947  ;;  %v936_v17 = vpop.permute.xlu1 %935  ;;  %v3136_v13 = vld [vmem:[#allocation18_spill] sm:$0xff] }
 0x18f   : > { %v1021_v60 = vadd.f32 %v989_v24, %v825_v3  ;;  %v1366_v9 = vadd.f32 %v1334_v34, %v1298_v45  ;;  %v1054_v47 = vadd.f32 %v2550_v52, %v1016_v40  ;;  %v986_v36 = vmul.f32 %v2351_v54, %v928_v10  ;;  %v3133_v3 = vld [vmem:[#allocation17_spill] sm:$0xff] }
 0x190   : > { %v1393_v37 = vadd.f32 %v2550_v52, %v1361_v4  ;;  %v1331_v29 = vmul.f32 %v2354_v62, %v928_v10  ;;  %v991_v57 = vmul.f32 %v2351_v54, %v948_v1  ;;  %v1336_v7 = vmul.f32 %v2354_v62, %v948_v1 }
 0x191   : > { %v1059_v28 = vadd.f32 %v2550_v52, %v1021_v60  ;;  %v1398_v39 = vadd.f32 %v2550_v52, %v1366_v9  ;;  %1087 = vst.msk [vmem:[%s2567_s29 + $0x160] sm:$0xff] %vm1064_vm0, %v1054_v47  ;;  %v1018_v25 = vadd.f32 %v986_v36, %v2384_v23  ;;  %v829_v15 = vadd.f32 %v797_v49, %v2594_v50 }
 0x192   : > { %1528 = vst.msk [vmem:[%s2567_s29 + $0x170] sm:$0xff] %vm1064_vm0, %v1393_v37  ;;  %v1363_v26 = vadd.f32 %v1331_v29, %v2386_v41  ;;  %v1302_v5 = vadd.f32 %v1270_v59, %v2597_v18  ;;  %v1023_v58 = vadd.f32 %v991_v57, %v827_v42  ;;  %v1368_v12 = vadd.f32 %v1336_v7, %v1300_v35  ;;  %v956_v51 = vpop.permute.xlu0 %955  ;;  %v944_v16 = vpop.permute.xlu1 %943 }
 0x193   : > { %1092 = vst.msk [vmem:[%s2567_s29 + $0x1a8] sm:$0xff] %vm1064_vm0, %v1059_v28  ;;  %1533 = vst.msk [vmem:[%s2567_s29 + $0x1b8] sm:$0xff] %vm1064_vm0, %v1398_v39  ;;  %v1056_v8 = vadd.f32 %v2550_v52, %v1018_v25  ;;  %v988_v41 = vmul.f32 %v2351_v54, %v936_v17  ;;  %v1333_v50 = vmul.f32 %v2354_v62, %v936_v17 }
 0x194   : > { %v1395_v23 = vadd.f32 %v2550_v52, %v1363_v26  ;;  %v1061_v18 = vadd.f32 %v2550_v52, %v1023_v58  ;;  %v1400_v55 = vadd.f32 %v2550_v52, %v1368_v12  ;;  %v993_v22 = vmul.f32 %v2351_v54, %v956_v51 }
 0x195   : > { %v1338_v44 = vmul.f32 %v2354_v62, %v956_v51  ;;  %1089 = vst.msk [vmem:[%s2567_s29 + $0x180] sm:$0xff] %vm1064_vm0, %v1056_v8  ;;  %v1020_v48 = vadd.f32 %v988_v41, %v3131_v46  ;;  %v1365_v2 = vadd.f32 %v1333_v50, %v3132_v19  ;;  %v990_v53 = vmul.f32 %v2351_v54, %v944_v16 }
 0x196   : > { %1530 = vst.msk [vmem:[%s2567_s29 + $0x190] sm:$0xff] %vm1064_vm0, %v1395_v23  ;;  %1094 = vst.msk [vmem:[%s2567_s29 + $0x1c8] sm:$0xff] %vm1064_vm0, %v1061_v18  ;;  %v1025_v20 = vadd.f32 %v993_v22, %v829_v15  ;;  %v1335_v33 = vmul.f32 %v2354_v62, %v944_v16  ;;  %v952_v38 = vpop.permute.xlu1 %951 }
 0x197   : > { %1535 = vst.msk [vmem:[%s2567_s29 + $0x1d8] sm:$0xff] %vm1064_vm0, %v1400_v55  ;;  %v1370_v6 = vadd.f32 %v1338_v44, %v1302_v5  ;;  %v1058_v32 = vadd.f32 %v2550_v52, %v1020_v48  ;;  %v1397_v31 = vadd.f32 %v2550_v52, %v1365_v2  ;;  %v1022_v45 = vadd.f32 %v990_v53, %v3133_v3 }
 0x198   : > { %v1063_v11 = vadd.f32 %v2550_v52, %v1025_v20  ;;  %v1367_v0 = vadd.f32 %v1335_v33, %v3134_v43  ;;  %v992_v27 = vmul.f32 %v2351_v54, %v952_v38  ;;  %v1337_v30 = vmul.f32 %v2354_v62, %v952_v38 }
 0x199   : > { %v1402_v63 = vadd.f32 %v2550_v52, %v1370_v6  ;;  %1091 = vst.msk [vmem:[%s2567_s29 + $0x1a0] sm:$0xff] %vm1064_vm0, %v1058_v32  ;;  %1532 = vst.msk [vmem:[%s2567_s29 + $0x1b0] sm:$0xff] %vm1064_vm0, %v1397_v31  ;;  %v1060_v14 = vadd.f32 %v2550_v52, %v1022_v45 }
 0x19a   : > { %1096 = vst.msk [vmem:[%s2567_s29 + $0x1e8] sm:$0xff] %vm1064_vm0, %v1063_v11  ;;  %v1399_v61 = vadd.f32 %v2550_v52, %v1367_v0  ;;  %v1024_v21 = vadd.f32 %v992_v27, %v3135_v56  ;;  %v1369_v24 = vadd.f32 %v1337_v30, %v3136_v13 }
 0x19b   : > { %1537 = vst.msk [vmem:[%s2567_s29 + $0x1f8] sm:$0xff] %vm1064_vm0, %v1402_v63  ;;  %1093 = vst.msk [vmem:[%s2567_s29 + $0x1c0] sm:$0xff] %vm1064_vm0, %v1060_v14 }
 0x19c   : > { %1534 = vst.msk [vmem:[%s2567_s29 + $0x1d0] sm:$0xff] %vm1064_vm0, %v1399_v61  ;;  %v1062_v34 = vadd.f32 %v2550_v52, %v1024_v21  ;;  %v1401_v42 = vadd.f32 %v2550_v52, %v1369_v24 }
 0x19e   : > { %1095 = vst.msk [vmem:[%s2567_s29 + $0x1e0] sm:$0xff] %vm1064_vm0, %v1062_v34  ;;  %1536 = vst.msk [vmem:[%s2567_s29 + $0x1f0] sm:$0xff] %vm1064_vm0, %v1401_v42 }
 0x19f PF: > { %s13_s12 = sadd.s32 1, %s1567_s12  }
 0x1a0   : > { %p10_p5 = scmp.ge.s32.totalorder %s13_s12, 4  }
 0x1a2   :  { %12 = sbr.rel (!%p10_p5) target bundleno = 1 (0x1), region = 64 }

</bundles_post_ra>
